<compile_context>
chip_gen: v7x
topology: tpu7x:2x2x1
jax: 0.10.0
libtpu: 0.0.40
codegen_flags: <defaults>
</compile_context>

<pallas_src>
import functools

import jax
import jax.numpy as jnp
from jax.experimental import pallas as pl
from jax.experimental.pallas import tpu as pltpu


EXPANSION = 4
BN_EPS = 1e-5
LANES = 128


def _round_up(x, m):
    return (x + m - 1) // m * m


def _vmem_limit_bytes():
    # v5e/v6e: 128 MiB physical -> 64 MiB scoped; v7x: 64 MiB -> 32 MiB.
    try:
        cap = int(pltpu.get_tpu_info().vmem_capacity_bytes)
        return max(32 * 1024 * 1024, min(cap // 2, 64 * 1024 * 1024))
    except Exception:
        return 32 * 1024 * 1024


# ----------------------------------------------------------------------------
# Pointwise (1x1 conv) + folded BN bias (+ fused skip branch) (+ ReLU)
# ----------------------------------------------------------------------------
def _pointwise_kernel(apply_relu, skip_kind, x_ref, *refs):
    if skip_kind == "proj":
        w_ref, b_ref, xs_ref, wsk_ref, bsk_ref, o_ref = refs
    elif skip_kind == "identity":
        w_ref, b_ref, xs_ref, o_ref = refs
    else:
        w_ref, b_ref, o_ref = refs

    acc = jnp.dot(x_ref[...], w_ref[...], preferred_element_type=jnp.float32)
    acc = acc + b_ref[...]
    if skip_kind == "proj":
        acc = acc + jnp.dot(xs_ref[...], wsk_ref[...],
                            preferred_element_type=jnp.float32)
        acc = acc + bsk_ref[...]
    elif skip_kind == "identity":
        acc = acc + xs_ref[...].astype(jnp.float32)
    if apply_relu:
        acc = jnp.maximum(acc, 0.0)
    o_ref[...] = acc.astype(o_ref.dtype)


def _pick_row_tile(M, tmax):
    """Largest tile <= tmax that divides M, is a multiple of 8 and (when
    possible) leaves >= 2 grid steps; falls back to a padded tile."""
    if M <= 16:
        return M
    cap = min(tmax, M // 2 if M % 2 == 0 else M)
    best = 0
    for d in range(8, cap + 1, 8):
        if M % d == 0:
            best = d
    if best:
        return best
    return M if M <= tmax else tmax


def _pick_cout_tile(C):
    if C <= 512:
        return C
    for t in (512, 384, 256, 128):
        if C % t == 0:
            return t
    return C


def pointwise_bn(x2d, w, bias, *, skip=None, skip_w=None, skip_b=None,
                 relu=True, tm_max=1024):
    """x2d: (M, Cin) flattened NHW x C (lane-dense Cin). w: (Cin, Cout)."""
    M, Cin = x2d.shape
    Cout = w.shape[1]

    tm = _pick_row_tile(M, tm_max)
    Mp = _round_up(M, tm)
    if Mp != M:
        x2d = jnp.pad(x2d, ((0, Mp - M), (0, 0)))
        if skip is not None:
            skip = jnp.pad(skip, ((0, Mp - M), (0, 0)))
    tn = _pick_cout_tile(Cout)
    grid = (Mp // tm, Cout // tn)

    in_specs = [
        pl.BlockSpec((tm, Cin), lambda i, j: (i, 0)),
        pl.BlockSpec((Cin, tn), lambda i, j: (0, j)),
        pl.BlockSpec((1, tn), lambda i, j: (0, j)),
    ]
    args = [x2d, w, bias.reshape(1, -1)]
    flops = 2 * Mp * Cin * Cout

    if skip is None:
        skip_kind = "none"
    elif skip_w is None:
        skip_kind = "identity"
        in_specs.append(pl.BlockSpec((tm, tn), lambda i, j: (i, j)))
        args.append(skip)
    else:
        skip_kind = "proj"
        Csk = skip.shape[1]
        in_specs += [
            pl.BlockSpec((tm, Csk), lambda i, j: (i, 0)),
            pl.BlockSpec((Csk, tn), lambda i, j: (0, j)),
            pl.BlockSpec((1, tn), lambda i, j: (0, j)),
        ]
        args += [skip, skip_w, skip_b.reshape(1, -1)]
        flops += 2 * Mp * Csk * Cout

    bytes_accessed = int(sum(int(a.size) * a.dtype.itemsize for a in args)
                         + Mp * Cout * x2d.dtype.itemsize)

    out = pl.pallas_call(
        functools.partial(_pointwise_kernel, relu, skip_kind),
        out_shape=jax.ShapeDtypeStruct((Mp, Cout), x2d.dtype),
        grid=grid,
        in_specs=in_specs,
        out_specs=pl.BlockSpec((tm, tn), lambda i, j: (i, j)),
        compiler_params=pltpu.CompilerParams(
            dimension_semantics=("parallel", "parallel"),
            vmem_limit_bytes=_vmem_limit_bytes()),
        cost_estimate=pl.CostEstimate(flops=int(flops), transcendentals=0,
                                      bytes_accessed=bytes_accessed),
    )(*args)
    return out[:M]


# ----------------------------------------------------------------------------
# Fused: conv1 (1x1) + bn1 + relu  -->  conv3x3 (stride, 'same') + bn2 + relu
# Grid over (batch, output-row blocks); halo rows of the ORIGINAL input are
# fetched by a double-buffered manual DMA; zero padding is created in VMEM.
# Optionally also emits the strided skip slice x[:, ::s, ::s, :].
# ----------------------------------------------------------------------------
def conv1_conv3x3_fused(x, w1, b1, w2, b2, stride, *, emit_skip=False,
                        row_tile_target=32):
    """x: (N,H,W,cin_p) NHWC; w1: (cin_p, mid_p); w2: (KH,KW,mid_p,mid_p)."""
    N, H, W, cin_p = x.shape
    KH, KW, _, mid_p = w2.shape
    ph, pw = KH // 2, KW // 2
    OH = (H + 2 * ph - KH) // stride + 1
    OW = (W + 2 * pw - KW) // stride + 1
    Wp = W + 2 * pw
    cdt = x.dtype

    # --- row-block size: divisor of OH, prefer >= 2 blocks when cheap -------
    target = min(row_tile_target, OH)
    divs = [d for d in range(1, OH + 1)
            if OH % d == 0 and (d == OH or d * stride >= ph)]
    fits = [d for d in divs if d <= target]
    row_tile = max(fits) if fits else OH
    multi = [d for d in fits if d < OH]
    if multi and max(multi) * 2 >= row_tile:
        row_tile = max(multi)

    rts = row_tile * stride
    halo = (row_tile - 1) * stride + KH
    n_row = OH // row_tile

    # static DMA geometry (first / last blocks clamp to the image)
    first_rows = min(halo - ph, H)
    if n_row > 1:
        last_lo = (n_row - 1) * rts - ph            # >= 0 given rts >= ph
        last_rows = min(last_lo + halo, H) - last_lo
    else:
        last_lo = last_rows = None

    w2r = w2.reshape(KH, KW * mid_p, mid_p)          # kw-major rows

    def kernel(*refs):
        if emit_skip:
            (x_hbm, w1_ref, b1_ref, w2_ref, b2_ref,
             o_ref, sk_ref, xbuf, mid_buf, sem) = refs
        else:
            (x_hbm, w1_ref, b1_ref, w2_ref, b2_ref,
             o_ref, xbuf, mid_buf, sem) = refs

        n = pl.program_id(0)
        j = pl.program_id(1)

        def dma(jb, slot, start):
            def go(cp):
                cp.start() if start else cp.wait()

            @pl.when(jb == 0)
            def _():
                go(pltpu.make_async_copy(
                    x_hbm.at[n, pl.ds(0, first_rows)],
                    xbuf.at[slot, pl.ds(ph, first_rows)],
                    sem.at[slot]))

            if n_row > 1:
                @pl.when(jb == n_row - 1)
                def _():
                    go(pltpu.make_async_copy(
                        x_hbm.at[n, pl.ds(last_lo, last_rows)],
                        xbuf.at[slot, pl.ds(0, last_rows)],
                        sem.at[slot]))

            if n_row > 2:
                @pl.when(jnp.logical_and(jb > 0, jb < n_row - 1))
                def _():
                    go(pltpu.make_async_copy(
                        x_hbm.at[n, pl.ds(jb * rts - ph, halo)],
                        xbuf.at[slot],
                        sem.at[slot]))

        slot = j % 2
        # First block of each image was not prefetched: start it here.
        @pl.when(j == 0)
        def _():
            pltpu.make_async_copy(
                x_hbm.at[n, pl.ds(0, first_rows)],
                xbuf.at[slot, pl.ds(ph, first_rows)],
                sem.at[slot]).start()
        dma(j, slot, False)                 # wait for current block
        # Prefetch next row block of the same image into the other slot.
        # TODO(synk): also prefetch the first block of this core's next image.
        @pl.when(j + 1 < n_row)
        def _():
            dma(j + 1, (j + 1) % 2, True)

        xt = xbuf[slot]                                    # (halo, W, cin_p)

        if emit_skip:
            sk = jax.lax.slice(
                xt, (ph, 0, 0),
                (ph + (row_tile - 1) * stride + 1,
                 (OW - 1) * stride + 1, cin_p),
                (stride, stride, 1))                       # rows always valid
            sk_ref[...] = sk.reshape(1, row_tile, OW, cin_p).astype(
                sk_ref.dtype)

        # --- conv1 (1x1) + bn1 + relu on the halo rows ----------------------
        mid = jnp.dot(xt.reshape(halo * W, cin_p), w1_ref[...],
                      preferred_element_type=jnp.float32)
        mid = jnp.maximum(mid + b1_ref[...], 0.0).reshape(halo, W, mid_p)

        # --- build conv2's zero-padded input in VMEM ------------------------
        if pw > 0:
            mid_buf[:, :pw, :] = jnp.zeros((halo, pw, mid_p), cdt)
            mid_buf[:, pw + W:, :] = jnp.zeros((halo, pw, mid_p), cdt)
        mid_buf[:, pw:pw + W, :] = mid.astype(cdt)
        # zero the out-of-image halo rows (acts as conv2's 'same' padding)
        if ph > 0:
            @pl.when(j == 0)
            def _():
                mid_buf[:ph, :, :] = jnp.zeros((ph, Wp, mid_p), cdt)
        top_fill = ph + first_rows
        if top_fill < halo:
            @pl.when(j == 0)
            def _():
                mid_buf[top_fill:, :, :] = jnp.zeros(
                    (halo - top_fill, Wp, mid_p), cdt)
        if n_row > 1 and last_rows < halo:
            @pl.when(j == n_row - 1)
            def _():
                mid_buf[last_rows:, :, :] = jnp.zeros(
                    (halo - last_rows, Wp, mid_p), cdt)

        # --- conv2 (KHxKW, stride) + bn2 + relu: one matmul per kernel row --
        xm = mid_buf[...]                                  # (halo, Wp, mid_p)
        acc = jnp.zeros((row_tile * OW, mid_p), jnp.float32)
        for kh in range(KH):
            xr = jax.lax.slice(
                xm, (kh, 0, 0),
                (kh + (row_tile - 1) * stride + 1, Wp, mid_p),
                (stride, 1, 1))                            # (row_tile, Wp, C)
            cols = [jax.lax.slice(xr, (0, r, 0), (row_tile, Wp, mid_p),
                                  (1, stride, 1)) for r in range(stride)]
            segs = []
            for kw in range(KW):
                src = cols[kw % stride]
                st = kw // stride
                segs.append(jax.lax.slice(src, (0, st, 0),
                                          (row_tile, st + OW, mid_p)))
            patch = jnp.concatenate(segs, axis=-1)         # (rt, OW, KW*C)
            acc = acc + jnp.dot(patch.reshape(row_tile * OW, KW * mid_p),
                                w2_ref[kh],
                                preferred_element_type=jnp.float32)
        acc = jnp.maximum(acc + b2_ref[...], 0.0)
        o_ref[...] = acc.reshape(1, row_tile, OW, mid_p).astype(o_ref.dtype)

    out_shapes = [jax.ShapeDtypeStruct((N, OH, OW, mid_p), cdt)]
    out_specs = [pl.BlockSpec((1, row_tile, OW, mid_p),
                              lambda bn, bj: (bn, bj, 0, 0))]
    if emit_skip:
        out_shapes.append(jax.ShapeDtypeStruct((N, OH, OW, cin_p), cdt))
        out_specs.append(pl.BlockSpec((1, row_tile, OW, cin_p),
                                      lambda bn, bj: (bn, bj, 0, 0)))

    flops = (2 * N * OH * OW * KH * KW * mid_p * mid_p
             + 2 * N * n_row * halo * W * cin_p * mid_p)
    bytes_accessed = int(int(x.size) * x.dtype.itemsize
                         + int(w1.size) * w1.dtype.itemsize
                         + int(w2r.size) * w2r.dtype.itemsize
                         + N * OH * OW * mid_p * cdt.itemsize
                         + (N * OH * OW * cin_p * cdt.itemsize
                            if emit_skip else 0))

    return pl.pallas_call(
        kernel,
        out_shape=tuple(out_shapes) if emit_skip else out_shapes[0],
        grid=(N, n_row),
        in_specs=[
            pl.BlockSpec(memory_space=pl.ANY),                # x stays in HBM
            pl.BlockSpec((cin_p, mid_p), lambda bn, bj: (0, 0)),
            pl.BlockSpec((1, mid_p), lambda bn, bj: (0, 0)),
            pl.BlockSpec((KH, KW * mid_p, mid_p), lambda bn, bj: (0, 0, 0)),
            pl.BlockSpec((1, mid_p), lambda bn, bj: (0, 0)),
        ],
        out_specs=tuple(out_specs) if emit_skip else out_specs[0],
        scratch_shapes=[
            pltpu.VMEM((2, halo, W, cin_p), cdt),             # double buffer
            pltpu.VMEM((halo, Wp, mid_p), cdt),               # padded mid
            pltpu.SemaphoreType.DMA((2,)),
        ],
        compiler_params=pltpu.CompilerParams(
            # j must stay sequential on one core: the manual DMA prefetch
            # assumes (n, j+1) follows (n, j) on the same TensorCore.
            dimension_semantics=("parallel", "arbitrary"),
            vmem_limit_bytes=_vmem_limit_bytes()),
        cost_estimate=pl.CostEstimate(flops=int(flops), transcendentals=0,
                                      bytes_accessed=bytes_accessed),
    )(x, w1, b1.reshape(1, -1), w2r, b2.reshape(1, -1))


# ----------------------------------------------------------------------------
# BN folding + channel padding (lane-dense) helpers
# ----------------------------------------------------------------------------
def _fold_bn(bn):
    s = bn["gamma"] / jnp.sqrt(bn["var"] + BN_EPS)
    return s, bn["beta"] - bn["mean"] * s


def _fold_1x1(w, bn, cin_pad, cout_pad, dtype):
    s, b = _fold_bn(bn)
    ws = w * s[None, :]
    ws = jnp.pad(ws, ((0, cin_pad - w.shape[0]), (0, cout_pad - w.shape[1])))
    b = jnp.pad(b, (0, cout_pad - b.shape[0]))
    return ws.astype(dtype), b.astype(jnp.float32)


def _fold_3x3(w, bn, cin_pad, cout_pad, dtype):
    s, b = _fold_bn(bn)
    ws = w * s[None, None, None, :]
    ws = jnp.pad(ws, ((0, 0), (0, 0),
                      (0, cin_pad - w.shape[2]), (0, cout_pad - w.shape[3])))
    b = jnp.pad(b, (0, cout_pad - b.shape[0]))
    return ws.astype(dtype), b.astype(jnp.float32)


# ----------------------------------------------------------------------------
# Parameters + wrapper
# ----------------------------------------------------------------------------
def init_params(key, in_channels, out_channels, conv_size):
    width = out_channels * EXPANSION
    ks = jax.random.split(key, 8)

    def bn_params(k, c):
        k1, k2, k3, k4 = jax.random.split(k, 4)
        return dict(
            gamma=jax.random.uniform(k1, (c,), jnp.float32, 0.5, 1.5),
            beta=jax.random.normal(k2, (c,), jnp.float32) * 0.1,
            mean=jax.random.normal(k3, (c,), jnp.float32) * 0.1,
            var=jax.random.uniform(k4, (c,), jnp.float32, 0.5, 1.5),
        )

    return dict(
        # conv weights stored channels-last: 1x1 as (Cin, Cout), 3x3 as HWIO.
        w1=jax.random.normal(ks[0], (in_channels, out_channels), jnp.float32) * 0.1,
        w2=jax.random.normal(ks[1], (conv_size, conv_size, out_channels,
                                     out_channels), jnp.float32) * 0.1,
        w3=jax.random.normal(ks[2], (out_channels, width), jnp.float32) * 0.1,
        wsk=jax.random.normal(ks[3], (in_channels, width), jnp.float32) * 0.1,
        bn1=bn_params(ks[4], out_channels),
        bn2=bn_params(ks[5], out_channels),
        bn3=bn_params(ks[6], width),
        bnsk=bn_params(ks[7], width),
    )


def bottleneck_forward(x_nchw, params, in_channels, out_channels, stride=1,
                       compute_dtype=jnp.float32):
    width = out_channels * EXPANSION
    need_skip = (stride != 1) or (in_channels != width)

    cin_p = _round_up(in_channels, LANES)
    mid_p = _round_up(out_channels, LANES)
    wid_p = _round_up(width, LANES)

    # NCHW -> NHWC, lane-dense channel padding, compute dtype (bf16 on v6e/v7x).
    x = jnp.transpose(x_nchw, (0, 2, 3, 1))
    x = jnp.pad(x, ((0, 0), (0, 0), (0, 0), (0, cin_p - in_channels)))
    x = x.astype(compute_dtype)
    N, H, W, _ = x.shape

    w1, b1 = _fold_1x1(params["w1"], params["bn1"], cin_p, mid_p, compute_dtype)
    w2, b2 = _fold_3x3(params["w2"], params["bn2"], mid_p, mid_p, compute_dtype)
    w3, b3 = _fold_1x1(params["w3"], params["bn3"], mid_p, wid_p, compute_dtype)

    # Fused conv1 + conv2 (and, for stride>1 projections, the strided skip).
    emit_skip = need_skip and stride > 1
    conv_out = conv1_conv3x3_fused(x, w1, b1, w2, b2, stride,
                                   emit_skip=emit_skip)
    if emit_skip:
        out, xs = conv_out
    else:
        out = conv_out
    _, OH, OW, _ = out.shape
    out2d = out.reshape(N * OH * OW, mid_p)

    # conv3 (1x1) + bn3 + skip branch + final relu, fused in one kernel.
    if need_skip:
        wsk, bsk = _fold_1x1(params["wsk"], params["bnsk"], cin_p, wid_p,
                             compute_dtype)
        if stride > 1:
            xs2d = xs.reshape(N * OH * OW, cin_p)
        else:
            xs2d = x.reshape(N * OH * OW, cin_p)     # no-copy reshape
        out = pointwise_bn(out2d, w3, b3, relu=True,
                           skip=xs2d, skip_w=wsk, skip_b=bsk)
    else:
        assert cin_p == wid_p, "identity skip requires in_channels == width"
        xs2d = x.reshape(N * OH * OW, cin_p)
        out = pointwise_bn(out2d, w3, b3, relu=True, skip=xs2d)

    out = out.reshape(N, OH, OW, wid_p)[..., :width].astype(jnp.float32)
    return jnp.transpose(out, (0, 3, 1, 2))          # NHWC -> NCHW


# ----------------------------------------------------------------------------
# Pure-JAX reference (for correctness check)
# ----------------------------------------------------------------------------
def reference_forward(x_nchw, params, in_channels, out_channels, stride=1):
    width = out_channels * EXPANSION
    need_skip = (stride != 1) or (in_channels != width)
    pad = params["w2"].shape[0] // 2

    def bn(y, p):
        return (y - p["mean"]) / jnp.sqrt(p["var"] + BN_EPS) * p["gamma"] + p["beta"]

    x = jnp.transpose(x_nchw, (0, 2, 3, 1))
    out = jnp.einsum("nhwc,cd->nhwd", x, params["w1"])
    out = jax.nn.relu(bn(out, params["bn1"]))
    out = jax.lax.conv_general_dilated(
        out, params["w2"], (stride, stride), [(pad, pad), (pad, pad)],
        dimension_numbers=("NHWC", "HWIO", "NHWC"))
    out = jax.nn.relu(bn(out, params["bn2"]))
    out = bn(jnp.einsum("nhwc,cd->nhwd", out, params["w3"]), params["bn3"])
    if need_skip:
        skip = x[:, ::stride, ::stride, :]
        skip = bn(jnp.einsum("nhwc,cd->nhwd", skip, params["wsk"]), params["bnsk"])
    else:
        skip = x
    out = jax.nn.relu(out + skip)
    return jnp.transpose(out, (0, 3, 1, 2))


# ----------------------------------------------------------------------------
if __name__ == "__main__":
    key = jax.random.PRNGKey(0)
    N, H, W = 2, 16, 16
    configs = [
        # (in_channels, out_channels, stride, conv_size)
        (8, 4, 1, 3),    # projection skip (channel mismatch)
        (16, 4, 1, 3),   # identity skip
        (8, 4, 2, 3),    # projection skip with stride 2
    ]

    for idx, (cin, cout, stride, ksz) in enumerate(configs):
        kx, kp, key = jax.random.split(key, 3)
        x = jax.random.normal(kx, (N, cin, H, W), jnp.float32)
        params = init_params(kp, cin, cout, ksz)
        ref = reference_forward(x, params, cin, cout, stride)

        # f32 path (tight tolerance)
        fwd = jax.jit(functools.partial(
            bottleneck_forward, params=params, in_channels=cin,
            out_channels=cout, stride=stride, compute_dtype=jnp.float32))
        out = jax.block_until_ready(fwd(x))
        assert out.shape == (N, cout * EXPANSION, H // stride, W // stride)
        assert jnp.allclose(out, ref, rtol=1e-4, atol=1e-4), f"f32 mismatch cfg{idx}"

        # bf16 compute path (v6e/v7x recommendation), loose tolerance
        fwd_bf16 = jax.jit(functools.partial(
            bottleneck_forward, params=params, in_channels=cin,
            out_channels=cout, stride=stride, compute_dtype=jnp.bfloat16))
        out_bf16 = jax.block_until_ready(fwd_bf16(x))
        assert jnp.allclose(out_bf16, ref, rtol=0.1, atol=0.1), f"bf16 mismatch cfg{idx}"

    print("KERNEL_OK")
</pallas_src>

<mosaic_0001>
module attributes {stable_mosaic.version = 11 : i64} {
  func.func @_pointwise_kernel(%arg0: i32, %arg1: i32, %arg2: memref<256x128xf32, #tpu.memory_space<vmem>>, %arg3: memref<128x128xf32, #tpu.memory_space<vmem>>, %arg4: memref<1x128xf32, #tpu.memory_space<vmem>>, %arg5: memref<256x128xf32, #tpu.memory_space<vmem>>, %arg6: memref<128x128xf32, #tpu.memory_space<vmem>>, %arg7: memref<1x128xf32, #tpu.memory_space<vmem>>, %arg8: memref<256x128xf32, #tpu.memory_space<vmem>>) attributes {dimension_semantics = [#tpu.dimension_semantics<parallel>, #tpu.dimension_semantics<parallel>], iteration_bounds = array<i64: 2, 1>, scalar_prefetch = 0 : i64, scratch_operands = 0 : i64, tpu.core_type = #tpu.core_type<tc>, window_params = [{transform_indices = @transform_0, window_bounds = array<i64: 256, 128>}, {transform_indices = @transform_1, window_bounds = array<i64: 128, 128>}, {transform_indices = @transform_2, window_bounds = array<i64: 1, 128>}, {transform_indices = @transform_3, window_bounds = array<i64: 256, 128>}, {transform_indices = @transform_4, window_bounds = array<i64: 128, 128>}, {transform_indices = @transform_5, window_bounds = array<i64: 1, 128>}, {transform_indices = @transform_6, window_bounds = array<i64: 256, 128>}]} {
    %c0 = arith.constant 0 : index
    %c0_0 = arith.constant 0 : index
    %0 = vector.load %arg2[%c0, %c0_0] : memref<256x128xf32, #tpu.memory_space<vmem>>, vector<256x128xf32>
    %c0_1 = arith.constant 0 : index
    %c0_2 = arith.constant 0 : index
    %1 = vector.load %arg3[%c0_1, %c0_2] : memref<128x128xf32, #tpu.memory_space<vmem>>, vector<128x128xf32>
    %cst = arith.constant dense<0.000000e+00> : vector<256x128xf32>
    %2 = tpu.matmul %0, %1, %cst {dimension_numbers = #tpu.dot_dimension_numbers<[1], [0], [0], [1], [0, 0, 1, 1], [], []>} : vector<256x128xf32>, vector<128x128xf32>, vector<256x128xf32> -> vector<256x128xf32>
    %c0_3 = arith.constant 0 : index
    %c0_4 = arith.constant 0 : index
    %3 = vector.load %arg4[%c0_3, %c0_4] : memref<1x128xf32, #tpu.memory_space<vmem>>, vector<1x128xf32>
    %4 = vector.broadcast %3 : vector<1x128xf32> to vector<256x128xf32>
    %5 = arith.addf %2, %4 : vector<256x128xf32>
    %c0_5 = arith.constant 0 : index
    %c0_6 = arith.constant 0 : index
    %6 = vector.load %arg5[%c0_5, %c0_6] : memref<256x128xf32, #tpu.memory_space<vmem>>, vector<256x128xf32>
    %c0_7 = arith.constant 0 : index
    %c0_8 = arith.constant 0 : index
    %7 = vector.load %arg6[%c0_7, %c0_8] : memref<128x128xf32, #tpu.memory_space<vmem>>, vector<128x128xf32>
    %cst_9 = arith.constant dense<0.000000e+00> : vector<256x128xf32>
    %8 = tpu.matmul %6, %7, %cst_9 {dimension_numbers = #tpu.dot_dimension_numbers<[1], [0], [0], [1], [0, 0, 1, 1], [], []>} : vector<256x128xf32>, vector<128x128xf32>, vector<256x128xf32> -> vector<256x128xf32>
    %9 = arith.addf %5, %8 : vector<256x128xf32>
    %c0_10 = arith.constant 0 : index
    %c0_11 = arith.constant 0 : index
    %10 = vector.load %arg7[%c0_10, %c0_11] : memref<1x128xf32, #tpu.memory_space<vmem>>, vector<1x128xf32>
    %11 = vector.broadcast %10 : vector<1x128xf32> to vector<256x128xf32>
    %12 = arith.addf %9, %11 : vector<256x128xf32>
    %cst_12 = arith.constant 0.000000e+00 : f32
    %13 = vector.broadcast %cst_12 : f32 to vector<256x128xf32>
    %14 = arith.maximumf %12, %13 : vector<256x128xf32>
    %c0_13 = arith.constant 0 : index
    %c0_14 = arith.constant 0 : index
    %15 = vector.load %arg8[%c0_13, %c0_14] : memref<256x128xf32, #tpu.memory_space<vmem>>, vector<256x128xf32>
    tpu.vector_store %arg8[%c0_13, %c0_14], %14 {strides = array<i32>} : memref<256x128xf32, #tpu.memory_space<vmem>>, vector<256x128xf32>,
    return
  }
  func.func @transform_0(%arg0: i32, %arg1: i32) -> (i32, i32) {
    %c0_i32 = arith.constant 0 : i32
    %c0_i32_0 = arith.constant 0 : i32
    return %arg0, %c0_i32 : i32, i32
  }
  func.func @transform_1(%arg0: i32, %arg1: i32) -> (i32, i32) {
    %c0_i32 = arith.constant 0 : i32
    %c0_i32_0 = arith.constant 0 : i32
    return %c0_i32, %arg1 : i32, i32
  }
  func.func @transform_2(%arg0: i32, %arg1: i32) -> (i32, i32) {
    %c0_i32 = arith.constant 0 : i32
    %c0_i32_0 = arith.constant 0 : i32
    return %c0_i32, %arg1 : i32, i32
  }
  func.func @transform_3(%arg0: i32, %arg1: i32) -> (i32, i32) {
    %c0_i32 = arith.constant 0 : i32
    %c0_i32_0 = arith.constant 0 : i32
    return %arg0, %c0_i32 : i32, i32
  }
  func.func @transform_4(%arg0: i32, %arg1: i32) -> (i32, i32) {
    %c0_i32 = arith.constant 0 : i32
    %c0_i32_0 = arith.constant 0 : i32
    return %c0_i32, %arg1 : i32, i32
  }
  func.func @transform_5(%arg0: i32, %arg1: i32) -> (i32, i32) {
    %c0_i32 = arith.constant 0 : i32
    %c0_i32_0 = arith.constant 0 : i32
    return %c0_i32, %arg1 : i32, i32
  }
  func.func @transform_6(%arg0: i32, %arg1: i32) -> (i32, i32) {
    %c0_i32 = arith.constant 0 : i32
    return %arg0, %arg1 : i32, i32
  }
}

module attributes {stable_mosaic.version = 11 : i64} {
  func.func @kernel(%arg0: i32, %arg1: i32, %arg2: memref<2x16x16x128xf32, #tpu.memory_space<any>>, %arg3: memref<128x128xf32, #tpu.memory_space<vmem>>, %arg4: memref<1x128xf32, #tpu.memory_space<vmem>>, %arg5: memref<3x384x128xf32, #tpu.memory_space<vmem>>, %arg6: memref<1x128xf32, #tpu.memory_space<vmem>>, %arg7: memref<1x8x16x128xf32, #tpu.memory_space<vmem>>, %arg8: memref<2x10x16x128xf32, #tpu.memory_space<vmem>>, %arg9: memref<10x18x128xf32, #tpu.memory_space<vmem>>, %arg10: memref<2x!tpu.dma_semaphore, #tpu.memory_space<semaphore_mem>>) attributes {dimension_semantics = [#tpu.dimension_semantics<parallel>, #tpu.dimension_semantics<arbitrary>], iteration_bounds = array<i64: 2, 2>, scalar_prefetch = 0 : i64, scratch_operands = 3 : i64, tpu.core_type = #tpu.core_type<tc>, window_params = [{}, {pipeline_mode = #tpu.pipeline_mode<synchronous>, transform_indices = @transform_1, window_bounds = array<i64: 128, 128>}, {pipeline_mode = #tpu.pipeline_mode<synchronous>, transform_indices = @transform_2, window_bounds = array<i64: 1, 128>}, {pipeline_mode = #tpu.pipeline_mode<synchronous>, transform_indices = @transform_3, window_bounds = array<i64: 3, 384, 128>}, {pipeline_mode = #tpu.pipeline_mode<synchronous>, transform_indices = @transform_4, window_bounds = array<i64: 1, 128>}, {transform_indices = @transform_5, window_bounds = array<i64: 1, 8, 16, 128>}]} {
    %c2_i32 = arith.constant 2 : i32
    %c0_i32 = arith.constant 0 : i32
    %0 = arith.cmpi eq, %c2_i32, %c0_i32 : i32
    %c1_i32 = arith.constant 1 : i32
    %1 = arith.select %0, %c1_i32, %c2_i32 : i32
    %2 = arith.remsi %arg1, %1 : i32
    %c0_i32_0 = arith.constant 0 : i32
    %3 = arith.cmpi ne, %2, %c0_i32_0 : i32
    %c0_i32_1 = arith.constant 0 : i32
    %4 = arith.cmpi slt, %2, %c0_i32_1 : i32
    %c0_i32_2 = arith.constant 0 : i32
    %5 = arith.cmpi slt, %1, %c0_i32_2 : i32
    %6 = arith.xori %4, %5 : i1
    %7 = arith.andi %6, %3 : i1
    %8 = arith.addi %2, %1 : i32
    %9 = arith.select %7, %8, %2 : i32
    %c0_i32_3 = arith.constant 0 : i32
    %10 = arith.cmpi eq, %arg1, %c0_i32_3 : i32
    %11 = arith.extui %10 : i1 to i32
    %c0_i32_4 = arith.constant 0 : i32
    %12 = arith.cmpi ne, %11, %c0_i32_4 : i32
    scf.if %12 {
      %c0_i32_54 = arith.constant 0 : i32
      %c0_i32_55 = arith.constant 0 : i32
      %c0_i32_56 = arith.constant 0 : i32
      %88 = tpu.memref_slice %arg2[%arg0, %c0_i32_54, %c0_i32_55, %c0_i32_56] : memref<2x16x16x128xf32, #tpu.memory_space<any>> -> memref<1x9x16x128xf32, #tpu.memory_space<any>>
      %89 = tpu.memref_squeeze %88 : memref<1x9x16x128xf32, #tpu.memory_space<any>> -> memref<9x16x128xf32, #tpu.memory_space<any>>
      %c1_i32_57 = arith.constant 1 : i32
      %c0_i32_58 = arith.constant 0 : i32
      %c0_i32_59 = arith.constant 0 : i32
      %90 = tpu.memref_slice %arg8[%9, %c1_i32_57, %c0_i32_58, %c0_i32_59] : memref<2x10x16x128xf32, #tpu.memory_space<vmem>> -> memref<1x9x16x128xf32, #tpu.memory_space<vmem>>
      %91 = tpu.memref_squeeze %90 : memref<1x9x16x128xf32, #tpu.memory_space<vmem>> -> memref<9x16x128xf32, #tpu.memory_space<vmem>>
      %92 = tpu.memref_slice %arg10[%9] : memref<2x!tpu.dma_semaphore, #tpu.memory_space<semaphore_mem>> -> memref<1x!tpu.dma_semaphore, #tpu.memory_space<semaphore_mem>>
      %93 = tpu.memref_squeeze %92 : memref<1x!tpu.dma_semaphore, #tpu.memory_space<semaphore_mem>> -> memref<!tpu.dma_semaphore, #tpu.memory_space<semaphore_mem>>
      tpu.enqueue_dma source(%89 : memref<9x16x128xf32, #tpu.memory_space<any>>) target(%91 : memref<9x16x128xf32, #tpu.memory_space<vmem>>) target_semaphore(%93 : memref<!tpu.dma_semaphore, #tpu.memory_space<semaphore_mem>>)
    } else {
    }
    %c0_i32_5 = arith.constant 0 : i32
    %13 = arith.cmpi eq, %arg1, %c0_i32_5 : i32
    %14 = arith.extui %13 : i1 to i32
    %c0_i32_6 = arith.constant 0 : i32
    %15 = arith.cmpi ne, %14, %c0_i32_6 : i32
    scf.if %15 {
      %c0_i32_54 = arith.constant 0 : i32
      %c0_i32_55 = arith.constant 0 : i32
      %c0_i32_56 = arith.constant 0 : i32
      %88 = tpu.memref_slice %arg2[%arg0, %c0_i32_54, %c0_i32_55, %c0_i32_56] : memref<2x16x16x128xf32, #tpu.memory_space<any>> -> memref<1x9x16x128xf32, #tpu.memory_space<any>>
      %89 = tpu.memref_squeeze %88 : memref<1x9x16x128xf32, #tpu.memory_space<any>> -> memref<9x16x128xf32, #tpu.memory_space<any>>
      %c1_i32_57 = arith.constant 1 : i32
      %c0_i32_58 = arith.constant 0 : i32
      %c0_i32_59 = arith.constant 0 : i32
      %90 = tpu.memref_slice %arg8[%9, %c1_i32_57, %c0_i32_58, %c0_i32_59] : memref<2x10x16x128xf32, #tpu.memory_space<vmem>> -> memref<1x9x16x128xf32, #tpu.memory_space<vmem>>
      %91 = tpu.memref_squeeze %90 : memref<1x9x16x128xf32, #tpu.memory_space<vmem>> -> memref<9x16x128xf32, #tpu.memory_space<vmem>>
      %92 = tpu.memref_slice %arg10[%9] : memref<2x!tpu.dma_semaphore, #tpu.memory_space<semaphore_mem>> -> memref<1x!tpu.dma_semaphore, #tpu.memory_space<semaphore_mem>>
      %93 = tpu.memref_squeeze %92 : memref<1x!tpu.dma_semaphore, #tpu.memory_space<semaphore_mem>> -> memref<!tpu.dma_semaphore, #tpu.memory_space<semaphore_mem>>
      tpu.wait_dma2 semaphore(%93 : memref<!tpu.dma_semaphore, #tpu.memory_space<semaphore_mem>>) src(%89 : memref<9x16x128xf32, #tpu.memory_space<any>>) dst(%91 : memref<9x16x128xf32, #tpu.memory_space<vmem>>)
    } else {
    }
    %c1_i32_7 = arith.constant 1 : i32
    %16 = arith.cmpi eq, %arg1, %c1_i32_7 : i32
    %17 = arith.extui %16 : i1 to i32
    %c0_i32_8 = arith.constant 0 : i32
    %18 = arith.cmpi ne, %17, %c0_i32_8 : i32
    scf.if %18 {
      %c7_i32 = arith.constant 7 : i32
      %c0_i32_54 = arith.constant 0 : i32
      %c0_i32_55 = arith.constant 0 : i32
      %88 = tpu.memref_slice %arg2[%arg0, %c7_i32, %c0_i32_54, %c0_i32_55] : memref<2x16x16x128xf32, #tpu.memory_space<any>> -> memref<1x9x16x128xf32, #tpu.memory_space<any>>
      %89 = tpu.memref_squeeze %88 : memref<1x9x16x128xf32, #tpu.memory_space<any>> -> memref<9x16x128xf32, #tpu.memory_space<any>>
      %c0_i32_56 = arith.constant 0 : i32
      %c0_i32_57 = arith.constant 0 : i32
      %c0_i32_58 = arith.constant 0 : i32
      %90 = tpu.memref_slice %arg8[%9, %c0_i32_56, %c0_i32_57, %c0_i32_58] : memref<2x10x16x128xf32, #tpu.memory_space<vmem>> -> memref<1x9x16x128xf32, #tpu.memory_space<vmem>>
      %91 = tpu.memref_squeeze %90 : memref<1x9x16x128xf32, #tpu.memory_space<vmem>> -> memref<9x16x128xf32, #tpu.memory_space<vmem>>
      %92 = tpu.memref_slice %arg10[%9] : memref<2x!tpu.dma_semaphore, #tpu.memory_space<semaphore_mem>> -> memref<1x!tpu.dma_semaphore, #tpu.memory_space<semaphore_mem>>
      %93 = tpu.memref_squeeze %92 : memref<1x!tpu.dma_semaphore, #tpu.memory_space<semaphore_mem>> -> memref<!tpu.dma_semaphore, #tpu.memory_space<semaphore_mem>>
      tpu.wait_dma2 semaphore(%93 : memref<!tpu.dma_semaphore, #tpu.memory_space<semaphore_mem>>) src(%89 : memref<9x16x128xf32, #tpu.memory_space<any>>) dst(%91 : memref<9x16x128xf32, #tpu.memory_space<vmem>>)
    } else {
    }
    %c1_i32_9 = arith.constant 1 : i32
    %19 = arith.addi %arg1, %c1_i32_9 : i32
    %c2_i32_10 = arith.constant 2 : i32
    %20 = arith.cmpi slt, %19, %c2_i32_10 : i32
    %21 = arith.extui %20 : i1 to i32
    %c0_i32_11 = arith.constant 0 : i32
    %22 = arith.cmpi ne, %21, %c0_i32_11 : i32
    scf.if %22 {
      %c1_i32_54 = arith.constant 1 : i32
      %88 = arith.addi %arg1, %c1_i32_54 : i32
      %c1_i32_55 = arith.constant 1 : i32
      %89 = arith.addi %arg1, %c1_i32_55 : i32
      %c2_i32_56 = arith.constant 2 : i32
      %c0_i32_57 = arith.constant 0 : i32
      %90 = arith.cmpi eq, %c2_i32_56, %c0_i32_57 : i32
      %c1_i32_58 = arith.constant 1 : i32
      %91 = arith.select %90, %c1_i32_58, %c2_i32_56 : i32
      %92 = arith.remsi %89, %91 : i32
      %c0_i32_59 = arith.constant 0 : i32
      %93 = arith.cmpi ne, %92, %c0_i32_59 : i32
      %c0_i32_60 = arith.constant 0 : i32
      %94 = arith.cmpi slt, %92, %c0_i32_60 : i32
      %c0_i32_61 = arith.constant 0 : i32
      %95 = arith.cmpi slt, %91, %c0_i32_61 : i32
      %96 = arith.xori %94, %95 : i1
      %97 = arith.andi %96, %93 : i1
      %98 = arith.addi %92, %91 : i32
      %99 = arith.select %97, %98, %92 : i32
      %c0_i32_62 = arith.constant 0 : i32
      %100 = arith.cmpi eq, %88, %c0_i32_62 : i32
      %101 = arith.extui %100 : i1 to i32
      %c0_i32_63 = arith.constant 0 : i32
      %102 = arith.cmpi ne, %101, %c0_i32_63 : i32
      scf.if %102 {
        %c0_i32_66 = arith.constant 0 : i32
        %c0_i32_67 = arith.constant 0 : i32
        %c0_i32_68 = arith.constant 0 : i32
        %106 = tpu.memref_slice %arg2[%arg0, %c0_i32_66, %c0_i32_67, %c0_i32_68] : memref<2x16x16x128xf32, #tpu.memory_space<any>> -> memref<1x9x16x128xf32, #tpu.memory_space<any>>
        %107 = tpu.memref_squeeze %106 : memref<1x9x16x128xf32, #tpu.memory_space<any>> -> memref<9x16x128xf32, #tpu.memory_space<any>>
        %c1_i32_69 = arith.constant 1 : i32
        %c0_i32_70 = arith.constant 0 : i32
        %c0_i32_71 = arith.constant 0 : i32
        %108 = tpu.memref_slice %arg8[%99, %c1_i32_69, %c0_i32_70, %c0_i32_71] : memref<2x10x16x128xf32, #tpu.memory_space<vmem>> -> memref<1x9x16x128xf32, #tpu.memory_space<vmem>>
        %109 = tpu.memref_squeeze %108 : memref<1x9x16x128xf32, #tpu.memory_space<vmem>> -> memref<9x16x128xf32, #tpu.memory_space<vmem>>
        %110 = tpu.memref_slice %arg10[%99] : memref<2x!tpu.dma_semaphore, #tpu.memory_space<semaphore_mem>> -> memref<1x!tpu.dma_semaphore, #tpu.memory_space<semaphore_mem>>
        %111 = tpu.memref_squeeze %110 : memref<1x!tpu.dma_semaphore, #tpu.memory_space<semaphore_mem>> -> memref<!tpu.dma_semaphore, #tpu.memory_space<semaphore_mem>>
        tpu.enqueue_dma source(%107 : memref<9x16x128xf32, #tpu.memory_space<any>>) target(%109 : memref<9x16x128xf32, #tpu.memory_space<vmem>>) target_semaphore(%111 : memref<!tpu.dma_semaphore, #tpu.memory_space<semaphore_mem>>)
      } else {
      }
      %c1_i32_64 = arith.constant 1 : i32
      %103 = arith.cmpi eq, %88, %c1_i32_64 : i32
      %104 = arith.extui %103 : i1 to i32
      %c0_i32_65 = arith.constant 0 : i32
      %105 = arith.cmpi ne, %104, %c0_i32_65 : i32
      scf.if %105 {
        %c7_i32 = arith.constant 7 : i32
        %c0_i32_66 = arith.constant 0 : i32
        %c0_i32_67 = arith.constant 0 : i32
        %106 = tpu.memref_slice %arg2[%arg0, %c7_i32, %c0_i32_66, %c0_i32_67] : memref<2x16x16x128xf32, #tpu.memory_space<any>> -> memref<1x9x16x128xf32, #tpu.memory_space<any>>
        %107 = tpu.memref_squeeze %106 : memref<1x9x16x128xf32, #tpu.memory_space<any>> -> memref<9x16x128xf32, #tpu.memory_space<any>>
        %c0_i32_68 = arith.constant 0 : i32
        %c0_i32_69 = arith.constant 0 : i32
        %c0_i32_70 = arith.constant 0 : i32
        %108 = tpu.memref_slice %arg8[%99, %c0_i32_68, %c0_i32_69, %c0_i32_70] : memref<2x10x16x128xf32, #tpu.memory_space<vmem>> -> memref<1x9x16x128xf32, #tpu.memory_space<vmem>>
        %109 = tpu.memref_squeeze %108 : memref<1x9x16x128xf32, #tpu.memory_space<vmem>> -> memref<9x16x128xf32, #tpu.memory_space<vmem>>
        %110 = tpu.memref_slice %arg10[%99] : memref<2x!tpu.dma_semaphore, #tpu.memory_space<semaphore_mem>> -> memref<1x!tpu.dma_semaphore, #tpu.memory_space<semaphore_mem>>
        %111 = tpu.memref_squeeze %110 : memref<1x!tpu.dma_semaphore, #tpu.memory_space<semaphore_mem>> -> memref<!tpu.dma_semaphore, #tpu.memory_space<semaphore_mem>>
        tpu.enqueue_dma source(%107 : memref<9x16x128xf32, #tpu.memory_space<any>>) target(%109 : memref<9x16x128xf32, #tpu.memory_space<vmem>>) target_semaphore(%111 : memref<!tpu.dma_semaphore, #tpu.memory_space<semaphore_mem>>)
      } else {
      }
    } else {
    }
    %23 = arith.index_cast %9 : i32 to index
    %c0 = arith.constant 0 : index
    %c0_12 = arith.constant 0 : index
    %c0_13 = arith.constant 0 : index
    %24 = vector.load %arg8[%23, %c0, %c0_12, %c0_13] : memref<2x10x16x128xf32, #tpu.memory_space<vmem>>, vector<1x10x16x128xf32>
    %25 = vector.shape_cast %24 : vector<1x10x16x128xf32> to vector<10x16x128xf32>
    %26 = vector.shape_cast %25 : vector<10x16x128xf32> to vector<160x128xf32>
    %c0_14 = arith.constant 0 : index
    %c0_15 = arith.constant 0 : index
    %27 = vector.load %arg3[%c0_14, %c0_15] : memref<128x128xf32, #tpu.memory_space<vmem>>, vector<128x128xf32>
    %cst = arith.constant dense<0.000000e+00> : vector<160x128xf32>
    %28 = tpu.matmul %26, %27, %cst {dimension_numbers = #tpu.dot_dimension_numbers<[1], [0], [0], [1], [0, 0, 1, 1], [], []>} : vector<160x128xf32>, vector<128x128xf32>, vector<160x128xf32> -> vector<160x128xf32>
    %c0_16 = arith.constant 0 : index
    %c0_17 = arith.constant 0 : index
    %29 = vector.load %arg4[%c0_16, %c0_17] : memref<1x128xf32, #tpu.memory_space<vmem>>, vector<1x128xf32>
    %30 = vector.broadcast %29 : vector<1x128xf32> to vector<160x128xf32>
    %31 = arith.addf %28, %30 : vector<160x128xf32>
    %cst_18 = arith.constant 0.000000e+00 : f32
    %32 = vector.broadcast %cst_18 : f32 to vector<160x128xf32>
    %33 = arith.maximumf %31, %32 : vector<160x128xf32>
    %34 = vector.shape_cast %33 : vector<160x128xf32> to vector<10x16x128xf32>
    %cst_19 = arith.constant 0.000000e+00 : f32
    %35 = vector.broadcast %cst_19 : f32 to vector<10x1x128xf32>
    %c0_20 = arith.constant 0 : index
    %c0_21 = arith.constant 0 : index
    %c0_22 = arith.constant 0 : index
    %36 = vector.load %arg9[%c0_20, %c0_21, %c0_22] : memref<10x18x128xf32, #tpu.memory_space<vmem>>, vector<10x1x128xf32>
    tpu.vector_store %arg9[%c0_20, %c0_21, %c0_22], %35 {strides = array<i32>} : memref<10x18x128xf32, #tpu.memory_space<vmem>>, vector<10x1x128xf32>,
    %cst_23 = arith.constant 0.000000e+00 : f32
    %37 = vector.broadcast %cst_23 : f32 to vector<10x1x128xf32>
    %c0_24 = arith.constant 0 : index
    %c17 = arith.constant 17 : index
    %c0_25 = arith.constant 0 : index
    %38 = vector.load %arg9[%c0_24, %c17, %c0_25] : memref<10x18x128xf32, #tpu.memory_space<vmem>>, vector<10x1x128xf32>
    tpu.vector_store %arg9[%c0_24, %c17, %c0_25], %37 {strides = array<i32>} : memref<10x18x128xf32, #tpu.memory_space<vmem>>, vector<10x1x128xf32>,
    %c0_26 = arith.constant 0 : index
    %c1 = arith.constant 1 : index
    %c0_27 = arith.constant 0 : index
    %39 = vector.load %arg9[%c0_26, %c1, %c0_27] : memref<10x18x128xf32, #tpu.memory_space<vmem>>, vector<10x16x128xf32>
    tpu.vector_store %arg9[%c0_26, %c1, %c0_27], %34 {strides = array<i32>} : memref<10x18x128xf32, #tpu.memory_space<vmem>>, vector<10x16x128xf32>,
    %c0_i32_28 = arith.constant 0 : i32
    %40 = arith.cmpi eq, %arg1, %c0_i32_28 : i32
    %41 = arith.extui %40 : i1 to i32
    %c0_i32_29 = arith.constant 0 : i32
    %42 = arith.cmpi ne, %41, %c0_i32_29 : i32
    scf.if %42 {
      %cst_54 = arith.constant 0.000000e+00 : f32
      %88 = vector.broadcast %cst_54 : f32 to vector<1x18x128xf32>
      %c0_55 = arith.constant 0 : index
      %c0_56 = arith.constant 0 : index
      %c0_57 = arith.constant 0 : index
      %89 = vector.load %arg9[%c0_55, %c0_56, %c0_57] : memref<10x18x128xf32, #tpu.memory_space<vmem>>, vector<1x18x128xf32>
      tpu.vector_store %arg9[%c0_55, %c0_56, %c0_57], %88 {strides = array<i32>} : memref<10x18x128xf32, #tpu.memory_space<vmem>>, vector<1x18x128xf32>,
    } else {
    }
    %c1_i32_30 = arith.constant 1 : i32
    %43 = arith.cmpi eq, %arg1, %c1_i32_30 : i32
    %44 = arith.extui %43 : i1 to i32
    %c0_i32_31 = arith.constant 0 : i32
    %45 = arith.cmpi ne, %44, %c0_i32_31 : i32
    scf.if %45 {
      %cst_54 = arith.constant 0.000000e+00 : f32
      %88 = vector.broadcast %cst_54 : f32 to vector<1x18x128xf32>
      %c9 = arith.constant 9 : index
      %c0_55 = arith.constant 0 : index
      %c0_56 = arith.constant 0 : index
      %89 = vector.load %arg9[%c9, %c0_55, %c0_56] : memref<10x18x128xf32, #tpu.memory_space<vmem>>, vector<1x18x128xf32>
      tpu.vector_store %arg9[%c9, %c0_55, %c0_56], %88 {strides = array<i32>} : memref<10x18x128xf32, #tpu.memory_space<vmem>>, vector<1x18x128xf32>,
    } else {
    }
    %c0_32 = arith.constant 0 : index
    %c0_33 = arith.constant 0 : index
    %c0_34 = arith.constant 0 : index
    %46 = vector.load %arg9[%c0_32, %c0_33, %c0_34] : memref<10x18x128xf32, #tpu.memory_space<vmem>>, vector<10x18x128xf32>
    %cst_35 = arith.constant 0.000000e+00 : f32
    %47 = vector.broadcast %cst_35 : f32 to vector<128x128xf32>
    %48 = vector.extract_strided_slice %46 {offsets = [0, 0, 0], sizes = [8, 18, 128], strides = [1, 1, 1]} : vector<10x18x128xf32> to vector<8x18x128xf32>
    %49 = vector.extract_strided_slice %48 {offsets = [0, 0, 0], sizes = [8, 18, 128], strides = [1, 1, 1]} : vector<8x18x128xf32> to vector<8x18x128xf32>
    %50 = vector.extract_strided_slice %49 {offsets = [0, 0, 0], sizes = [8, 16, 128], strides = [1, 1, 1]} : vector<8x18x128xf32> to vector<8x16x128xf32>
    %51 = vector.extract_strided_slice %49 {offsets = [0, 1, 0], sizes = [8, 16, 128], strides = [1, 1, 1]} : vector<8x18x128xf32> to vector<8x16x128xf32>
    %52 = vector.extract_strided_slice %49 {offsets = [0, 2, 0], sizes = [8, 16, 128], strides = [1, 1, 1]} : vector<8x18x128xf32> to vector<8x16x128xf32>
    %53 = tpu.concatenate %50, %51, %52 in 2 : vector<8x16x128xf32>, vector<8x16x128xf32>, vector<8x16x128xf32> -> vector<8x16x384xf32>
    %54 = vector.shape_cast %53 : vector<8x16x384xf32> to vector<128x384xf32>
    %c0_36 = arith.constant 0 : index
    %c0_37 = arith.constant 0 : index
    %c0_38 = arith.constant 0 : index
    %55 = vector.load %arg5[%c0_36, %c0_37, %c0_38] : memref<3x384x128xf32, #tpu.memory_space<vmem>>, vector<1x384x128xf32>
    %56 = vector.shape_cast %55 : vector<1x384x128xf32> to vector<384x128xf32>
    %cst_39 = arith.constant dense<0.000000e+00> : vector<128x128xf32>
    %57 = tpu.matmul %54, %56, %cst_39 {dimension_numbers = #tpu.dot_dimension_numbers<[1], [0], [0], [1], [0, 0, 1, 1], [], []>} : vector<128x384xf32>, vector<384x128xf32>, vector<128x128xf32> -> vector<128x128xf32>
    %58 = arith.addf %47, %57 : vector<128x128xf32>
    %59 = vector.extract_strided_slice %46 {offsets = [1, 0, 0], sizes = [8, 18, 128], strides = [1, 1, 1]} : vector<10x18x128xf32> to vector<8x18x128xf32>
    %60 = vector.extract_strided_slice %59 {offsets = [0, 0, 0], sizes = [8, 18, 128], strides = [1, 1, 1]} : vector<8x18x128xf32> to vector<8x18x128xf32>
    %61 = vector.extract_strided_slice %60 {offsets = [0, 0, 0], sizes = [8, 16, 128], strides = [1, 1, 1]} : vector<8x18x128xf32> to vector<8x16x128xf32>
    %62 = vector.extract_strided_slice %60 {offsets = [0, 1, 0], sizes = [8, 16, 128], strides = [1, 1, 1]} : vector<8x18x128xf32> to vector<8x16x128xf32>
    %63 = vector.extract_strided_slice %60 {offsets = [0, 2, 0], sizes = [8, 16, 128], strides = [1, 1, 1]} : vector<8x18x128xf32> to vector<8x16x128xf32>
    %64 = tpu.concatenate %61, %62, %63 in 2 : vector<8x16x128xf32>, vector<8x16x128xf32>, vector<8x16x128xf32> -> vector<8x16x384xf32>
    %65 = vector.shape_cast %64 : vector<8x16x384xf32> to vector<128x384xf32>
    %c1_40 = arith.constant 1 : index
    %c0_41 = arith.constant 0 : index
    %c0_42 = arith.constant 0 : index
    %66 = vector.load %arg5[%c1_40, %c0_41, %c0_42] : memref<3x384x128xf32, #tpu.memory_space<vmem>>, vector<1x384x128xf32>
    %67 = vector.shape_cast %66 : vector<1x384x128xf32> to vector<384x128xf32>
    %cst_43 = arith.constant dense<0.000000e+00> : vector<128x128xf32>
    %68 = tpu.matmul %65, %67, %cst_43 {dimension_numbers = #tpu.dot_dimension_numbers<[1], [0], [0], [1], [0, 0, 1, 1], [], []>} : vector<128x384xf32>, vector<384x128xf32>, vector<128x128xf32> -> vector<128x128xf32>
    %69 = arith.addf %58, %68 : vector<128x128xf32>
    %70 = vector.extract_strided_slice %46 {offsets = [2, 0, 0], sizes = [8, 18, 128], strides = [1, 1, 1]} : vector<10x18x128xf32> to vector<8x18x128xf32>
    %71 = vector.extract_strided_slice %70 {offsets = [0, 0, 0], sizes = [8, 18, 128], strides = [1, 1, 1]} : vector<8x18x128xf32> to vector<8x18x128xf32>
    %72 = vector.extract_strided_slice %71 {offsets = [0, 0, 0], sizes = [8, 16, 128], strides = [1, 1, 1]} : vector<8x18x128xf32> to vector<8x16x128xf32>
    %73 = vector.extract_strided_slice %71 {offsets = [0, 1, 0], sizes = [8, 16, 128], strides = [1, 1, 1]} : vector<8x18x128xf32> to vector<8x16x128xf32>
    %74 = vector.extract_strided_slice %71 {offsets = [0, 2, 0], sizes = [8, 16, 128], strides = [1, 1, 1]} : vector<8x18x128xf32> to vector<8x16x128xf32>
    %75 = tpu.concatenate %72, %73, %74 in 2 : vector<8x16x128xf32>, vector<8x16x128xf32>, vector<8x16x128xf32> -> vector<8x16x384xf32>
    %76 = vector.shape_cast %75 : vector<8x16x384xf32> to vector<128x384xf32>
    %c2 = arith.constant 2 : index
    %c0_44 = arith.constant 0 : index
    %c0_45 = arith.constant 0 : index
    %77 = vector.load %arg5[%c2, %c0_44, %c0_45] : memref<3x384x128xf32, #tpu.memory_space<vmem>>, vector<1x384x128xf32>
    %78 = vector.shape_cast %77 : vector<1x384x128xf32> to vector<384x128xf32>
    %cst_46 = arith.constant dense<0.000000e+00> : vector<128x128xf32>
    %79 = tpu.matmul %76, %78, %cst_46 {dimension_numbers = #tpu.dot_dimension_numbers<[1], [0], [0], [1], [0, 0, 1, 1], [], []>} : vector<128x384xf32>, vector<384x128xf32>, vector<128x128xf32> -> vector<128x128xf32>
    %80 = arith.addf %69, %79 : vector<128x128xf32>
    %c0_47 = arith.constant 0 : index
    %c0_48 = arith.constant 0 : index
    %81 = vector.load %arg6[%c0_47, %c0_48] : memref<1x128xf32, #tpu.memory_space<vmem>>, vector<1x128xf32>
    %82 = vector.broadcast %81 : vector<1x128xf32> to vector<128x128xf32>
    %83 = arith.addf %80, %82 : vector<128x128xf32>
    %cst_49 = arith.constant 0.000000e+00 : f32
    %84 = vector.broadcast %cst_49 : f32 to vector<128x128xf32>
    %85 = arith.maximumf %83, %84 : vector<128x128xf32>
    %86 = vector.shape_cast %85 : vector<128x128xf32> to vector<1x8x16x128xf32>
    %c0_50 = arith.constant 0 : index
    %c0_51 = arith.constant 0 : index
    %c0_52 = arith.constant 0 : index
    %c0_53 = arith.constant 0 : index
    %87 = vector.load %arg7[%c0_50, %c0_51, %c0_52, %c0_53] : memref<1x8x16x128xf32, #tpu.memory_space<vmem>>, vector<1x8x16x128xf32>
    tpu.vector_store %arg7[%c0_50, %c0_51, %c0_52, %c0_53], %86 {strides = array<i32>} : memref<1x8x16x128xf32, #tpu.memory_space<vmem>>, vector<1x8x16x128xf32>,
    return
  }
  func.func @transform_1(%arg0: i32, %arg1: i32) -> (i32, i32) {
    %c0_i32 = arith.constant 0 : i32
    %c0_i32_0 = arith.constant 0 : i32
    %c0_i32_1 = arith.constant 0 : i32
    return %c0_i32, %c0_i32_0 : i32, i32
  }
  func.func @transform_2(%arg0: i32, %arg1: i32) -> (i32, i32) {
    %c0_i32 = arith.constant 0 : i32
    %c0_i32_0 = arith.constant 0 : i32
    %c0_i32_1 = arith.constant 0 : i32
    return %c0_i32, %c0_i32_0 : i32, i32
  }
  func.func @transform_3(%arg0: i32, %arg1: i32) -> (i32, i32, i32) {
    %c0_i32 = arith.constant 0 : i32
    %c0_i32_0 = arith.constant 0 : i32
    %c0_i32_1 = arith.constant 0 : i32
    %c0_i32_2 = arith.constant 0 : i32
    return %c0_i32, %c0_i32_0, %c0_i32_1 : i32, i32, i32
  }
  func.func @transform_4(%arg0: i32, %arg1: i32) -> (i32, i32) {
    %c0_i32 = arith.constant 0 : i32
    %c0_i32_0 = arith.constant 0 : i32
    %c0_i32_1 = arith.constant 0 : i32
    return %c0_i32, %c0_i32_0 : i32, i32
  }
  func.func @transform_5(%arg0: i32, %arg1: i32) -> (i32, i32, i32, i32) {
    %c0_i32 = arith.constant 0 : i32
    %c0_i32_0 = arith.constant 0 : i32
    %c0_i32_1 = arith.constant 0 : i32
    return %arg0, %arg1, %c0_i32, %c0_i32_0 : i32, i32, i32, i32
  }
}

</mosaic_0001>

<bundles_post_ra>
// kernel: bottleneck_forward.3
= control target key start
LH: loop header
LB: loop body
LE: loop exit
PB: predicated region body
PF: predicated region fallthrough
CT: control target
= control target key end

     0   :  { %s1674_s21 = smov 0   ;;  %s1676_s22 = smov 0   ;;  %s1990_s0 = inlined_call_operand.vmem [shape: f32[512,128], index: 0, kind: input, shape index: {}]   ;;  %s1991_s1 = inlined_call_operand.vmem [shape: f32[128,128], index: 1, kind: input, shape index: {}]   ;;  %s1992_s2 = inlined_call_operand.vmem [shape: f32[1,128], index: 2, kind: input, shape index: {}]   ;;  %s1993_s3 = inlined_call_operand.vmem [shape: f32[512,128], index: 3, kind: input, shape index: {}]   ;;  %s1994_s4 = inlined_call_operand.vmem [shape: f32[128,128], index: 4, kind: input, shape index: {}]   ;;  %s1995_s5 = inlined_call_operand.vmem [shape: f32[1,128], index: 5, kind: input, shape index: {}]   ;;  %s1996_s6 = inlined_call_operand.vmem [shape: f32[512,128], index: 6, kind: output, shape index: {}]  }
   0x1   :  { %s1678_s23 = smov 0  }
   0x2 LB: > { %s28_s24 = sadd.s32 1, %s1633_s22  ;;  %p1196_p0 = scmp.ge.s32.totalorder %s1637_s23, 1  ;;  %s1637_s23 = sphi %s1678_s23, %s16_s23   ;;  %s1633_s22 = sphi %s1676_s22, %s1998_s22   ;;  %s1629_s21 = sphi %s1674_s21, %s1997_s21  }
   0x3   : > { %p30_p1 = scmp.ge.s32.totalorder %s28_s24, 2  ;;  %p272_p2 = scmp.lt.s32.totalorder %s1637_s23, 3 }
   0x5   : > { %s2000_s24 = smov (%p30_p1, %s28_s24), 0  ;;  %p273_p3 = pnand %p1196_p0, %p272_p2 }
   0x6   : > { %v391_v0 = vld [vmem:[%s1991_s1] sm:$0xff] (!%p273_p3)  ;;  %v392_v1 = vld [vmem:[%s1991_s1 + $0x8] sm:$0xff] (!%p273_p3)  ;;  %s1197_s7 = sshll.u32 (!%p273_p3), %s1629_s21, 5  ;;  %v393_v5 = vld [vmem:[%s1991_s1 + $0x10] sm:$0xff] (!%p273_p3) }
   0x7   : > { %276 = sbr.rel (%p273_p3) target bundleno = 323 (0x143), region = 44  ;;  %v671_v2 = vld [vmem:[%s1994_s4] sm:$0xff] (!%p273_p3)  ;;  %v1463_v3 = vpack.c.bf16 (!%p273_p3), %v392_v1, %v391_v0  ;;  %v672_v4 = vld [vmem:[%s1994_s4 + $0x8] sm:$0xff] (!%p273_p3)  ;;  %v394_v6 = vld [vmem:[%s1991_s1 + $0x18] sm:$0xff] (!%p273_p3)  ;;  %p325_p4 = scmp.lt.s32.totalorder (!%p273_p3), %s1197_s7, 63 }
   0x8   : > { %v1495_v7 = vpack.c.bf16 (!%p273_p3), %v672_v4, %v671_v2  ;;  %v1467_v8 = vpack.c.bf16 (!%p273_p3), %v394_v6, %v393_v5  ;;  %v673_v9 = vld [vmem:[%s1994_s4 + $0x10] sm:$0xff] (!%p273_p3)  ;;  %v674_v10 = vld [vmem:[%s1994_s4 + $0x18] sm:$0xff] (!%p273_p3)  ;;  %v395_v11 = vld [vmem:[%s1991_s1 + $0x20] sm:$0xff] (!%p273_p3) }
   0x9   : > { %1464 = vmatprep.subr.bf16.mxu1 (!%p273_p3), %v1463_v3  ;;  %v1499_v12 = vpack.c.bf16 (!%p273_p3), %v674_v10, %v673_v9  ;;  %v396_v13 = vld [vmem:[%s1991_s1 + $0x28] sm:$0xff] (!%p273_p3)  ;;  %v675_v14 = vld [vmem:[%s1994_s4 + $0x20] sm:$0xff] (!%p273_p3)  ;;  %v397_v18 = vld [vmem:[%s1991_s1 + $0x30] sm:$0xff] (!%p273_p3) }
   0xa   : > { %v676_v15 = vld [vmem:[%s1994_s4 + $0x28] sm:$0xff] (!%p273_p3)  ;;  %1466 = vmatpush3.bf16.msra.mxu1 (!%p273_p3), %v1463_v3  ;;  %1496 = vmatprep.subr.bf16.mxu0 (!%p273_p3), %v1495_v7  ;;  %v1471_v16 = vpack.c.bf16 (!%p273_p3), %v396_v13, %v395_v11  ;;  %v398_v19 = vld [vmem:[%s1991_s1 + $0x38] sm:$0xff] (!%p273_p3)  ;;  %v677_v20 = vld [vmem:[%s1994_s4 + $0x30] sm:$0xff] (!%p273_p3) }
   0xb   : > { %1498 = vmatpush3.bf16.msra.mxu0 (!%p273_p3), %v1495_v7  ;;  %1468 = vmatprep.subr.bf16.mxu1 (!%p273_p3), %v1467_v8  ;;  %v1503_v17 = vpack.c.bf16 (!%p273_p3), %v676_v15, %v675_v14  ;;  %v678_v21 = vld [vmem:[%s1994_s4 + $0x38] sm:$0xff] (!%p273_p3)  ;;  %v1475_v22 = vpack.c.bf16 (!%p273_p3), %v398_v19, %v397_v18  ;;  %v399_v24 = vld [vmem:[%s1991_s1 + $0x40] sm:$0xff] (!%p273_p3)  ;;  %v400_v25 = vld [vmem:[%s1991_s1 + $0x48] sm:$0xff] (!%p273_p3) }
   0xc   : > { %1500 = vmatprep.subr.bf16.mxu0 (!%p273_p3), %v1499_v12  ;;  %v1507_v23 = vpack.c.bf16 (!%p273_p3), %v678_v21, %v677_v20  ;;  %v679_v27 = vld [vmem:[%s1994_s4 + $0x40] sm:$0xff] (!%p273_p3)  ;;  %v680_v28 = vld [vmem:[%s1994_s4 + $0x48] sm:$0xff] (!%p273_p3)  ;;  %v1479_v30 = vpack.c.bf16 (!%p273_p3), %v400_v25, %v399_v24  ;;  %v401_v32 = vld [vmem:[%s1991_s1 + $0x50] sm:$0xff] (!%p273_p3) }
   0xd   : > { %v1511_v31 = vpack.c.bf16 (!%p273_p3), %v680_v28, %v679_v27  ;;  %v402_v33 = vld [vmem:[%s1991_s1 + $0x58] sm:$0xff] (!%p273_p3)  ;;  %v681_v34 = vld [vmem:[%s1994_s4 + $0x50] sm:$0xff] (!%p273_p3)  ;;  %v403_v38 = vld [vmem:[%s1991_s1 + $0x60] sm:$0xff] (!%p273_p3) }
   0xe   : > { %s2002_s7 = smov (!%p325_p4, %s1197_s7), 63  ;;  %1470 = vmatpush3.bf16.msra.mxu1 %v1467_v8  ;;  %v682_v35 = vld [vmem:[%s1994_s4 + $0x58] sm:$0xff]  ;;  %v1483_v36 = vpack.c.bf16 %v402_v33, %v401_v32  ;;  %v404_v39 = vld [vmem:[%s1991_s1 + $0x68] sm:$0xff]  ;;  %v683_v40 = vld [vmem:[%s1994_s4 + $0x60] sm:$0xff] }
   0xf   : > { %s1731_s29 = sshll.u32 %s2002_s7, 3  ;;  %1502 = vmatpush3.bf16.msra.mxu0 %v1499_v12  ;;  %1472 = vmatprep.subr.bf16.mxu1 %v1471_v16  ;;  %v1515_v37 = vpack.c.bf16 %v682_v35, %v681_v34  ;;  %v684_v41 = vld [vmem:[%s1994_s4 + $0x68] sm:$0xff]  ;;  %v1487_v42 = vpack.c.bf16 %v404_v39, %v403_v38  ;;  %v405_v44 = vld [vmem:[%s1991_s1 + $0x70] sm:$0xff]  ;;  %v406_v45 = vld [vmem:[%s1991_s1 + $0x78] sm:$0xff] }
  0x10   : > { %s1749_s16 = scalar_lea.vmem %s1990_s0, %s1731_s29  ;;  %s1755_s19 = scalar_lea.vmem %s1993_s3, %s1731_s29  ;;  %1504 = vmatprep.subr.bf16.mxu0 %v1503_v17  ;;  %v1519_v43 = vpack.c.bf16 %v684_v41, %v683_v40  ;;  %v685_v46 = vld [vmem:[%s1994_s4 + $0x70] sm:$0xff]  ;;  %v686_v47 = vld [vmem:[%s1994_s4 + $0x78] sm:$0xff]  ;;  %v1491_v48 = vpack.c.bf16 %v406_v45, %v405_v44 }
  0x11   : > { %v359_v26 = vld [vmem:[%s1749_s16] sm:$0xff]  ;;  %v1523_v49 = vpack.c.bf16 %v686_v47, %v685_v46  ;;  %v360_v50 = vld [vmem:[%s1749_s16 + $0x8] sm:$0xff]  ;;  %v361_v52 = vld [vmem:[%s1749_s16 + $0x10] sm:$0xff]  ;;  %s1887_s20 = scalar_lea.vmem %s1996_s6, %s1731_s29 }
  0x12   : > { %1335 = vmatprep.mubr.f32.mxu1 %v359_v26  ;;  %v639_v29 = vld [vmem:[%s1755_s19] sm:$0xff]  ;;  %1474 = vmatpush3.bf16.msra.mxu1 %v1471_v16  ;;  %v640_v51 = vld [vmem:[%s1755_s19 + $0x8] sm:$0xff]  ;;  %v641_v53 = vld [vmem:[%s1755_s19 + $0x10] sm:$0xff] }
  0x13   : > { %1415 = vmatprep.mubr.f32.mxu0 %v639_v29  ;;  %1506 = vmatpush3.bf16.msra.mxu0 %v1503_v17  ;;  %v362_v54 = vld [vmem:[%s1749_s16 + $0x18] sm:$0xff]  ;;  %v363_v56 = vld [vmem:[%s1749_s16 + $0x20] sm:$0xff]  ;;  %v364_v58 = vld [vmem:[%s1749_s16 + $0x28] sm:$0xff] }
  0x14   : > { %1476 = vmatprep.subr.bf16.mxu1 %v1475_v22  ;;  %1508 = vmatprep.subr.bf16.mxu0 %v1507_v23  ;;  %v642_v55 = vld [vmem:[%s1755_s19 + $0x18] sm:$0xff]  ;;  %v643_v57 = vld [vmem:[%s1755_s19 + $0x20] sm:$0xff]  ;;  %v644_v59 = vld [vmem:[%s1755_s19 + $0x28] sm:$0xff] }
  0x15   : > { %v365_v60 = vld [vmem:[%s1749_s16 + $0x30] sm:$0xff]  ;;  %v366_v62 = vld [vmem:[%s1749_s16 + $0x38] sm:$0xff]  ;;  %v367_v0 = vld [vmem:[%s1749_s16 + $0x40] sm:$0xff] }
  0x16   : > { %1478 = vmatpush3.bf16.msra.mxu1 %v1475_v22  ;;  %v645_v61 = vld [vmem:[%s1755_s19 + $0x30] sm:$0xff]  ;;  %v646_v63 = vld [vmem:[%s1755_s19 + $0x38] sm:$0xff]  ;;  %v647_v1 = vld [vmem:[%s1755_s19 + $0x40] sm:$0xff] }
  0x17   : > { %1510 = vmatpush3.bf16.msra.mxu0 %v1507_v23  ;;  %1480 = vmatprep.subr.bf16.mxu1 %v1479_v30  ;;  %v368_v2 = vld [vmem:[%s1749_s16 + $0x48] sm:$0xff]  ;;  %v369_v4 = vld [vmem:[%s1749_s16 + $0x50] sm:$0xff]  ;;  %v370_v6 = vld [vmem:[%s1749_s16 + $0x58] sm:$0xff] }
  0x18   : > { %1512 = vmatprep.subr.bf16.mxu0 %v1511_v31  ;;  %v648_v3 = vld [vmem:[%s1755_s19 + $0x48] sm:$0xff]  ;;  %v649_v5 = vld [vmem:[%s1755_s19 + $0x50] sm:$0xff]  ;;  %v650_v7 = vld [vmem:[%s1755_s19 + $0x58] sm:$0xff] }
  0x19   : > { %v371_v8 = vld [vmem:[%s1749_s16 + $0x60] sm:$0xff]  ;;  %v372_v10 = vld [vmem:[%s1749_s16 + $0x68] sm:$0xff]  ;;  %v373_v12 = vld [vmem:[%s1749_s16 + $0x70] sm:$0xff] }
  0x1a   : > { %1482 = vmatpush3.bf16.msra.mxu1 %v1479_v30  ;;  %v651_v9 = vld [vmem:[%s1755_s19 + $0x60] sm:$0xff]  ;;  %v652_v11 = vld [vmem:[%s1755_s19 + $0x68] sm:$0xff]  ;;  %v653_v13 = vld [vmem:[%s1755_s19 + $0x70] sm:$0xff] }
  0x1b   : > { %1514 = vmatpush3.bf16.msra.mxu0 %v1511_v31  ;;  %1484 = vmatprep.subr.bf16.mxu1 %v1483_v36  ;;  %v374_v14 = vld [vmem:[%s1749_s16 + $0x78] sm:$0xff]  ;;  %v375_v16 = vld [vmem:[%s1749_s16 + $0x80] sm:$0xff]  ;;  %v376_v18 = vld [vmem:[%s1749_s16 + $0x88] sm:$0xff] }
  0x1c   : > { %1516 = vmatprep.subr.bf16.mxu0 %v1515_v37  ;;  %v654_v15 = vld [vmem:[%s1755_s19 + $0x78] sm:$0xff]  ;;  %v655_v17 = vld [vmem:[%s1755_s19 + $0x80] sm:$0xff]  ;;  %v656_v19 = vld [vmem:[%s1755_s19 + $0x88] sm:$0xff] }
  0x1d   : > { %v377_v20 = vld [vmem:[%s1749_s16 + $0x90] sm:$0xff]  ;;  %v378_v22 = vld [vmem:[%s1749_s16 + $0x98] sm:$0xff]  ;;  %v379_v24 = vld [vmem:[%s1749_s16 + $0xa0] sm:$0xff] }
  0x1e   : > { %1486 = vmatpush3.bf16.msra.mxu1 %v1483_v36  ;;  %v657_v21 = vld [vmem:[%s1755_s19 + $0x90] sm:$0xff]  ;;  %v658_v23 = vld [vmem:[%s1755_s19 + $0x98] sm:$0xff]  ;;  %v659_v25 = vld [vmem:[%s1755_s19 + $0xa0] sm:$0xff] }
  0x1f   : > { %1518 = vmatpush3.bf16.msra.mxu0 %v1515_v37  ;;  %1488 = vmatprep.subr.bf16.mxu1 %v1487_v42  ;;  %v380_v26 = vld [vmem:[%s1749_s16 + $0xa8] sm:$0xff]  ;;  %v381_v28 = vld [vmem:[%s1749_s16 + $0xb0] sm:$0xff]  ;;  %v382_v30 = vld [vmem:[%s1749_s16 + $0xb8] sm:$0xff] }
  0x20   : > { %1520 = vmatprep.subr.bf16.mxu0 %v1519_v43  ;;  %v660_v27 = vld [vmem:[%s1755_s19 + $0xa8] sm:$0xff]  ;;  %v661_v29 = vld [vmem:[%s1755_s19 + $0xb0] sm:$0xff]  ;;  %v662_v31 = vld [vmem:[%s1755_s19 + $0xb8] sm:$0xff] }
  0x21   : > { %v383_v32 = vld [vmem:[%s1749_s16 + $0xc0] sm:$0xff]  ;;  %v384_v34 = vld [vmem:[%s1749_s16 + $0xc8] sm:$0xff]  ;;  %v385_v36 = vld [vmem:[%s1749_s16 + $0xd0] sm:$0xff] }
  0x22   : > { %1490 = vmatpush3.bf16.msra.mxu1 %v1487_v42  ;;  %v663_v33 = vld [vmem:[%s1755_s19 + $0xc0] sm:$0xff]  ;;  %v664_v35 = vld [vmem:[%s1755_s19 + $0xc8] sm:$0xff]  ;;  %v665_v37 = vld [vmem:[%s1755_s19 + $0xd0] sm:$0xff] }
  0x23   : > { %1522 = vmatpush3.bf16.msra.mxu0 %v1519_v43  ;;  %1492 = vmatprep.subr.bf16.mxu1 %v1491_v48  ;;  %v386_v38 = vld [vmem:[%s1749_s16 + $0xd8] sm:$0xff]  ;;  %v387_v40 = vld [vmem:[%s1749_s16 + $0xe0] sm:$0xff]  ;;  %v388_v42 = vld [vmem:[%s1749_s16 + $0xe8] sm:$0xff] }
  0x24   : > { %1524 = vmatprep.subr.bf16.mxu0 %v1523_v49  ;;  %v666_v39 = vld [vmem:[%s1755_s19 + $0xd8] sm:$0xff]  ;;  %v667_v41 = vld [vmem:[%s1755_s19 + $0xe0] sm:$0xff]  ;;  %v668_v43 = vld [vmem:[%s1755_s19 + $0xe8] sm:$0xff] }
  0x25   : > { %v389_v44 = vld [vmem:[%s1749_s16 + $0xf0] sm:$0xff]  ;;  %v390_v46 = vld [vmem:[%s1749_s16 + $0xf8] sm:$0xff] }
  0x26   : > { %1494 = vmatpush3.bf16.msra.mxu1 %v1491_v48  ;;  %v669_v45 = vld [vmem:[%s1755_s19 + $0xf0] sm:$0xff]  ;;  %v670_v47 = vld [vmem:[%s1755_s19 + $0xf8] sm:$0xff]  ;;  %v1872_v48 = vld [vmem:[%s1992_s2] ss:$0 sm:$0xff] }
  0x27   : > { %1526 = vmatpush3.bf16.msra.mxu0 %v1523_v49 }
  0x29   : > { %1336 = vmatmul.mubr.f32.vlgmr.msra.gmra.mrb[0].mxu1 %v360_v50 }
  0x2a   : > { %1416 = vmatmul.mubr.f32.vlgmr.msra.gmra.mrb[0].mxu0 %v640_v51  ;;  %1338 = vmatprep.mubr.f32.mxu1 %v361_v52 }
  0x2b   : > { %1418 = vmatprep.mubr.f32.mxu0 %v641_v53 }
  0x2d   : > { %1339 = vmatmul.mubr.f32.gmra.mrb[2].mxu1 %v362_v54  ;;  %v1879_v54 = vld [vmem:[%s1995_s5] ss:$0 sm:$0xff] }
  0x2e   : > { %1419 = vmatmul.mubr.f32.gmra.mrb[2].mxu0 %v642_v55  ;;  %1341 = vmatprep.mubr.f32.mxu1 %v363_v56 }
  0x2f   : > { %1421 = vmatprep.mubr.f32.mxu0 %v643_v57 }
  0x31   : > { %1342 = vmatmul.mubr.f32.gmra.mrb[4].mxu1 %v364_v58 }
  0x32   : > { %1422 = vmatmul.mubr.f32.gmra.mrb[4].mxu0 %v644_v59  ;;  %1344 = vmatprep.mubr.f32.mxu1 %v365_v60 }
  0x33   : > { %1424 = vmatprep.mubr.f32.mxu0 %v645_v61 }
  0x35   : > { %1345 = vmatmul.mubr.f32.gmra.mrb[6].mxu1 %v366_v62 }
  0x36   : > { %1425 = vmatmul.mubr.f32.gmra.mrb[6].mxu0 %v646_v63  ;;  %1347 = vmatprep.mubr.f32.mxu1 %v367_v0 }
  0x37   : > { %1427 = vmatprep.mubr.f32.mxu0 %v647_v1 }
  0x39   : > { %1348 = vmatmul.mubr.f32.gmra.mrb[8].mxu1 %v368_v2 }
  0x3a   : > { %1428 = vmatmul.mubr.f32.gmra.mrb[8].mxu0 %v648_v3  ;;  %1350 = vmatprep.mubr.f32.mxu1 %v369_v4 }
  0x3b   : > { %1430 = vmatprep.mubr.f32.mxu0 %v649_v5 }
  0x3d   : > { %1351 = vmatmul.mubr.f32.gmra.mrb[10].mxu1 %v370_v6 }
  0x3e   : > { %1431 = vmatmul.mubr.f32.gmra.mrb[10].mxu0 %v650_v7  ;;  %1353 = vmatprep.mubr.f32.mxu1 %v371_v8 }
  0x3f   : > { %1433 = vmatprep.mubr.f32.mxu0 %v651_v9 }
  0x41   : > { %1354 = vmatmul.mubr.f32.gmra.mrb[12].mxu1 %v372_v10 }
  0x42   : > { %1434 = vmatmul.mubr.f32.gmra.mrb[12].mxu0 %v652_v11  ;;  %1356 = vmatprep.mubr.f32.mxu1 %v373_v12 }
  0x43   : > { %1436 = vmatprep.mubr.f32.mxu0 %v653_v13 }
  0x45   : > { %1357 = vmatmul.mubr.f32.gmra.mrb[14].mxu1 %v374_v14 }
  0x46   : > { %1437 = vmatmul.mubr.f32.gmra.mrb[14].mxu0 %v654_v15  ;;  %1359 = vmatprep.mubr.f32.mxu1 %v375_v16 }
  0x47   : > { %1439 = vmatprep.mubr.f32.mxu0 %v655_v17 }
  0x49   : > { %1360 = vmatmul.mubr.f32.gmra.mrb[16].mxu1 %v376_v18 }
  0x4a   : > { %1440 = vmatmul.mubr.f32.gmra.mrb[16].mxu0 %v656_v19  ;;  %1362 = vmatprep.mubr.f32.mxu1 %v377_v20 }
  0x4b   : > { %1442 = vmatprep.mubr.f32.mxu0 %v657_v21 }
  0x4d   : > { %1363 = vmatmul.mubr.f32.gmra.mrb[18].mxu1 %v378_v22 }
  0x4e   : > { %1443 = vmatmul.mubr.f32.gmra.mrb[18].mxu0 %v658_v23  ;;  %1365 = vmatprep.mubr.f32.mxu1 %v379_v24 }
  0x4f   : > { %1445 = vmatprep.mubr.f32.mxu0 %v659_v25 }
  0x51   : > { %1366 = vmatmul.mubr.f32.gmra.mrb[20].mxu1 %v380_v26 }
  0x52   : > { %1446 = vmatmul.mubr.f32.gmra.mrb[20].mxu0 %v660_v27  ;;  %1368 = vmatprep.mubr.f32.mxu1 %v381_v28 }
  0x53   : > { %1448 = vmatprep.mubr.f32.mxu0 %v661_v29 }
  0x55   : > { %1369 = vmatmul.mubr.f32.gmra.mrb[22].mxu1 %v382_v30 }
  0x56   : > { %1449 = vmatmul.mubr.f32.gmra.mrb[22].mxu0 %v662_v31  ;;  %1371 = vmatprep.mubr.f32.mxu1 %v383_v32 }
  0x57   : > { %1451 = vmatprep.mubr.f32.mxu0 %v663_v33 }
  0x59   : > { %1372 = vmatmul.mubr.f32.gmra.mrb[24].mxu1 %v384_v34 }
  0x5a   : > { %1452 = vmatmul.mubr.f32.gmra.mrb[24].mxu0 %v664_v35  ;;  %1374 = vmatprep.mubr.f32.mxu1 %v385_v36 }
  0x5b   : > { %1454 = vmatprep.mubr.f32.mxu0 %v665_v37 }
  0x5d   : > { %1375 = vmatmul.mubr.f32.gmra.mrb[26].mxu1 %v386_v38 }
  0x5e   : > { %1455 = vmatmul.mubr.f32.gmra.mrb[26].mxu0 %v666_v39  ;;  %1377 = vmatprep.mubr.f32.mxu1 %v387_v40 }
  0x5f   : > { %1457 = vmatprep.mubr.f32.mxu0 %v667_v41 }
  0x61   : > { %1378 = vmatmul.mubr.f32.gmra.mrb[28].mxu1 %v388_v42 }
  0x62   : > { %1458 = vmatmul.mubr.f32.gmra.mrb[28].mxu0 %v668_v43  ;;  %1380 = vmatprep.mubr.f32.mxu1 %v389_v44 }
  0x63   : > { %1460 = vmatprep.mubr.f32.mxu0 %v669_v45 }
  0x65   : > { %1381 = vmatmul.mubr.f32.gmra.mrb[30].mxu1 %v390_v46 }
  0x66   : > { %1461 = vmatmul.mubr.f32.gmra.mrb[30].mxu0 %v670_v47 }
  0xfc   : > { %v1337_v49 = vpop.f32.mrb[0].mxu1 }
  0xfd   : > { %v486_v50 = vadd.f32 %v1337_v49, %v1872_v48  ;;  %v480_v51 = vpop.f32.mrb[1].mxu1  ;;  %v1417_v52 = vpop.f32.mrb[0].mxu0 }
  0xfe   : > { %v481_v53 = vadd.f32 %v1872_v48, %v480_v51  ;;  %v753_v55 = vpop.f32.mrb[1].mxu0 }
  0xff   : > { %v913_v56 = vadd.f32 %v1417_v52, %v486_v50 }
 0x100   : > { %v912_v57 = vadd.f32 %v753_v55, %v481_v53  ;;  %v1340_v58 = vpop.f32.mrb[2].mxu1 }
 0x101   : > { %v952_v59 = vadd.f32 %v1879_v54, %v913_v56  ;;  %v496_v60 = vadd.f32 %v1340_v58, %v1872_v48  ;;  %v490_v61 = vpop.f32.mrb[3].mxu1  ;;  %v1420_v62 = vpop.f32.mrb[2].mxu0 }
 0x102   : > { %v951_v63 = vadd.f32 %v1879_v54, %v912_v57  ;;  %v491_v0 = vadd.f32 %v1872_v48, %v490_v61  ;;  %v763_v1 = vpop.f32.mrb[3].mxu0 }
 0x103   : > { %v984_v2 = vmax.f32 %v952_v59, 0.0  ;;  %v915_v3 = vadd.f32 %v1420_v62, %v496_v60 }
 0x104   : > { %v983_v4 = vmax.f32 %v951_v63, 0.0  ;;  %v914_v5 = vadd.f32 %v763_v1, %v491_v0  ;;  %v1343_v6 = vpop.f32.mrb[4].mxu1 }
 0x105   : > { %1016 = vst [vmem:[%s1887_s20 + $0x8] sm:$0xff] %v984_v2  ;;  %v954_v7 = vadd.f32 %v1879_v54, %v915_v3  ;;  %v506_v8 = vadd.f32 %v1343_v6, %v1872_v48  ;;  %v500_v9 = vpop.f32.mrb[5].mxu1  ;;  %v1423_v10 = vpop.f32.mrb[4].mxu0 }
 0x106   : > { %1015 = vst [vmem:[%s1887_s20] sm:$0xff] %v983_v4  ;;  %v953_v11 = vadd.f32 %v1879_v54, %v914_v5  ;;  %v501_v12 = vadd.f32 %v1872_v48, %v500_v9  ;;  %v773_v13 = vpop.f32.mrb[5].mxu0 }
 0x107   : > { %v986_v14 = vmax.f32 %v954_v7, 0.0  ;;  %v917_v15 = vadd.f32 %v1423_v10, %v506_v8 }
 0x108   : > { %v985_v16 = vmax.f32 %v953_v11, 0.0  ;;  %v916_v17 = vadd.f32 %v773_v13, %v501_v12  ;;  %v1346_v18 = vpop.f32.mrb[6].mxu1 }
 0x109   : > { %1018 = vst [vmem:[%s1887_s20 + $0x18] sm:$0xff] %v986_v14  ;;  %v956_v19 = vadd.f32 %v1879_v54, %v917_v15  ;;  %v516_v20 = vadd.f32 %v1346_v18, %v1872_v48  ;;  %v510_v21 = vpop.f32.mrb[7].mxu1  ;;  %v1426_v22 = vpop.f32.mrb[6].mxu0 }
 0x10a   : > { %1017 = vst [vmem:[%s1887_s20 + $0x10] sm:$0xff] %v985_v16  ;;  %v955_v23 = vadd.f32 %v1879_v54, %v916_v17  ;;  %v511_v24 = vadd.f32 %v1872_v48, %v510_v21  ;;  %v783_v25 = vpop.f32.mrb[7].mxu0 }
 0x10b   : > { %v988_v26 = vmax.f32 %v956_v19, 0.0  ;;  %v919_v27 = vadd.f32 %v1426_v22, %v516_v20 }
 0x10c   : > { %v987_v28 = vmax.f32 %v955_v23, 0.0  ;;  %v918_v29 = vadd.f32 %v783_v25, %v511_v24  ;;  %v1349_v30 = vpop.f32.mrb[8].mxu1 }
 0x10d   : > { %1020 = vst [vmem:[%s1887_s20 + $0x28] sm:$0xff] %v988_v26  ;;  %v958_v31 = vadd.f32 %v1879_v54, %v919_v27  ;;  %v526_v32 = vadd.f32 %v1349_v30, %v1872_v48  ;;  %v520_v33 = vpop.f32.mrb[9].mxu1  ;;  %v1429_v34 = vpop.f32.mrb[8].mxu0 }
 0x10e   : > { %1019 = vst [vmem:[%s1887_s20 + $0x20] sm:$0xff] %v987_v28  ;;  %v957_v35 = vadd.f32 %v1879_v54, %v918_v29  ;;  %v521_v36 = vadd.f32 %v1872_v48, %v520_v33  ;;  %v793_v37 = vpop.f32.mrb[9].mxu0 }
 0x10f   : > { %v990_v38 = vmax.f32 %v958_v31, 0.0  ;;  %v921_v39 = vadd.f32 %v1429_v34, %v526_v32 }
 0x110   : > { %v989_v40 = vmax.f32 %v957_v35, 0.0  ;;  %v920_v41 = vadd.f32 %v793_v37, %v521_v36  ;;  %v1352_v42 = vpop.f32.mrb[10].mxu1 }
 0x111   : > { %1022 = vst [vmem:[%s1887_s20 + $0x38] sm:$0xff] %v990_v38  ;;  %v960_v43 = vadd.f32 %v1879_v54, %v921_v39  ;;  %v536_v44 = vadd.f32 %v1352_v42, %v1872_v48  ;;  %v530_v45 = vpop.f32.mrb[11].mxu1  ;;  %v1432_v46 = vpop.f32.mrb[10].mxu0 }
 0x112   : > { %1021 = vst [vmem:[%s1887_s20 + $0x30] sm:$0xff] %v989_v40  ;;  %v959_v47 = vadd.f32 %v1879_v54, %v920_v41  ;;  %v531_v49 = vadd.f32 %v1872_v48, %v530_v45  ;;  %v803_v50 = vpop.f32.mrb[11].mxu0 }
 0x113   : > { %v992_v51 = vmax.f32 %v960_v43, 0.0  ;;  %v923_v52 = vadd.f32 %v1432_v46, %v536_v44 }
 0x114   : > { %v991_v53 = vmax.f32 %v959_v47, 0.0  ;;  %v922_v55 = vadd.f32 %v803_v50, %v531_v49  ;;  %v1355_v56 = vpop.f32.mrb[12].mxu1 }
 0x115   : > { %1024 = vst [vmem:[%s1887_s20 + $0x48] sm:$0xff] %v992_v51  ;;  %v962_v57 = vadd.f32 %v1879_v54, %v923_v52  ;;  %v546_v58 = vadd.f32 %v1355_v56, %v1872_v48  ;;  %v540_v59 = vpop.f32.mrb[13].mxu1  ;;  %v1435_v60 = vpop.f32.mrb[12].mxu0 }
 0x116   : > { %1023 = vst [vmem:[%s1887_s20 + $0x40] sm:$0xff] %v991_v53  ;;  %v961_v61 = vadd.f32 %v1879_v54, %v922_v55  ;;  %v541_v62 = vadd.f32 %v1872_v48, %v540_v59  ;;  %v813_v63 = vpop.f32.mrb[13].mxu0 }
 0x117   : > { %v994_v0 = vmax.f32 %v962_v57, 0.0  ;;  %v925_v1 = vadd.f32 %v1435_v60, %v546_v58 }
 0x118   : > { %v993_v2 = vmax.f32 %v961_v61, 0.0  ;;  %v924_v3 = vadd.f32 %v813_v63, %v541_v62  ;;  %v1358_v4 = vpop.f32.mrb[14].mxu1 }
 0x119   : > { %1026 = vst [vmem:[%s1887_s20 + $0x58] sm:$0xff] %v994_v0  ;;  %v964_v5 = vadd.f32 %v1879_v54, %v925_v1  ;;  %v556_v6 = vadd.f32 %v1358_v4, %v1872_v48  ;;  %v550_v7 = vpop.f32.mrb[15].mxu1  ;;  %v1438_v8 = vpop.f32.mrb[14].mxu0 }
 0x11a   : > { %1025 = vst [vmem:[%s1887_s20 + $0x50] sm:$0xff] %v993_v2  ;;  %v963_v9 = vadd.f32 %v1879_v54, %v924_v3  ;;  %v551_v10 = vadd.f32 %v1872_v48, %v550_v7  ;;  %v823_v11 = vpop.f32.mrb[15].mxu0 }
 0x11b   : > { %v996_v12 = vmax.f32 %v964_v5, 0.0  ;;  %v927_v13 = vadd.f32 %v1438_v8, %v556_v6 }
 0x11c   : > { %v995_v14 = vmax.f32 %v963_v9, 0.0  ;;  %v926_v15 = vadd.f32 %v823_v11, %v551_v10  ;;  %v1361_v16 = vpop.f32.mrb[16].mxu1 }
 0x11d   : > { %1028 = vst [vmem:[%s1887_s20 + $0x68] sm:$0xff] %v996_v12  ;;  %v966_v17 = vadd.f32 %v1879_v54, %v927_v13  ;;  %v566_v18 = vadd.f32 %v1361_v16, %v1872_v48  ;;  %v560_v19 = vpop.f32.mrb[17].mxu1  ;;  %v1441_v20 = vpop.f32.mrb[16].mxu0 }
 0x11e   : > { %1027 = vst [vmem:[%s1887_s20 + $0x60] sm:$0xff] %v995_v14  ;;  %v965_v21 = vadd.f32 %v1879_v54, %v926_v15  ;;  %v561_v22 = vadd.f32 %v1872_v48, %v560_v19  ;;  %v833_v23 = vpop.f32.mrb[17].mxu0 }
 0x11f   : > { %v998_v24 = vmax.f32 %v966_v17, 0.0  ;;  %v929_v25 = vadd.f32 %v1441_v20, %v566_v18 }
 0x120   : > { %v997_v26 = vmax.f32 %v965_v21, 0.0  ;;  %v928_v27 = vadd.f32 %v833_v23, %v561_v22  ;;  %v1364_v28 = vpop.f32.mrb[18].mxu1 }
 0x121   : > { %1030 = vst [vmem:[%s1887_s20 + $0x78] sm:$0xff] %v998_v24  ;;  %v968_v29 = vadd.f32 %v1879_v54, %v929_v25  ;;  %v576_v30 = vadd.f32 %v1364_v28, %v1872_v48  ;;  %v570_v31 = vpop.f32.mrb[19].mxu1  ;;  %v1444_v32 = vpop.f32.mrb[18].mxu0 }
 0x122   : > { %1029 = vst [vmem:[%s1887_s20 + $0x70] sm:$0xff] %v997_v26  ;;  %v967_v33 = vadd.f32 %v1879_v54, %v928_v27  ;;  %v571_v34 = vadd.f32 %v1872_v48, %v570_v31  ;;  %v843_v35 = vpop.f32.mrb[19].mxu0 }
 0x123   : > { %v1000_v36 = vmax.f32 %v968_v29, 0.0  ;;  %v931_v37 = vadd.f32 %v1444_v32, %v576_v30 }
 0x124   : > { %v999_v38 = vmax.f32 %v967_v33, 0.0  ;;  %v930_v39 = vadd.f32 %v843_v35, %v571_v34  ;;  %v1367_v40 = vpop.f32.mrb[20].mxu1 }
 0x125   : > { %1032 = vst [vmem:[%s1887_s20 + $0x88] sm:$0xff] %v1000_v36  ;;  %v970_v41 = vadd.f32 %v1879_v54, %v931_v37  ;;  %v586_v42 = vadd.f32 %v1367_v40, %v1872_v48  ;;  %v580_v43 = vpop.f32.mrb[21].mxu1  ;;  %v1447_v44 = vpop.f32.mrb[20].mxu0 }
 0x126   : > { %1031 = vst [vmem:[%s1887_s20 + $0x80] sm:$0xff] %v999_v38  ;;  %v969_v45 = vadd.f32 %v1879_v54, %v930_v39  ;;  %v581_v46 = vadd.f32 %v1872_v48, %v580_v43  ;;  %v853_v47 = vpop.f32.mrb[21].mxu0 }
 0x127   : > { %v1002_v49 = vmax.f32 %v970_v41, 0.0  ;;  %v933_v50 = vadd.f32 %v1447_v44, %v586_v42 }
 0x128   : > { %v1001_v51 = vmax.f32 %v969_v45, 0.0  ;;  %v932_v52 = vadd.f32 %v853_v47, %v581_v46  ;;  %v1370_v53 = vpop.f32.mrb[22].mxu1 }
 0x129   : > { %1034 = vst [vmem:[%s1887_s20 + $0x98] sm:$0xff] %v1002_v49  ;;  %v972_v55 = vadd.f32 %v1879_v54, %v933_v50  ;;  %v596_v56 = vadd.f32 %v1370_v53, %v1872_v48  ;;  %v590_v57 = vpop.f32.mrb[23].mxu1  ;;  %v1450_v58 = vpop.f32.mrb[22].mxu0 }
 0x12a   : > { %1033 = vst [vmem:[%s1887_s20 + $0x90] sm:$0xff] %v1001_v51  ;;  %v971_v59 = vadd.f32 %v1879_v54, %v932_v52  ;;  %v591_v60 = vadd.f32 %v1872_v48, %v590_v57  ;;  %v863_v61 = vpop.f32.mrb[23].mxu0 }
 0x12b   : > { %v1004_v62 = vmax.f32 %v972_v55, 0.0  ;;  %v935_v63 = vadd.f32 %v1450_v58, %v596_v56 }
 0x12c   : > { %v1003_v0 = vmax.f32 %v971_v59, 0.0  ;;  %v934_v1 = vadd.f32 %v863_v61, %v591_v60  ;;  %v1373_v2 = vpop.f32.mrb[24].mxu1 }
 0x12d   : > { %1036 = vst [vmem:[%s1887_s20 + $0xa8] sm:$0xff] %v1004_v62  ;;  %v974_v3 = vadd.f32 %v1879_v54, %v935_v63  ;;  %v606_v4 = vadd.f32 %v1373_v2, %v1872_v48  ;;  %v600_v5 = vpop.f32.mrb[25].mxu1  ;;  %v1453_v6 = vpop.f32.mrb[24].mxu0 }
 0x12e   : > { %1035 = vst [vmem:[%s1887_s20 + $0xa0] sm:$0xff] %v1003_v0  ;;  %v973_v7 = vadd.f32 %v1879_v54, %v934_v1  ;;  %v601_v8 = vadd.f32 %v1872_v48, %v600_v5  ;;  %v873_v9 = vpop.f32.mrb[25].mxu0 }
 0x12f   : > { %v1006_v10 = vmax.f32 %v974_v3, 0.0  ;;  %v937_v11 = vadd.f32 %v1453_v6, %v606_v4 }
 0x130   : > { %v1005_v12 = vmax.f32 %v973_v7, 0.0  ;;  %v936_v13 = vadd.f32 %v873_v9, %v601_v8  ;;  %v1376_v14 = vpop.f32.mrb[26].mxu1 }
 0x131   : > { %1038 = vst [vmem:[%s1887_s20 + $0xb8] sm:$0xff] %v1006_v10  ;;  %v976_v15 = vadd.f32 %v1879_v54, %v937_v11  ;;  %v616_v16 = vadd.f32 %v1376_v14, %v1872_v48  ;;  %v610_v17 = vpop.f32.mrb[27].mxu1  ;;  %v1456_v18 = vpop.f32.mrb[26].mxu0 }
 0x132   : > { %1037 = vst [vmem:[%s1887_s20 + $0xb0] sm:$0xff] %v1005_v12  ;;  %v975_v19 = vadd.f32 %v1879_v54, %v936_v13  ;;  %v611_v20 = vadd.f32 %v1872_v48, %v610_v17  ;;  %v883_v21 = vpop.f32.mrb[27].mxu0 }
 0x133   : > { %v1008_v22 = vmax.f32 %v976_v15, 0.0  ;;  %v939_v23 = vadd.f32 %v1456_v18, %v616_v16 }
 0x134   : > { %v1007_v24 = vmax.f32 %v975_v19, 0.0  ;;  %v938_v25 = vadd.f32 %v883_v21, %v611_v20  ;;  %v1379_v26 = vpop.f32.mrb[28].mxu1 }
 0x135   : > { %1040 = vst [vmem:[%s1887_s20 + $0xc8] sm:$0xff] %v1008_v22  ;;  %v978_v27 = vadd.f32 %v1879_v54, %v939_v23  ;;  %v626_v28 = vadd.f32 %v1379_v26, %v1872_v48  ;;  %v620_v29 = vpop.f32.mrb[29].mxu1  ;;  %v1459_v30 = vpop.f32.mrb[28].mxu0 }
 0x136   : > { %1039 = vst [vmem:[%s1887_s20 + $0xc0] sm:$0xff] %v1007_v24  ;;  %v977_v31 = vadd.f32 %v1879_v54, %v938_v25  ;;  %v621_v32 = vadd.f32 %v1872_v48, %v620_v29  ;;  %v893_v33 = vpop.f32.mrb[29].mxu0 }
 0x137   : > { %v1010_v34 = vmax.f32 %v978_v27, 0.0  ;;  %v941_v35 = vadd.f32 %v1459_v30, %v626_v28 }
 0x138   : > { %v1009_v36 = vmax.f32 %v977_v31, 0.0  ;;  %v940_v37 = vadd.f32 %v893_v33, %v621_v32  ;;  %v1382_v38 = vpop.f32.mrb[30].mxu1 }
 0x139   : > { %1042 = vst [vmem:[%s1887_s20 + $0xd8] sm:$0xff] %v1010_v34  ;;  %v980_v39 = vadd.f32 %v1879_v54, %v941_v35  ;;  %v636_v40 = vadd.f32 %v1382_v38, %v1872_v48  ;;  %v630_v41 = vpop.f32.mrb[31].mxu1  ;;  %v1462_v42 = vpop.f32.mrb[30].mxu0 }
 0x13a   : > { %1041 = vst [vmem:[%s1887_s20 + $0xd0] sm:$0xff] %v1009_v36  ;;  %v979_v43 = vadd.f32 %v1879_v54, %v940_v37  ;;  %v631_v44 = vadd.f32 %v1872_v48, %v630_v41  ;;  %v903_v45 = vpop.f32.mrb[31].mxu0 }
 0x13b   : > { %v1012_v46 = vmax.f32 %v980_v39, 0.0  ;;  %v943_v47 = vadd.f32 %v1462_v42, %v636_v40 }
 0x13c   : > { %v1011_v49 = vmax.f32 %v979_v43, 0.0  ;;  %v942_v50 = vadd.f32 %v903_v45, %v631_v44 }
 0x13d   : > { %1044 = vst [vmem:[%s1887_s20 + $0xe8] sm:$0xff] %v1012_v46  ;;  %v982_v51 = vadd.f32 %v1879_v54, %v943_v47 }
 0x13e   : > { %1043 = vst [vmem:[%s1887_s20 + $0xe0] sm:$0xff] %v1011_v49  ;;  %v981_v52 = vadd.f32 %v1879_v54, %v942_v50 }
 0x13f   : > { %v1014_v53 = vmax.f32 %v982_v51, 0.0 }
 0x140   : > { %v1013_v55 = vmax.f32 %v981_v52, 0.0 }
 0x141   : > { %1046 = vst [vmem:[%s1887_s20 + $0xf8] sm:$0xff] %v1014_v53 }
 0x142   : > { %1045 = vst [vmem:[%s1887_s20 + $0xf0] sm:$0xff] %v1013_v55 }
 0x143 PF: > { %s16_s23 = sadd.s32 1, %s1637_s23   ;;  %s1997_s21 = smov %s1633_s22 }
 0x144   : > { %p13_p5 = scmp.ge.s32.totalorder %s16_s23, 4   ;;  %s1998_s22 = smov %s2000_s24 }
 0x146   :  { %15 = sbr.rel (!%p13_p5) target bundleno = 2 (0x2), region = 89 }

// kernel: bottleneck_forward.2
= control target key start
LH: loop header
LB: loop body
LE: loop exit
PB: predicated region body
PF: predicated region fallthrough
CT: control target
= control target key end

     0   :  { %s3426_s18 = smov 0   ;;  %s3428_s19 = smov 0   ;;  %s4645_s0 = inlined_call_operand.vmem [shape: f32[2,16,16,128], index: 0, kind: input, shape index: {}]   ;;  %s4646_s1 = inlined_call_operand.vmem [shape: f32[128,128], index: 1, kind: input, shape index: {}]   ;;  %s4647_s2 = inlined_call_operand.vmem [shape: f32[1,128], index: 2, kind: input, shape index: {}]   ;;  %s4648_s3 = inlined_call_operand.vmem [shape: f32[3,384,128], index: 3, kind: input, shape index: {}]   ;;  %s4649_s4 = inlined_call_operand.vmem [shape: f32[1,128], index: 4, kind: input, shape index: {}]   ;;  %s4650_s5 = inlined_call_operand.vmem [shape: f32[2,16,16,128], index: 5, kind: output, shape index: {}]  }
   0x1   :  { %s3430_s20 = smov 0   ;;  %s3432_s21 = smov 0  }
   0x2   :  { %s3434_s22 = smov 0  }
   0x3 LB: > { %s24_s23 = sadd.s32 1, %s3383_s20  ;;  %s27_s24 = sadd.s32 1, %s3387_s21  ;;  %s3391_s22 = sphi %s3434_s22, %s15_s22   ;;  %s3387_s21 = sphi %s3432_s21, %s4665_s21   ;;  %s3383_s20 = sphi %s3430_s20, %s4664_s20   ;;  %s3379_s19 = sphi %s3428_s19, %s4663_s19   ;;  %s3375_s18 = sphi %s3426_s18, %s4662_s18  }
   0x4   : > { %p25_p0 = scmp.ge.s32.totalorder %s24_s23, 2  ;;  %p2215_p1 = scmp.ge.s32.totalorder %s3391_s22, 1 }
   0x5   : > { %p167_p2 = scmp.lt.s32.totalorder %s3391_s22, 5 }
   0x6   : > { %s4667_s23 = smov (%p25_p0, %s24_s23), 0  ;;  %s4669_s24 = smov (!%p25_p0, %s27_s24), %s3387_s21 }
   0x7   : > { %p168_p3 = pnand %p2215_p1, %p167_p2  ;;  %p29_p4 = scmp.ge.s32.totalorder %s4669_s24, 2 }
   0x9   : > { %s4671_s24 = smov (%p29_p4, %s4669_s24), 0  ;;  %171 = sbr.rel (%p168_p3) target bundleno = 796 (0x31c), region = 36 }
  0x10   : > { %s2216_s25 = sshll.u32 %s3375_s18, 3  ;;  %p194_p5 = scmp.lt.s32.totalorder %s3379_s19, 1 }
  0x11   : > { %p196_p6 = scmp.lt.s32.totalorder %s2216_s25, 15  ;;  %p204_p7 = scmp.lt.s32.totalorder %s3375_s18, 0 }
  0x12   : > { %s195_s26 = scalar_select %p194_p5, %s3379_s19, 1 }
  0x13   : > { %s4673_s25 = smov (!%p196_p6, %s2216_s25), 15  ;;  %s205_s28 = ssub.s32 0, %s3375_s18 }
  0x14   : > { %s2218_s27 = sshll.u32 %s195_s26, 5  ;;  %s2217_s29 = sshll.u32 %s4673_s25, 1 }
  0x15   : > { %s2220_s30 = smin.u32 %s3375_s18, %s205_s28  ;;  %s200_s6 = sadd.s32 %s2218_s27, %s2217_s29 }
  0x16   : > { %s207_s7 = sand.u32 1, %s2220_s30   ;;  %s2219_s8 = sshll.u32 %s200_s6, 3 }
  0x17   : > { %s208_s9 = ssub.s32 0, %s207_s7  ;;  %s3469_s12 = scalar_lea.vmem %s4650_s5, %s2219_s8 }
  0x18   : > { %s4675_s9 = smov (!%p204_p7, %s208_s9), %s207_s7  ;;  %p2223_p9 = scmp.ne.s32.totalorder %s3375_s18, 0 }
  0x19   : > { %p2222_p8 = scmp.lt.s32.totalorder %s4675_s9, 0  ;;  %s214_s13 = sadd.s32 2, %s4675_s9 }
  0x1a   : > { %219 = sbr.rel (%p2223_p9) target bundleno = 43 (0x2b), region = 40  ;;  %s2224_s14 = sshll.u32 (!%p2223_p9), %s3379_s19, 8 }
  0x1b   : > { %s4677_s13 = smov (!%p2222_p8, %s214_s13), %s4675_s9  ;;  %s3481_s25 = scalar_lea.vmem (!%p2223_p9), %s4645_s0, %s2224_s14 }
  0x1c   : > { %s2133_s15 = smul.u32 (!%p2223_p9), 160, %s4677_s13  ;;  %v258_v0 = vld [vmem:[%s3481_s25] sm:$0xff] (!%p2223_p9)  ;;  %v260_v1 = vld [vmem:[%s3481_s25 + $0x8] sm:$0xff] (!%p2223_p9)  ;;  %v262_v2 = vld [vmem:[%s3481_s25 + $0x10] sm:$0xff] (!%p2223_p9)  ;;  %s225_s27 = scalar_lea.sflag (!%p2223_p9), [#allocation4], %s4677_s13 }
  0x1d   : > { %v264_v3 = vld [vmem:[%s3481_s25 + $0x18] sm:$0xff] (!%p2223_p9)  ;;  %v266_v4 = vld [vmem:[%s3481_s25 + $0x20] sm:$0xff] (!%p2223_p9)  ;;  %v268_v5 = vld [vmem:[%s3481_s25 + $0x28] sm:$0xff] (!%p2223_p9) }
  0x1e   : > { %s3486_s26 = scalar_lea.vmem (!%p2223_p9), [#allocation2], %s2133_s15  ;;  %v270_v6 = vld [vmem:[%s3481_s25 + $0x30] sm:$0xff] (!%p2223_p9)  ;;  %v272_v7 = vld [vmem:[%s3481_s25 + $0x38] sm:$0xff] (!%p2223_p9)  ;;  %v274_v8 = vld [vmem:[%s3481_s25 + $0x40] sm:$0xff] (!%p2223_p9) }
  0x1f   : > { %2225 = vst [vmem:[%s3486_s26 + $0x10] sm:$0xff] (!%p2223_p9), %v258_v0  ;;  %2226 = vst [vmem:[%s3486_s26 + $0x18] sm:$0xff] (!%p2223_p9), %v260_v1  ;;  %v276_v9 = vld [vmem:[%s3481_s25 + $0x48] sm:$0xff] (!%p2223_p9)  ;;  %v278_v10 = vld [vmem:[%s3481_s25 + $0x50] sm:$0xff] (!%p2223_p9) }
  0x20   : > { %2227 = vst [vmem:[%s3486_s26 + $0x20] sm:$0xff] (!%p2223_p9), %v262_v2  ;;  %2228 = vst [vmem:[%s3486_s26 + $0x28] sm:$0xff] (!%p2223_p9), %v264_v3  ;;  %v280_v11 = vld [vmem:[%s3481_s25 + $0x58] sm:$0xff] (!%p2223_p9)  ;;  %v282_v12 = vld [vmem:[%s3481_s25 + $0x60] sm:$0xff] (!%p2223_p9) }
  0x21   : > { %2229 = vst [vmem:[%s3486_s26 + $0x30] sm:$0xff] %v266_v4  ;;  %2230 = vst [vmem:[%s3486_s26 + $0x38] sm:$0xff] %v268_v5  ;;  %v284_v13 = vld [vmem:[%s3481_s25 + $0x68] sm:$0xff]  ;;  %v286_v14 = vld [vmem:[%s3481_s25 + $0x70] sm:$0xff] }
  0x22   : > { %2231 = vst [vmem:[%s3486_s26 + $0x40] sm:$0xff] %v270_v6  ;;  %2232 = vst [vmem:[%s3486_s26 + $0x48] sm:$0xff] %v272_v7  ;;  %v288_v15 = vld [vmem:[%s3481_s25 + $0x78] sm:$0xff]  ;;  %v290_v16 = vld [vmem:[%s3481_s25 + $0x80] sm:$0xff] }
  0x23   : > { %2233 = vst [vmem:[%s3486_s26 + $0x50] sm:$0xff] %v274_v8  ;;  %2234 = vst [vmem:[%s3486_s26 + $0x58] sm:$0xff] %v276_v9  ;;  %v292_v17 = vld [vmem:[%s3481_s25 + $0x88] sm:$0xff] }
  0x24   : > { %2235 = vst [vmem:[%s3486_s26 + $0x60] sm:$0xff] %v278_v10  ;;  %2236 = vst [vmem:[%s3486_s26 + $0x68] sm:$0xff] %v280_v11 }
  0x25   : > { %2237 = vst [vmem:[%s3486_s26 + $0x70] sm:$0xff] %v282_v12  ;;  %2238 = vst [vmem:[%s3486_s26 + $0x78] sm:$0xff] %v284_v13 }
  0x26   : > { %2239 = vst [vmem:[%s3486_s26 + $0x80] sm:$0xff] %v286_v14  ;;  %2240 = vst [vmem:[%s3486_s26 + $0x88] sm:$0xff] %v288_v15 }
  0x27   : > { %2241 = vst [vmem:[%s3486_s26 + $0x90] sm:$0xff] %v290_v16  ;;  %2242 = vst [vmem:[%s3486_s26 + $0x98] sm:$0xff] %v292_v17 }
  0x28   : > { %301 = vsyncadd %s225_s27, 2304 }
  0x29   : > { %3367 = dma.done.wait %s225_s27, 2304 }
  0x2a   : > { %3368 = vsyncadd %s225_s27, 4294964992 }
  0x2b PF: > { %p2244_p10 = scmp.ne.s32.totalorder %s3375_s18, 1  ;;  %p3303_p11 = scmp.eq.s32.totalorder %s3375_s18, 1 }
  0x2c   : > { %s310_s28 = scalar_lea.sflag [#allocation4], %s4677_s13 }
  0x2d   : > { %3370 = dma.done.wait (%p3303_p11), %s310_s28, 2304 }
  0x2e   : > { %3372 = vsyncadd (%p3303_p11), %s310_s28, 4294964992  ;;  %s3526_s29 = sadd.s32 1, %s3375_s18 }
  0x2f   : > { %p2245_p12 = scmp.ge.s32.totalorder %s3526_s29, 2 }
  0x30   : > { %p320_p13 = scmp.lt.s32.totalorder (!%p2245_p12), %s3526_s29, 0  ;;  %s321_s30 = ssub.s32 (!%p2245_p12), 0, %s3526_s29 }
  0x31   : > { %319 = sbr.rel (%p2245_p12) target bundleno = 87 (0x57), region = 82  ;;  %s2246_s6 = smin.u32 (!%p2245_p12), %s321_s30, %s3526_s29 }
  0x32   : > { %s323_s7 = sand.u32 (!%p2245_p12), 1, %s2246_s6   ;;  %p2249_p1 = scmp.ne.s32.totalorder (!%p2245_p12), %s3526_s29, 0 }
  0x33   : > { %s324_s8 = ssub.s32 (!%p2245_p12), 0, %s323_s7 }
  0x38   : > { %s4679_s8 = smov (!%p320_p13, %s324_s8), %s323_s7  ;;  %335 = sbr.rel (%p2249_p1) target bundleno = 73 (0x49), region = 86 }
  0x39   : > { %p2248_p0 = scmp.lt.s32.totalorder %s4679_s8, 0  ;;  %s330_s9 = sadd.s32 2, %s4679_s8 }
  0x3a   : > { %s2250_s10 = sshll.u32 (!%p2249_p1), %s3379_s19, 8 }
  0x3b   : > { %s4681_s9 = smov (!%p2248_p0, %s330_s9), %s4679_s8  ;;  %s3540_s16 = scalar_lea.vmem (!%p2249_p1), %s4645_s0, %s2250_s10 }
  0x3c   : > { %s2140_s11 = smul.u32 (!%p2249_p1), 160, %s4681_s9  ;;  %v374_v18 = vld [vmem:[%s3540_s16] sm:$0xff] (!%p2249_p1)  ;;  %v376_v19 = vld [vmem:[%s3540_s16 + $0x8] sm:$0xff] (!%p2249_p1)  ;;  %v378_v20 = vld [vmem:[%s3540_s16 + $0x10] sm:$0xff] (!%p2249_p1)  ;;  %s341_s25 = scalar_lea.sflag (!%p2249_p1), [#allocation4], %s4681_s9 }
  0x3d   : > { %v380_v21 = vld [vmem:[%s3540_s16 + $0x18] sm:$0xff] (!%p2249_p1)  ;;  %v382_v22 = vld [vmem:[%s3540_s16 + $0x20] sm:$0xff] (!%p2249_p1)  ;;  %v384_v23 = vld [vmem:[%s3540_s16 + $0x28] sm:$0xff] (!%p2249_p1) }
  0x3e   : > { %s3545_s17 = scalar_lea.vmem (!%p2249_p1), [#allocation2], %s2140_s11  ;;  %v386_v24 = vld [vmem:[%s3540_s16 + $0x30] sm:$0xff] (!%p2249_p1)  ;;  %v388_v25 = vld [vmem:[%s3540_s16 + $0x38] sm:$0xff] (!%p2249_p1)  ;;  %v390_v26 = vld [vmem:[%s3540_s16 + $0x40] sm:$0xff] (!%p2249_p1) }
  0x3f   : > { %2251 = vst [vmem:[%s3545_s17 + $0x10] sm:$0xff] %v374_v18  ;;  %2252 = vst [vmem:[%s3545_s17 + $0x18] sm:$0xff] %v376_v19  ;;  %v392_v27 = vld [vmem:[%s3540_s16 + $0x48] sm:$0xff]  ;;  %v394_v28 = vld [vmem:[%s3540_s16 + $0x50] sm:$0xff] }
  0x40   : > { %2253 = vst [vmem:[%s3545_s17 + $0x20] sm:$0xff] %v378_v20  ;;  %2254 = vst [vmem:[%s3545_s17 + $0x28] sm:$0xff] %v380_v21  ;;  %v396_v29 = vld [vmem:[%s3540_s16 + $0x58] sm:$0xff]  ;;  %v398_v30 = vld [vmem:[%s3540_s16 + $0x60] sm:$0xff] }
  0x41   : > { %2255 = vst [vmem:[%s3545_s17 + $0x30] sm:$0xff] %v382_v22  ;;  %2256 = vst [vmem:[%s3545_s17 + $0x38] sm:$0xff] %v384_v23  ;;  %v400_v31 = vld [vmem:[%s3540_s16 + $0x68] sm:$0xff]  ;;  %v402_v32 = vld [vmem:[%s3540_s16 + $0x70] sm:$0xff] }
  0x42   : > { %2257 = vst [vmem:[%s3545_s17 + $0x40] sm:$0xff] %v386_v24  ;;  %2258 = vst [vmem:[%s3545_s17 + $0x48] sm:$0xff] %v388_v25  ;;  %v404_v33 = vld [vmem:[%s3540_s16 + $0x78] sm:$0xff]  ;;  %v406_v34 = vld [vmem:[%s3540_s16 + $0x80] sm:$0xff] }
  0x43   : > { %2259 = vst [vmem:[%s3545_s17 + $0x50] sm:$0xff] %v390_v26  ;;  %2260 = vst [vmem:[%s3545_s17 + $0x58] sm:$0xff] %v392_v27  ;;  %v408_v35 = vld [vmem:[%s3540_s16 + $0x88] sm:$0xff] }
  0x44   : > { %2261 = vst [vmem:[%s3545_s17 + $0x60] sm:$0xff] %v394_v28  ;;  %2262 = vst [vmem:[%s3545_s17 + $0x68] sm:$0xff] %v396_v29 }
  0x45   : > { %2263 = vst [vmem:[%s3545_s17 + $0x70] sm:$0xff] %v398_v30  ;;  %2264 = vst [vmem:[%s3545_s17 + $0x78] sm:$0xff] %v400_v31 }
  0x46   : > { %2265 = vst [vmem:[%s3545_s17 + $0x80] sm:$0xff] %v402_v32  ;;  %2266 = vst [vmem:[%s3545_s17 + $0x88] sm:$0xff] %v404_v33 }
  0x47   : > { %2267 = vst [vmem:[%s3545_s17 + $0x90] sm:$0xff] %v406_v34  ;;  %2268 = vst [vmem:[%s3545_s17 + $0x98] sm:$0xff] %v408_v35 }
  0x48   : > { %417 = vsyncadd %s341_s25, 2304 }
  0x49 PF: > { %p2270_p2 = scmp.ne.s32.totalorder %s3526_s29, 1 }
  0x4a   : > { %s2271_s26 = sshll.u32 (!%p2270_p2), %s3379_s19, 8  ;;  %s425_s27 = smul.u32 (!%p2270_p2), 160, %s4681_s9 }
  0x4b   : > { %421 = sbr.rel (%p2270_p2) target bundleno = 87 (0x57), region = 124  ;;  %s3587_s6 = scalar_lea.vmem (!%p2270_p2), %s4645_s0, %s2271_s26 }
  0x4c   : > { %v2272_v36 = vld [vmem:[%s3587_s6 + $0x70] sm:$0xff] (!%p2270_p2)  ;;  %v2273_v37 = vld [vmem:[%s3587_s6 + $0x78] sm:$0xff] (!%p2270_p2)  ;;  %v2274_v38 = vld [vmem:[%s3587_s6 + $0x80] sm:$0xff] (!%p2270_p2)  ;;  %s3592_s29 = scalar_lea.vmem (!%p2270_p2), [#allocation2], %s425_s27  ;;  %s427_s19 = scalar_lea.sflag (!%p2270_p2), [#allocation4], %s4681_s9 }
  0x4d   : > { %461 = vst [vmem:[%s3592_s29] sm:$0xff] (!%p2270_p2), %v2272_v36  ;;  %463 = vst [vmem:[%s3592_s29 + $0x8] sm:$0xff] (!%p2270_p2), %v2273_v37  ;;  %v2275_v39 = vld [vmem:[%s3587_s6 + $0x88] sm:$0xff] (!%p2270_p2)  ;;  %v2276_v40 = vld [vmem:[%s3587_s6 + $0x90] sm:$0xff] (!%p2270_p2) }
  0x4e   : > { %465 = vst [vmem:[%s3592_s29 + $0x10] sm:$0xff] (!%p2270_p2), %v2274_v38  ;;  %v2277_v41 = vld [vmem:[%s3587_s6 + $0x98] sm:$0xff] (!%p2270_p2)  ;;  %467 = vst [vmem:[%s3592_s29 + $0x18] sm:$0xff] (!%p2270_p2), %v2275_v39  ;;  %v2278_v42 = vld [vmem:[%s3587_s6 + $0xa0] sm:$0xff] (!%p2270_p2) }
  0x4f   : > { %469 = vst [vmem:[%s3592_s29 + $0x20] sm:$0xff] (!%p2270_p2), %v2276_v40  ;;  %471 = vst [vmem:[%s3592_s29 + $0x28] sm:$0xff] (!%p2270_p2), %v2277_v41  ;;  %v2279_v43 = vld [vmem:[%s3587_s6 + $0xa8] sm:$0xff] (!%p2270_p2)  ;;  %v2280_v44 = vld [vmem:[%s3587_s6 + $0xb0] sm:$0xff] (!%p2270_p2) }
  0x50   : > { %473 = vst [vmem:[%s3592_s29 + $0x30] sm:$0xff] (!%p2270_p2), %v2278_v42  ;;  %475 = vst [vmem:[%s3592_s29 + $0x38] sm:$0xff] (!%p2270_p2), %v2279_v43  ;;  %v2281_v45 = vld [vmem:[%s3587_s6 + $0xb8] sm:$0xff] (!%p2270_p2)  ;;  %v2282_v46 = vld [vmem:[%s3587_s6 + $0xc0] sm:$0xff] (!%p2270_p2) }
  0x51   : > { %477 = vst [vmem:[%s3592_s29 + $0x40] sm:$0xff] (!%p2270_p2), %v2280_v44  ;;  %v2283_v47 = vld [vmem:[%s3587_s6 + $0xc8] sm:$0xff] (!%p2270_p2)  ;;  %479 = vst [vmem:[%s3592_s29 + $0x48] sm:$0xff] (!%p2270_p2), %v2281_v45  ;;  %v2284_v48 = vld [vmem:[%s3587_s6 + $0xd0] sm:$0xff] (!%p2270_p2) }
  0x52   : > { %481 = vst [vmem:[%s3592_s29 + $0x50] sm:$0xff] %v2282_v46  ;;  %483 = vst [vmem:[%s3592_s29 + $0x58] sm:$0xff] %v2283_v47  ;;  %v2285_v49 = vld [vmem:[%s3587_s6 + $0xd8] sm:$0xff]  ;;  %v2286_v50 = vld [vmem:[%s3587_s6 + $0xe0] sm:$0xff] }
  0x53   : > { %485 = vst [vmem:[%s3592_s29 + $0x60] sm:$0xff] %v2284_v48  ;;  %487 = vst [vmem:[%s3592_s29 + $0x68] sm:$0xff] %v2285_v49  ;;  %v2287_v51 = vld [vmem:[%s3587_s6 + $0xe8] sm:$0xff]  ;;  %v2288_v52 = vld [vmem:[%s3587_s6 + $0xf0] sm:$0xff] }
  0x54   : > { %489 = vst [vmem:[%s3592_s29 + $0x70] sm:$0xff] %v2286_v50  ;;  %v2289_v53 = vld [vmem:[%s3587_s6 + $0xf8] sm:$0xff]  ;;  %491 = vst [vmem:[%s3592_s29 + $0x78] sm:$0xff] %v2287_v51 }
  0x55   : > { %493 = vst [vmem:[%s3592_s29 + $0x80] sm:$0xff] %v2288_v52  ;;  %495 = vst [vmem:[%s3592_s29 + $0x88] sm:$0xff] %v2289_v53 }
  0x56   : > { %503 = vsyncadd %s427_s19, 2304 }
  0x57 PF: > { %v526_v54 = vld [vmem:[%s4646_s1] sm:$0xff]  ;;  %v527_v55 = vld [vmem:[%s4646_s1 + $0x8] sm:$0xff]  ;;  %v528_v56 = vld [vmem:[%s4646_s1 + $0x10] sm:$0xff]  ;;  %s504_s16 = smul.u32 160, %s4677_s13  ;;  %v3393_v34 = vmov 0.0  }
  0x58   : > { %v2997_v57 = vpack.c.bf16 %v527_v55, %v526_v54  ;;  %v529_v58 = vld [vmem:[%s4646_s1 + $0x18] sm:$0xff]  ;;  %v530_v60 = vld [vmem:[%s4646_s1 + $0x20] sm:$0xff]  ;;  %v531_v61 = vld [vmem:[%s4646_s1 + $0x28] sm:$0xff]  ;;  %734 = vst [vmem:[#allocation3] sm:$0x1] %v3393_v34 }
  0x59   : > { %v3001_v59 = vpack.c.bf16 %v529_v58, %v528_v56  ;;  %v3005_v62 = vpack.c.bf16 %v531_v61, %v530_v60  ;;  %s3647_s30 = scalar_lea.vmem [#allocation2], %s504_s16  ;;  %v532_v0 = vld [vmem:[%s4646_s1 + $0x30] sm:$0xff]  ;;  %v533_v1 = vld [vmem:[%s4646_s1 + $0x38] sm:$0xff]  ;;  %v534_v3 = vld [vmem:[%s4646_s1 + $0x40] sm:$0xff]  ;;  %735 = vst [vmem:[#allocation3 + $0x18] sm:$0x1] %v3393_v34 }
  0x5a   : > { %2998 = vmatprep.subr.bf16.mxu1 %v2997_v57  ;;  %v3009_v2 = vpack.c.bf16 %v533_v1, %v532_v0  ;;  %v535_v4 = vld [vmem:[%s4646_s1 + $0x48] sm:$0xff]  ;;  %v536_v6 = vld [vmem:[%s4646_s1 + $0x50] sm:$0xff]  ;;  %v537_v7 = vld [vmem:[%s4646_s1 + $0x58] sm:$0xff]  ;;  %736 = vst [vmem:[#allocation3 + $0x30] sm:$0x1] %v3393_v34 }
  0x5b   : > { %3000 = vmatpush3.bf16.msra.mxu1 %v2997_v57  ;;  %v3013_v5 = vpack.c.bf16 %v535_v4, %v534_v3  ;;  %v3017_v8 = vpack.c.bf16 %v537_v7, %v536_v6  ;;  %v538_v9 = vld [vmem:[%s4646_s1 + $0x60] sm:$0xff]  ;;  %v539_v10 = vld [vmem:[%s4646_s1 + $0x68] sm:$0xff]  ;;  %v540_v12 = vld [vmem:[%s4646_s1 + $0x70] sm:$0xff]  ;;  %737 = vst [vmem:[#allocation3 + $0x48] sm:$0x1] %v3393_v34 }
  0x5c   : > { %3002 = vmatprep.subr.bf16.mxu1 %v3001_v59  ;;  %v3021_v11 = vpack.c.bf16 %v539_v10, %v538_v9  ;;  %v541_v13 = vld [vmem:[%s4646_s1 + $0x78] sm:$0xff]  ;;  %738 = vst [vmem:[#allocation3 + $0x60] sm:$0x1] %v3393_v34  ;;  %739 = vst [vmem:[#allocation3 + $0x78] sm:$0x1] %v3393_v34 }
  0x5d   : > { %v3025_v14 = vpack.c.bf16 %v541_v13, %v540_v12  ;;  %v509_v17 = vld [vmem:[%s3647_s30 + $0x18] sm:$0xff]  ;;  %740 = vst [vmem:[#allocation3 + $0x90] sm:$0x1] %v3393_v34  ;;  %741 = vst [vmem:[#allocation3 + $0xa8] sm:$0x1] %v3393_v34 }
  0x5e   : > { %v506_v63 = vld [vmem:[%s3647_s30] sm:$0xff]  ;;  %v507_v15 = vld [vmem:[%s3647_s30 + $0x8] sm:$0xff]  ;;  %v508_v16 = vld [vmem:[%s3647_s30 + $0x10] sm:$0xff]  ;;  %742 = vst [vmem:[#allocation3 + $0xc0] sm:$0x1] %v3393_v34 }
  0x5f   : > { %2799 = vmatprep.mubr.f32.mxu1 %v506_v63  ;;  %3004 = vmatpush3.bf16.msra.mxu1 %v3001_v59  ;;  %v510_v18 = vld [vmem:[%s3647_s30 + $0x20] sm:$0xff]  ;;  %v511_v19 = vld [vmem:[%s3647_s30 + $0x28] sm:$0xff]  ;;  %v512_v20 = vld [vmem:[%s3647_s30 + $0x30] sm:$0xff]  ;;  %743 = vst [vmem:[#allocation3 + $0xd8] sm:$0x1] %v3393_v34 }
  0x60   : > { %3006 = vmatprep.subr.bf16.mxu1 %v3005_v62  ;;  %v513_v21 = vld [vmem:[%s3647_s30 + $0x38] sm:$0xff]  ;;  %v514_v22 = vld [vmem:[%s3647_s30 + $0x40] sm:$0xff]  ;;  %v515_v23 = vld [vmem:[%s3647_s30 + $0x48] sm:$0xff]  ;;  %744 = vst [vmem:[#allocation3 + $0x11] sm:$0x1] %v3393_v34 }
  0x61   : > { %v516_v24 = vld [vmem:[%s3647_s30 + $0x50] sm:$0xff]  ;;  %v517_v25 = vld [vmem:[%s3647_s30 + $0x58] sm:$0xff]  ;;  %v518_v26 = vld [vmem:[%s3647_s30 + $0x60] sm:$0xff]  ;;  %745 = vst [vmem:[#allocation3 + $0x29] sm:$0x1] %v3393_v34 }
  0x62   : > { %v519_v27 = vld [vmem:[%s3647_s30 + $0x68] sm:$0xff]  ;;  %v520_v28 = vld [vmem:[%s3647_s30 + $0x70] sm:$0xff]  ;;  %v521_v29 = vld [vmem:[%s3647_s30 + $0x78] sm:$0xff]  ;;  %746 = vst [vmem:[#allocation3 + $0x41] sm:$0x1] %v3393_v34 }
  0x63   : > { %3008 = vmatpush3.bf16.msra.mxu1 %v3005_v62  ;;  %v522_v30 = vld [vmem:[%s3647_s30 + $0x80] sm:$0xff]  ;;  %v523_v31 = vld [vmem:[%s3647_s30 + $0x88] sm:$0xff]  ;;  %v524_v32 = vld [vmem:[%s3647_s30 + $0x90] sm:$0xff]  ;;  %747 = vst [vmem:[#allocation3 + $0x59] sm:$0x1] %v3393_v34 }
  0x64   : > { %3010 = vmatprep.subr.bf16.mxu1 %v3009_v2  ;;  %v525_v33 = vld [vmem:[%s3647_s30 + $0x98] sm:$0xff]  ;;  %748 = vst [vmem:[#allocation3 + $0x71] sm:$0x1] %v3393_v34  ;;  %749 = vst [vmem:[#allocation3 + $0x89] sm:$0x1] %v3393_v34 }
  0x65   : > { %750 = vst [vmem:[#allocation3 + $0xa1] sm:$0x1] %v3393_v34  ;;  %751 = vst [vmem:[#allocation3 + $0xb9] sm:$0x1] %v3393_v34  ;;  %v3702_v35 = vld [vmem:[%s4647_s2] ss:$0 sm:$0xff] }
  0x66   : > { %752 = vst [vmem:[#allocation3 + $0xd1] sm:$0x1] %v3393_v34  ;;  %753 = vst [vmem:[#allocation3 + $0xe9] sm:$0x1] %v3393_v34 }
  0x67   : > { %3012 = vmatpush3.bf16.msra.mxu1 %v3009_v2 }
  0x68   : > { %3014 = vmatprep.subr.bf16.mxu1 %v3013_v5 }
  0x6b   : > { %3016 = vmatpush3.bf16.msra.mxu1 %v3013_v5 }
  0x6c   : > { %3018 = vmatprep.subr.bf16.mxu1 %v3017_v8 }
  0x6f   : > { %3020 = vmatpush3.bf16.msra.mxu1 %v3017_v8 }
  0x70   : > { %3022 = vmatprep.subr.bf16.mxu1 %v3021_v11 }
  0x73   : > { %3024 = vmatpush3.bf16.msra.mxu1 %v3021_v11 }
  0x74   : > { %3026 = vmatprep.subr.bf16.mxu1 %v3025_v14 }
  0x77   : > { %3028 = vmatpush3.bf16.msra.mxu1 %v3025_v14 }
  0x7a   : > { %2800 = vmatmul.mubr.f32.vlgmr.msra.gmra.mrb[0].mxu1 %v507_v15 }
  0x7b   : > { %2802 = vmatprep.mubr.f32.mxu1 %v508_v16 }
  0x7e   : > { %2803 = vmatmul.mubr.f32.gmra.mrb[2].mxu1 %v509_v17 }
  0x7f   : > { %2805 = vmatprep.mubr.f32.mxu1 %v510_v18 }
  0x82   : > { %2806 = vmatmul.mubr.f32.gmra.mrb[4].mxu1 %v511_v19 }
  0x83   : > { %2808 = vmatprep.mubr.f32.mxu1 %v512_v20 }
  0x86   : > { %2809 = vmatmul.mubr.f32.gmra.mrb[6].mxu1 %v513_v21 }
  0x87   : > { %2811 = vmatprep.mubr.f32.mxu1 %v514_v22 }
  0x8a   : > { %2812 = vmatmul.mubr.f32.gmra.mrb[8].mxu1 %v515_v23 }
  0x8b   : > { %2814 = vmatprep.mubr.f32.mxu1 %v516_v24 }
  0x8e   : > { %2815 = vmatmul.mubr.f32.gmra.mrb[10].mxu1 %v517_v25 }
  0x8f   : > { %2817 = vmatprep.mubr.f32.mxu1 %v518_v26 }
  0x92   : > { %2818 = vmatmul.mubr.f32.gmra.mrb[12].mxu1 %v519_v27 }
  0x93   : > { %2820 = vmatprep.mubr.f32.mxu1 %v520_v28 }
  0x96   : > { %2821 = vmatmul.mubr.f32.gmra.mrb[14].mxu1 %v521_v29 }
  0x97   : > { %2823 = vmatprep.mubr.f32.mxu1 %v522_v30 }
  0x9a   : > { %2824 = vmatmul.mubr.f32.gmra.mrb[16].mxu1 %v523_v31 }
  0x9b   : > { %2826 = vmatprep.mubr.f32.mxu1 %v524_v32  ;;  %v3394_v32 = vmov (!%p2223_p9), 0.0  }
  0x9e   : > { %2827 = vmatmul.mubr.f32.gmra.mrb[18].mxu1 %v525_v33 }
 0x14d   : > { %v2801_v36 = vpop.f32.mrb[0].mxu1 }
 0x14e   : > { %v621_v37 = vadd.f32 %v2801_v36, %v3702_v35  ;;  %v615_v38 = vpop.f32.mrb[1].mxu1 }
 0x14f   : > { %v616_v39 = vadd.f32 %v3702_v35, %v615_v38 }
 0x150   : > { %v715_v40 = vmax.f32 %v621_v37, 0.0 }
 0x151   : > { %v714_v41 = vmax.f32 %v616_v39, 0.0  ;;  %v2804_v42 = vpop.f32.mrb[2].mxu1 }
 0x152   : > { %755 = vst [vmem:[#allocation3 + $0x9] sm:$0xff] %v715_v40  ;;  %v631_v43 = vadd.f32 %v2804_v42, %v3702_v35  ;;  %v625_v44 = vpop.f32.mrb[3].mxu1 }
 0x153   : > { %754 = vst [vmem:[#allocation3 + $0x1] sm:$0xff] %v714_v41  ;;  %v626_v45 = vadd.f32 %v3702_v35, %v625_v44  ;;  %779 = vst [vmem:[#allocation3 + $0x10] sm:$0x3] (!%p2223_p9), %v3394_v32 }
 0x154   : > { %v717_v46 = vmax.f32 %v631_v43, 0.0  ;;  %777 = vst [vmem:[#allocation3] sm:$0xff] (!%p2223_p9), %v3394_v32  ;;  %778 = vst [vmem:[#allocation3 + $0x8] sm:$0xff] (!%p2223_p9), %v3394_v32 }
 0x155   : > { %v716_v47 = vmax.f32 %v626_v45, 0.0  ;;  %v2807_v48 = vpop.f32.mrb[4].mxu1 }
 0x156   : > { %757 = vst [vmem:[#allocation3 + $0x21] sm:$0xff] %v717_v46  ;;  %v641_v49 = vadd.f32 %v2807_v48, %v3702_v35  ;;  %v635_v50 = vpop.f32.mrb[5].mxu1 }
 0x157   : > { %756 = vst [vmem:[#allocation3 + $0x19] sm:$0xff] %v716_v47  ;;  %v636_v51 = vadd.f32 %v3702_v35, %v635_v50 }
 0x158   : > { %v719_v52 = vmax.f32 %v641_v49, 0.0 }
 0x159   : > { %v718_v53 = vmax.f32 %v636_v51, 0.0  ;;  %v2810_v54 = vpop.f32.mrb[6].mxu1 }
 0x15a   : > { %759 = vst [vmem:[#allocation3 + $0x39] sm:$0xff] %v719_v52  ;;  %v651_v55 = vadd.f32 %v2810_v54, %v3702_v35  ;;  %v645_v56 = vpop.f32.mrb[7].mxu1 }
 0x15b   : > { %758 = vst [vmem:[#allocation3 + $0x31] sm:$0xff] %v718_v53  ;;  %v646_v57 = vadd.f32 %v3702_v35, %v645_v56 }
 0x15c   : > { %v721_v58 = vmax.f32 %v651_v55, 0.0 }
 0x15d   : > { %v720_v59 = vmax.f32 %v646_v57, 0.0  ;;  %v2813_v60 = vpop.f32.mrb[8].mxu1 }
 0x15e   : > { %761 = vst [vmem:[#allocation3 + $0x51] sm:$0xff] %v721_v58  ;;  %v661_v61 = vadd.f32 %v2813_v60, %v3702_v35  ;;  %v655_v62 = vpop.f32.mrb[9].mxu1 }
 0x15f   : > { %760 = vst [vmem:[#allocation3 + $0x49] sm:$0xff] %v720_v59  ;;  %v656_v63 = vadd.f32 %v3702_v35, %v655_v62 }
 0x160   : > { %v723_v0 = vmax.f32 %v661_v61, 0.0 }
 0x161   : > { %v722_v1 = vmax.f32 %v656_v63, 0.0  ;;  %v2816_v2 = vpop.f32.mrb[10].mxu1 }
 0x162   : > { %763 = vst [vmem:[#allocation3 + $0x69] sm:$0xff] %v723_v0  ;;  %v671_v3 = vadd.f32 %v2816_v2, %v3702_v35  ;;  %v665_v4 = vpop.f32.mrb[11].mxu1 }
 0x163   : > { %762 = vst [vmem:[#allocation3 + $0x61] sm:$0xff] %v722_v1  ;;  %v666_v5 = vadd.f32 %v3702_v35, %v665_v4 }
 0x164   : > { %v725_v6 = vmax.f32 %v671_v3, 0.0 }
 0x165   : > { %v724_v7 = vmax.f32 %v666_v5, 0.0  ;;  %v2819_v8 = vpop.f32.mrb[12].mxu1 }
 0x166   : > { %765 = vst [vmem:[#allocation3 + $0x81] sm:$0xff] %v725_v6  ;;  %v681_v9 = vadd.f32 %v2819_v8, %v3702_v35  ;;  %v675_v10 = vpop.f32.mrb[13].mxu1 }
 0x167   : > { %764 = vst [vmem:[#allocation3 + $0x79] sm:$0xff] %v724_v7  ;;  %v676_v11 = vadd.f32 %v3702_v35, %v675_v10 }
 0x168   : > { %v727_v12 = vmax.f32 %v681_v9, 0.0 }
 0x169   : > { %v726_v13 = vmax.f32 %v676_v11, 0.0  ;;  %v2822_v14 = vpop.f32.mrb[14].mxu1 }
 0x16a   : > { %767 = vst [vmem:[#allocation3 + $0x99] sm:$0xff] %v727_v12  ;;  %v691_v15 = vadd.f32 %v2822_v14, %v3702_v35  ;;  %v685_v16 = vpop.f32.mrb[15].mxu1 }
 0x16b   : > { %766 = vst [vmem:[#allocation3 + $0x91] sm:$0xff] %v726_v13  ;;  %v686_v17 = vadd.f32 %v3702_v35, %v685_v16 }
 0x16c   : > { %v729_v18 = vmax.f32 %v691_v15, 0.0 }
 0x16d   : > { %v728_v19 = vmax.f32 %v686_v17, 0.0  ;;  %v2825_v20 = vpop.f32.mrb[16].mxu1 }
 0x16e   : > { %769 = vst [vmem:[#allocation3 + $0xb1] sm:$0xff] %v729_v18  ;;  %v701_v21 = vadd.f32 %v2825_v20, %v3702_v35  ;;  %v695_v22 = vpop.f32.mrb[17].mxu1 }
 0x16f   : > { %768 = vst [vmem:[#allocation3 + $0xa9] sm:$0xff] %v728_v19  ;;  %v696_v23 = vadd.f32 %v3702_v35, %v695_v22 }
 0x170   : > { %v731_v24 = vmax.f32 %v701_v21, 0.0 }
 0x171   : > { %v730_v25 = vmax.f32 %v696_v23, 0.0  ;;  %v2828_v26 = vpop.f32.mrb[18].mxu1  ;;  %776 = sbr.rel (%p2223_p9) target bundleno = 376 (0x178), region = 162 }
 0x172   : > { %771 = vst [vmem:[#allocation3 + $0xc9] sm:$0xff] %v731_v24  ;;  %v711_v27 = vadd.f32 %v2828_v26, %v3702_v35  ;;  %v705_v28 = vpop.f32.mrb[19].mxu1 }
 0x173   : > { %770 = vst [vmem:[#allocation3 + $0xc1] sm:$0xff] %v730_v25  ;;  %v706_v29 = vadd.f32 %v3702_v35, %v705_v28 }
 0x174   : > { %v733_v30 = vmax.f32 %v711_v27, 0.0 }
 0x175   : > { %v732_v31 = vmax.f32 %v706_v29, 0.0 }
 0x176   : > { %773 = vst [vmem:[#allocation3 + $0xe1] sm:$0xff] %v733_v30 }
 0x177   : > { %772 = vst [vmem:[#allocation3 + $0xd9] sm:$0xff] %v732_v31 }
 0x178 PF: > { %782 = sbr.rel (%p2244_p10) target bundleno = 383 (0x17f), region = 166  ;;  %v3395_v33 = vmov (!%p2244_p10), 0.0  }
 0x179   : > { %784 = vst [vmem:[#allocation3 + $0xd8] sm:$0xff] (!%p2244_p10), %v3395_v33  ;;  %785 = vst [vmem:[#allocation3 + $0xe0] sm:$0xff] (!%p2244_p10), %v3395_v33 }
 0x17a   : > { %786 = vst [vmem:[#allocation3 + $0xe8] sm:$0x3] (!%p2244_p10), %v3395_v33 }
 0x17f PF: > { %v2310_v34 = vld [vmem:[%s4648_s3 + $0x200] sm:$0xff]  ;;  %v2311_v35 = vld [vmem:[%s4648_s3 + $0x208] sm:$0xff]  ;;  %v2312_v43 = vld [vmem:[%s4648_s3 + $0x210] sm:$0xff]  ;;  %vm841_vm0 = vcmask 1046528   ;;  %vm898_vm1 = vcmask 1045504  }
 0x180   : > { %v2326_v36 = vld [vmem:[%s4648_s3 + $0x280] sm:$0xff]  ;;  %v3029_v37 = vpack.c.bf16 %v2311_v35, %v2310_v34  ;;  %v2327_v38 = vld [vmem:[%s4648_s3 + $0x288] sm:$0xff]  ;;  %v2313_v44 = vld [vmem:[%s4648_s3 + $0x218] sm:$0xff] }
 0x181   : > { %v2294_v39 = vld [vmem:[%s4648_s3 + $0x180] sm:$0xff]  ;;  %v2295_v40 = vld [vmem:[%s4648_s3 + $0x188] sm:$0xff]  ;;  %v3061_v41 = vpack.c.bf16 %v2327_v38, %v2326_v36  ;;  %v2328_v45 = vld [vmem:[%s4648_s3 + $0x290] sm:$0xff]  ;;  %v3033_v46 = vpack.c.bf16 %v2313_v44, %v2312_v43 }
 0x182   : > { %v3031_v42 = vpack.c.bf16 %v2295_v40, %v2294_v39  ;;  %3030 = vmatprep.subr.bf16.mxu1 %v3029_v37  ;;  %v2329_v47 = vld [vmem:[%s4648_s3 + $0x298] sm:$0xff]  ;;  %v2296_v48 = vld [vmem:[%s4648_s3 + $0x190] sm:$0xff]  ;;  %v2314_v52 = vld [vmem:[%s4648_s3 + $0x220] sm:$0xff] }
 0x183   : > { %v2297_v49 = vld [vmem:[%s4648_s3 + $0x198] sm:$0xff]  ;;  %3062 = vmatprep.subr.bf16.mxu0 %v3061_v41  ;;  %v3065_v50 = vpack.c.bf16 %v2329_v47, %v2328_v45  ;;  %v2315_v53 = vld [vmem:[%s4648_s3 + $0x228] sm:$0xff]  ;;  %v2330_v54 = vld [vmem:[%s4648_s3 + $0x2a0] sm:$0xff] }
 0x184   : > { %3032 = vmatpush3.bf16.msra.mxu1 %v3031_v42  ;;  %v3035_v51 = vpack.c.bf16 %v2297_v49, %v2296_v48  ;;  %3064 = vmatpush3.bf16.msra.mxu0 %v3061_v41  ;;  %v3037_v55 = vpack.c.bf16 %v2315_v53, %v2314_v52  ;;  %v2331_v56 = vld [vmem:[%s4648_s3 + $0x2a8] sm:$0xff]  ;;  %v2298_v57 = vld [vmem:[%s4648_s3 + $0x1a0] sm:$0xff]  ;;  %v2316_v60 = vld [vmem:[%s4648_s3 + $0x230] sm:$0xff] }
 0x185   : > { %3034 = vmatprep.subr.bf16.mxu1 %v3033_v46  ;;  %v2299_v58 = vld [vmem:[%s4648_s3 + $0x1a8] sm:$0xff]  ;;  %3066 = vmatprep.subr.bf16.mxu0 %v3065_v50  ;;  %v3069_v59 = vpack.c.bf16 %v2331_v56, %v2330_v54  ;;  %v2317_v61 = vld [vmem:[%s4648_s3 + $0x238] sm:$0xff]  ;;  %v2332_v62 = vld [vmem:[%s4648_s3 + $0x2b0] sm:$0xff] }
 0x186   : > { %v2333_v63 = vld [vmem:[%s4648_s3 + $0x2b8] sm:$0xff]  ;;  %v3039_v0 = vpack.c.bf16 %v2299_v58, %v2298_v57  ;;  %v3041_v1 = vpack.c.bf16 %v2317_v61, %v2316_v60  ;;  %v2300_v2 = vld [vmem:[%s4648_s3 + $0x1b0] sm:$0xff]  ;;  %v2318_v5 = vld [vmem:[%s4648_s3 + $0x240] sm:$0xff] }
 0x187   : > { %v2301_v3 = vld [vmem:[%s4648_s3 + $0x1b8] sm:$0xff]  ;;  %v3073_v4 = vpack.c.bf16 %v2333_v63, %v2332_v62  ;;  %v2319_v6 = vld [vmem:[%s4648_s3 + $0x248] sm:$0xff]  ;;  %v2334_v7 = vld [vmem:[%s4648_s3 + $0x2c0] sm:$0xff] }
 0x188   : > { %3036 = vmatpush3.bf16.msra.mxu1 %v3035_v51  ;;  %3068 = vmatpush3.bf16.msra.mxu0 %v3065_v50  ;;  %v2335_v8 = vld [vmem:[%s4648_s3 + $0x2c8] sm:$0xff]  ;;  %v3043_v9 = vpack.c.bf16 %v2301_v3, %v2300_v2  ;;  %v2302_v10 = vld [vmem:[%s4648_s3 + $0x1c0] sm:$0xff]  ;;  %v3045_v11 = vpack.c.bf16 %v2319_v6, %v2318_v5  ;;  %v2320_v13 = vld [vmem:[%s4648_s3 + $0x250] sm:$0xff] }
 0x189   : > { %3038 = vmatprep.subr.bf16.mxu1 %v3037_v55  ;;  %3070 = vmatprep.subr.bf16.mxu0 %v3069_v59  ;;  %v2303_v12 = vld [vmem:[%s4648_s3 + $0x1c8] sm:$0xff]  ;;  %v2321_v14 = vld [vmem:[%s4648_s3 + $0x258] sm:$0xff]  ;;  %v3077_v15 = vpack.c.bf16 %v2335_v8, %v2334_v7  ;;  %v2336_v16 = vld [vmem:[%s4648_s3 + $0x2d0] sm:$0xff] }
 0x18a   : > { %v2337_v17 = vld [vmem:[%s4648_s3 + $0x2d8] sm:$0xff]  ;;  %v3047_v18 = vpack.c.bf16 %v2303_v12, %v2302_v10  ;;  %v3049_v19 = vpack.c.bf16 %v2321_v14, %v2320_v13  ;;  %v3832_v21 = vld [vmem:[#allocation3 + $0x20] sm:$0xff]  ;;  %v2304_v22 = vld [vmem:[%s4648_s3 + $0x1d0] sm:$0xff] }
 0x18b   : > { %v3830_v20 = vld [vmem:[#allocation3 + $0x18] sm:$0xff]  ;;  %v848_v25 = vrot.slane %v3832_v21, 1  ;;  %v905_v27 = vrot.slane %v3832_v21, 2  ;;  %v3081_v28 = vpack.c.bf16 %v2337_v17, %v2336_v16  ;;  %v2322_v29 = vld [vmem:[%s4648_s3 + $0x260] sm:$0xff]  ;;  %v2323_v30 = vld [vmem:[%s4648_s3 + $0x268] sm:$0xff] }
 0x18c   : > { %3040 = vmatpush3.bf16.msra.mxu1 %v3039_v0  ;;  %3072 = vmatpush3.bf16.msra.mxu0 %v3069_v59  ;;  %v2305_v23 = vld [vmem:[%s4648_s3 + $0x1d8] sm:$0xff]  ;;  %v847_v24 = vrot.slane %v3830_v20, 1  ;;  %v904_v26 = vrot.slane %v3830_v20, 2  ;;  %v2338_v31 = vld [vmem:[%s4648_s3 + $0x2e0] sm:$0xff]  ;;  %v2339_v32 = vld [vmem:[%s4648_s3 + $0x2e8] sm:$0xff]  ;;  %v3053_v36 = vpack.c.bf16 %v2323_v30, %v2322_v29 }
 0x18d   : > { %3042 = vmatprep.subr.bf16.mxu1 %v3041_v1  ;;  %3074 = vmatprep.subr.bf16.mxu0 %v3073_v4  ;;  %v3051_v35 = vpack.c.bf16 %v2305_v23, %v2304_v22  ;;  %v2306_v37 = vld [vmem:[%s4648_s3 + $0x1e0] sm:$0xff]  ;;  %v2307_v38 = vld [vmem:[%s4648_s3 + $0x1e8] sm:$0xff]  ;;  %v3085_v39 = vpack.c.bf16 %v2339_v32, %v2338_v31  ;;  %v2324_v40 = vld [vmem:[%s4648_s3 + $0x270] sm:$0xff] }
 0x18e   : > { %v3859_v33 = vsel %vm841_vm0, %v847_v24, %v848_v25  ;;  %v3862_v34 = vsel %vm898_vm1, %v904_v26, %v905_v27  ;;  %v2325_v41 = vld [vmem:[%s4648_s3 + $0x278] sm:$0xff]  ;;  %v2340_v42 = vld [vmem:[%s4648_s3 + $0x2f0] sm:$0xff]  ;;  %v3055_v44 = vpack.c.bf16 %v2307_v38, %v2306_v37  ;;  %v792_v48 = vld [vmem:[#allocation3 + $0x28] sm:$0x3] }
 0x18f   : > { %1133 = vmatprep.mubr.f32.mxu1 %v3859_v33  ;;  %2861 = vmatprep.mubr.f32.mxu0 %v3862_v34  ;;  %v2341_v43 = vld [vmem:[%s4648_s3 + $0x2f8] sm:$0xff]  ;;  %v3057_v45 = vpack.c.bf16 %v2325_v41, %v2324_v40  ;;  %v2308_v46 = vld [vmem:[%s4648_s3 + $0x1f0] sm:$0xff]  ;;  %v987_v50 = vld [vmem:[%s4648_s3 + $0x100] sm:$0xff]  ;;  %v907_v55 = vrot.slane %v792_v48, 2  ;;  %v850_v58 = vrot.slane %v792_v48, 1 }
 0x190   : > { %3044 = vmatpush3.bf16.msra.mxu1 %v3043_v9  ;;  %3076 = vmatpush3.bf16.msra.mxu0 %v3073_v4  ;;  %v2309_v47 = vld [vmem:[%s4648_s3 + $0x1f8] sm:$0xff]  ;;  %v3089_v49 = vpack.c.bf16 %v2341_v43, %v2340_v42  ;;  %v988_v51 = vld [vmem:[%s4648_s3 + $0x108] sm:$0xff]  ;;  %v3896_v52 = vld [vmem:[#allocation3 + $0x30] sm:$0xff] }
 0x191   : > { %3046 = vmatprep.subr.bf16.mxu1 %v3045_v11  ;;  %3078 = vmatprep.subr.bf16.mxu0 %v3077_v15  ;;  %v3898_v53 = vld [vmem:[#allocation3 + $0x38] sm:$0xff]  ;;  %v3059_v54 = vpack.c.bf16 %v2309_v47, %v2308_v46  ;;  %v971_v56 = vld [vmem:[%s4648_s3 + $0x80] sm:$0xff]  ;;  %v972_v57 = vld [vmem:[%s4648_s3 + $0x88] sm:$0xff]  ;;  %v3125_v60 = vpack.c.bf16 %v988_v51, %v987_v50  ;;  %v909_v61 = vrot.slane %v3896_v52, 2  ;;  %v3927_v6 = vsel %vm898_vm1, %v905_v27, %v907_v55 }
 0x192   : > { %v3906_v59 = vld [vmem:[#allocation3 + $0x40] sm:$0x3]  ;;  %v910_v62 = vrot.slane %v3898_v53, 2  ;;  %v989_v63 = vld [vmem:[%s4648_s3 + $0x110] sm:$0xff]  ;;  %v990_v0 = vld [vmem:[%s4648_s3 + $0x118] sm:$0xff]  ;;  %v3093_v3 = vpack.c.bf16 %v972_v57, %v971_v56  ;;  %v3933_v8 = vsel %vm841_vm0, %v848_v25, %v850_v58  ;;  %v852_v10 = vrot.slane %v3896_v52, 1 }
 0x193   : > { %v3916_v1 = vld [vmem:[#allocation3 + $0x48] sm:$0xff]  ;;  %v3918_v2 = vld [vmem:[#allocation3 + $0x50] sm:$0xff]  ;;  %v955_v4 = vld [vmem:[%s4648_s3] sm:$0xff]  ;;  %v912_v7 = vrot.slane %v3906_v59, 2  ;;  %v3129_v9 = vpack.c.bf16 %v990_v0, %v989_v63  ;;  %v853_v11 = vrot.slane %v3898_v53, 1 }
 0x194   : > { %3048 = vmatpush3.bf16.msra.mxu1 %v3047_v18  ;;  %3080 = vmatpush3.bf16.msra.mxu0 %v3077_v15  ;;  %4656 = vst [vmem:[#allocation10_spill] sm:$0xff] %v3918_v2  ;;  %v956_v5 = vld [vmem:[%s4648_s3 + $0x8] sm:$0xff]  ;;  %v3937_v12 = vld [vmem:[#allocation3 + $0x58] sm:$0x3]  ;;  %v991_v13 = vld [vmem:[%s4648_s3 + $0x120] sm:$0xff]  ;;  %v3946_v15 = vsel %vm898_vm1, %v909_v61, %v910_v62  ;;  %v914_v16 = vrot.slane %v3916_v1, 2 }
 0x195   : > { %3050 = vmatprep.subr.bf16.mxu1 %v3049_v19  ;;  %3082 = vmatprep.subr.bf16.mxu0 %v3081_v28  ;;  %v992_v14 = vld [vmem:[%s4648_s3 + $0x128] sm:$0xff]  ;;  %v915_v17 = vrot.slane %v3918_v2, 2  ;;  %v3950_v18 = vld [vmem:[#allocation3 + $0x60] sm:$0xff]  ;;  %v3095_v19 = vpack.c.bf16 %v956_v5, %v955_v4  ;;  %v973_v22 = vld [vmem:[%s4648_s3 + $0x90] sm:$0xff]  ;;  %v3970_v27 = vsel %vm898_vm1, %v910_v62, %v912_v7  ;;  %v3981_v31 = vsel %vm841_vm0, %v852_v10, %v853_v11 }
 0x196   : > { %v974_v23 = vld [vmem:[%s4648_s3 + $0x98] sm:$0xff]  ;;  %v3959_v24 = vld [vmem:[#allocation3 + $0x68] sm:$0xff]  ;;  %v957_v25 = vld [vmem:[%s4648_s3 + $0x10] sm:$0xff]  ;;  %v3133_v32 = vpack.c.bf16 %v992_v14, %v991_v13  ;;  %v857_v57 = vrot.slane %v3916_v1, 1  ;;  %v858_v58 = vrot.slane %v3918_v2, 1 }
 0x197   : > { %v958_v26 = vld [vmem:[%s4648_s3 + $0x18] sm:$0xff]  ;;  %v975_v29 = vld [vmem:[%s4648_s3 + $0xa0] sm:$0xff]  ;;  %v976_v30 = vld [vmem:[%s4648_s3 + $0xa8] sm:$0xff]  ;;  %v3097_v37 = vpack.c.bf16 %v974_v23, %v973_v22  ;;  %v3987_v38 = vsel %vm898_vm1, %v914_v16, %v915_v17  ;;  %v920_v40 = vrot.slane %v3959_v24, 2  ;;  %v860_v22 = vrot.slane %v3937_v12, 1 }
 0x198   : > { %3052 = vmatpush3.bf16.msra.mxu1 %v3051_v35  ;;  %3084 = vmatpush3.bf16.msra.mxu0 %v3081_v28  ;;  %v917_v28 = vrot.slane %v3937_v12, 2  ;;  %v855_v35 = vrot.slane %v3906_v59, 1  ;;  %v993_v41 = vld [vmem:[%s4648_s3 + $0x130] sm:$0xff]  ;;  %v994_v42 = vld [vmem:[%s4648_s3 + $0x138] sm:$0xff]  ;;  %v3101_v46 = vpack.c.bf16 %v976_v30, %v975_v29  ;;  %v959_v47 = vld [vmem:[%s4648_s3 + $0x20] sm:$0xff] }
 0x199   : > { %3054 = vmatprep.subr.bf16.mxu1 %v3053_v36  ;;  %3086 = vmatprep.subr.bf16.mxu0 %v3085_v39  ;;  %v3984_v36 = vld [vmem:[#allocation3 + $0x70] sm:$0x3]  ;;  %v3997_v43 = vld [vmem:[#allocation3 + $0x78] sm:$0xff]  ;;  %v960_v48 = vld [vmem:[%s4648_s3 + $0x28] sm:$0xff]  ;;  %v3137_v56 = vpack.c.bf16 %v994_v42, %v993_v41 }
 0x19a   : > { %v922_v50 = vrot.slane %v3984_v36, 2  ;;  %v977_v51 = vld [vmem:[%s4648_s3 + $0xb0] sm:$0xff]  ;;  %v4022_v55 = vsel %vm841_vm0, %v853_v11, %v855_v35  ;;  %v4026_v59 = vld [vmem:[#allocation3 + $0x88] sm:$0x3]  ;;  %v924_v61 = vrot.slane %v3997_v43, 2  ;;  %v995_v63 = vld [vmem:[%s4648_s3 + $0x140] sm:$0xff]  ;;  %v3103_v4 = vpack.c.bf16 %v960_v48, %v959_v47 }
 0x19b   : > { %v996_v0 = vld [vmem:[%s4648_s3 + $0x148] sm:$0xff]  ;;  %v4042_v5 = vld [vmem:[#allocation3 + $0x98] sm:$0xff]  ;;  %v927_v11 = vrot.slane %v4026_v59, 2  ;;  %v979_v13 = vld [vmem:[%s4648_s3 + $0xc0] sm:$0xff]  ;;  %v4105_v47 = vsel %vm841_vm0, %v858_v58, %v860_v22 }
 0x19c   : > { %3056 = vmatpush3.bf16.msra.mxu1 %v3055_v44  ;;  %3088 = vmatpush3.bf16.msra.mxu0 %v3085_v39  ;;  %v919_v39 = vrot.slane %v3950_v18, 2  ;;  %v3099_v44 = vpack.c.bf16 %v958_v26, %v957_v25  ;;  %v962_v10 = vld [vmem:[%s4648_s3 + $0x38] sm:$0xff]  ;;  %v980_v14 = vld [vmem:[%s4648_s3 + $0xc8] sm:$0xff]  ;;  %v4061_v16 = vsel %vm898_vm1, %v920_v40, %v922_v50  ;;  %v4067_v23 = vld [vmem:[#allocation3 + $0xa0] sm:$0x3]  ;;  %v862_v50 = vrot.slane %v3950_v18, 1 }
 0x19d   : > { %3058 = vmatprep.subr.bf16.mxu1 %v3057_v45  ;;  %3090 = vmatprep.subr.bf16.mxu0 %v3089_v49  ;;  %v4000_v45 = vld [vmem:[#allocation3 + $0x80] sm:$0xff]  ;;  %v997_v29 = vld [vmem:[%s4648_s3 + $0x150] sm:$0xff]  ;;  %v998_v30 = vld [vmem:[%s4648_s3 + $0x158] sm:$0xff]  ;;  %v932_v42 = vrot.slane %v4067_v23, 2 }
 0x19e   : > { %v925_v62 = vrot.slane %v4000_v45, 2  ;;  %v4083_v35 = vld [vmem:[#allocation3 + $0xb0] sm:$0xff]  ;;  %v3145_v48 = vpack.c.bf16 %v998_v30, %v997_v29  ;;  %v865_v30 = vrot.slane %v3984_v36, 1 }
 0x1a0   : > { %3060 = vmatpush3.bf16.msra.mxu1 %v3059_v54  ;;  %3092 = vmatpush3.bf16.msra.mxu0 %v3089_v49  ;;  %v4011_v49 = vsel %vm898_vm1, %v915_v17, %v917_v28  ;;  %v978_v54 = vld [vmem:[%s4648_s3 + $0xb8] sm:$0xff]  ;;  %v4064_v17 = vsel %vm841_vm0, %v857_v57, %v858_v58  ;;  %v4070_v25 = vsel %vm898_vm1, %v924_v61, %v925_v62  ;;  %v930_v28 = vrot.slane %v4042_v5, 2  ;;  %v999_v58 = vld [vmem:[%s4648_s3 + $0x160] sm:$0xff] }
 0x1a1   : > { %3094 = vmatprep.subr.bf16.mxu1 %v3093_v3  ;;  %3126 = vmatprep.subr.bf16.mxu0 %v3125_v60  ;;  %v4039_v3 = vld [vmem:[#allocation3 + $0x90] sm:$0xff]  ;;  %v3105_v7 = vpack.c.bf16 %v978_v54, %v977_v51  ;;  %v4094_v41 = vsel %vm898_vm1, %v925_v62, %v927_v11  ;;  %v863_v51 = vrot.slane %v3959_v24, 1  ;;  %v4109_v54 = vld [vmem:[#allocation3 + $0xb8] sm:$0x3]  ;;  %v1000_v62 = vld [vmem:[%s4648_s3 + $0x168] sm:$0xff] }
 0x1a2   : > { %v929_v26 = vrot.slane %v4039_v3, 2  ;;  %v937_v11 = vrot.slane %v4109_v54, 2  ;;  %v4144_v22 = vsel %vm898_vm1, %v930_v28, %v932_v42  ;;  %v3149_v29 = vpack.c.bf16 %v1000_v62, %v999_v58  ;;  %v4163_v42 = vld [vmem:[#allocation3] sm:$0xff] }
 0x1a3   : > { %1134 = vmatmul.mubr.f32.vlgmr.msra.gmra.mrb[20].mxu1 %v3830_v20  ;;  %2862 = vmatmul.mubr.f32.vlgmr.msra.gmra.mrb[0].mxu0 %v3927_v6 }
 0x1a4   : > { %1138 = vmatprep.mubr.f32.mxu1 %v3933_v8  ;;  %3128 = vmatpush3.bf16.msra.mxu0 %v3125_v60  ;;  %v4029_v60 = vsel %vm898_vm1, %v919_v39, %v920_v40  ;;  %v963_v39 = vld [vmem:[%s4648_s3 + $0x40] sm:$0xff]  ;;  %v964_v40 = vld [vmem:[%s4648_s3 + $0x48] sm:$0xff]  ;;  %v4112_v57 = vsel %vm898_vm1, %v929_v26, %v930_v28  ;;  %v4147_v26 = vsel %vm841_vm0, %v862_v50, %v863_v51  ;;  %v1001_v28 = vld [vmem:[%s4648_s3 + $0x170] sm:$0xff] }
 0x1a5   : > { %2864 = vmatprep.mubr.f32.mxu0 %v3946_v15  ;;  %3130 = vmatprep.subr.bf16.mxu0 %v3129_v9  ;;  %4657 = vst [vmem:[#allocation11_spill] sm:$0xff] %v4147_v26  ;;  %v967_v50 = vld [vmem:[%s4648_s3 + $0x60] sm:$0xff] }
 0x1a6   : > { %3096 = vmatpush3.bf16.msra.mxu1 %v3095_v19  ;;  %v3141_v19 = vpack.c.bf16 %v996_v0, %v995_v63  ;;  %v4122_v63 = vld [vmem:[#allocation3 + $0xc0] sm:$0xff]  ;;  %v3111_v0 = vpack.c.bf16 %v964_v40, %v963_v39  ;;  %v1002_v40 = vld [vmem:[%s4648_s3 + $0x178] sm:$0xff] }
 0x1a7   : > { %1139 = vmatmul.mubr.f32.gmra.mrb[22].mxu1 %v3832_v21  ;;  %3098 = vmatprep.subr.bf16.mxu1 %v3097_v37  ;;  %v3109_v37 = vpack.c.bf16 %v980_v14, %v979_v13  ;;  %v983_v13 = vld [vmem:[%s4648_s3 + $0xe0] sm:$0xff]  ;;  %v984_v14 = vld [vmem:[%s4648_s3 + $0xe8] sm:$0xff]  ;;  %v1013_v39 = vrot.slane %v4122_v63, 2 }
 0x1a8   : > { %2865 = vmatmul.mubr.f32.gmra.mrb[2].mxu0 %v3970_v27  ;;  %1143 = vmatprep.mubr.f32.mxu1 %v3981_v31 }
 0x1a9   : > { %3132 = vmatpush3.bf16.msra.mxu0 %v3129_v9  ;;  %2867 = vmatprep.mubr.f32.mxu0 %v3987_v38  ;;  %v961_v9 = vld [vmem:[%s4648_s3 + $0x30] sm:$0xff] }
 0x1aa   : > { %3134 = vmatprep.subr.bf16.mxu0 %v3133_v32  ;;  %3100 = vmatpush3.bf16.msra.mxu1 %v3099_v44  ;;  %v3107_v12 = vpack.c.bf16 %v962_v10, %v961_v9  ;;  %v981_v44 = vld [vmem:[%s4648_s3 + $0xd0] sm:$0xff]  ;;  %v966_v10 = vld [vmem:[%s4648_s3 + $0x58] sm:$0xff] }
 0x1ab   : > { %1144 = vmatmul.mubr.f32.gmra.mrb[24].mxu1 %v3896_v52  ;;  %3102 = vmatprep.subr.bf16.mxu1 %v3101_v46  ;;  %v982_v46 = vld [vmem:[%s4648_s3 + $0xd8] sm:$0xff]  ;;  %v965_v9 = vld [vmem:[%s4648_s3 + $0x50] sm:$0xff] }
 0x1ac   : > { %2868 = vmatmul.mubr.f32.gmra.mrb[4].mxu0 %v4011_v49  ;;  %1148 = vmatprep.mubr.f32.mxu1 %v4022_v55  ;;  %v3115_v36 = vpack.c.bf16 %v966_v10, %v965_v9  ;;  %v4188_v9 = vsel %vm841_vm0, %v863_v51, %v865_v30  ;;  %v3153_v10 = vpack.c.bf16 %v1002_v40, %v1001_v28  ;;  %v2359_v30 = vld [vmem:[%s4648_s3 + $0x388] sm:$0xff]  ;;  %v969_v28 = vld [vmem:[%s4648_s3 + $0x70] sm:$0xff]  ;;  %v970_v40 = vld [vmem:[%s4648_s3 + $0x78] sm:$0xff] }
 0x1ad   : > { %3136 = vmatpush3.bf16.msra.mxu0 %v3133_v32  ;;  %2870 = vmatprep.mubr.f32.mxu0 %v4029_v60  ;;  %v4080_v32 = vld [vmem:[#allocation3 + $0xa8] sm:$0xff] }
 0x1ae   : > { %3138 = vmatprep.subr.bf16.mxu0 %v3137_v56  ;;  %3104 = vmatpush3.bf16.msra.mxu1 %v3103_v4  ;;  %v934_v61 = vrot.slane %v4080_v32, 2  ;;  %v4125_v4 = vld [vmem:[#allocation3 + $0xc8] sm:$0xff] }
 0x1af   : > { %1149 = vmatmul.mubr.f32.gmra.mrb[26].mxu1 %v3898_v53  ;;  %3106 = vmatprep.subr.bf16.mxu1 %v3105_v7  ;;  %v3113_v7 = vpack.c.bf16 %v982_v46, %v981_v44  ;;  %v4166_v44 = vld [vmem:[#allocation3 + $0x8] sm:$0xff]  ;;  %v3117_v46 = vpack.c.bf16 %v984_v14, %v983_v13  ;;  %v899_v14 = vrot.slane %v4163_v42, 2 }
 0x1b0   : > { %2871 = vmatmul.mubr.f32.gmra.mrb[6].mxu0 %v4061_v16  ;;  %1153 = vmatprep.mubr.f32.mxu1 %v4064_v17 }
 0x1b1   : > { %3140 = vmatpush3.bf16.msra.mxu0 %v3137_v56  ;;  %2873 = vmatprep.mubr.f32.mxu0 %v4070_v25  ;;  %v935_v56 = vrot.slane %v4083_v35, 2 }
 0x1b2   : > { %3142 = vmatprep.subr.bf16.mxu0 %v3141_v19  ;;  %3108 = vmatpush3.bf16.msra.mxu1 %v3107_v12  ;;  %v4150_v12 = vld [vmem:[#allocation3 + $0xd0] sm:$0x3] }
 0x1b3   : > { %1154 = vmatmul.mubr.f32.gmra.mrb[28].mxu1 %v3916_v1  ;;  %3110 = vmatprep.subr.bf16.mxu1 %v3109_v37  ;;  %v4153_v37 = vsel %vm898_vm1, %v934_v61, %v935_v56  ;;  %v968_v61 = vld [vmem:[%s4648_s3 + $0x68] sm:$0xff]  ;;  %v4177_v58 = vsel %vm898_vm1, %v935_v56, %v937_v11  ;;  %v1016_v62 = vrot.slane %v4150_v12, 2  ;;  %v867_v56 = vrot.slane %v3997_v43, 1 }
 0x1b4   : > { %2874 = vmatmul.mubr.f32.gmra.mrb[8].mxu0 %v4094_v41  ;;  %1158 = vmatprep.mubr.f32.mxu1 %v4105_v47  ;;  %v868_v11 = vrot.slane %v4000_v45, 1  ;;  %v3119_v51 = vpack.c.bf16 %v968_v61, %v967_v50  ;;  %v2342_v61 = vld [vmem:[%s4648_s3 + $0x300] sm:$0xff] }
 0x1b5   : > { %3144 = vmatpush3.bf16.msra.mxu0 %v3141_v19  ;;  %2876 = vmatprep.mubr.f32.mxu0 %v4112_v57  ;;  %v1014_v19 = vrot.slane %v4125_v4, 2 }
 0x1b6   : > { %3146 = vmatprep.subr.bf16.mxu0 %v3145_v48  ;;  %3112 = vmatpush3.bf16.msra.mxu1 %v3111_v0  ;;  %v985_v0 = vld [vmem:[%s4648_s3 + $0xf0] sm:$0xff] }
 0x1b7   : > { %1159 = vmatmul.mubr.f32.gmra.mrb[30].mxu1 %v3918_v2  ;;  %3114 = vmatprep.subr.bf16.mxu1 %v3113_v7  ;;  %v986_v7 = vld [vmem:[%s4648_s3 + $0xf8] sm:$0xff]  ;;  %v4193_v13 = vsel %vm898_vm1, %v1013_v39, %v1014_v19  ;;  %v4197_v2 = vld [vmem:[#allocation3 + $0x10] sm:$0x3] }
 0x1b8   : > { %2877 = vmatmul.mubr.f32.gmra.mrb[10].mxu0 %v4144_v22  ;;  %1163 = vmatprep.mubr.f32.mxu1 %v4147_v26  ;;  %4658 = vst [vmem:[#allocation12_spill] sm:$0xff] %v4193_v13  ;;  %v900_v26 = vrot.slane %v4166_v44, 2  ;;  %v3121_v39 = vpack.c.bf16 %v986_v7, %v985_v0  ;;  %v902_v50 = vrot.slane %v4197_v2, 2  ;;  %v2343_v0 = vld [vmem:[%s4648_s3 + $0x308] sm:$0xff] }
 0x1b9   : > { %3148 = vmatpush3.bf16.msra.mxu0 %v3145_v48  ;;  %2879 = vmatprep.mubr.f32.mxu0 %v4153_v37  ;;  %v2358_v48 = vld [vmem:[%s4648_s3 + $0x380] sm:$0xff] }
 0x1ba   : > { %3150 = vmatprep.subr.bf16.mxu0 %v3149_v29  ;;  %3116 = vmatpush3.bf16.msra.mxu1 %v3115_v36  ;;  %v4216_v36 = vsel %vm898_vm1, %v1014_v19, %v1016_v62  ;;  %v901_v7 = vsel %vm898_vm1, %v899_v14, %v900_v26  ;;  %v3157_v19 = vpack.c.bf16 %v2359_v30, %v2358_v48  ;;  %v873_v30 = vrot.slane %v4042_v5, 1 }
 0x1bb   : > { %1164 = vmatmul.mubr.f32.gmra.mrb[32].mxu1 %v3950_v18  ;;  %3118 = vmatprep.subr.bf16.mxu1 %v3117_v46  ;;  %v4219_v46 = vsel %vm841_vm0, %v867_v56, %v868_v11  ;;  %v3123_v62 = vpack.c.bf16 %v970_v40, %v969_v28  ;;  %v2360_v56 = vld [vmem:[%s4648_s3 + $0x390] sm:$0xff]  ;;  %v903_v14 = vsel %vm898_vm1, %v900_v26, %v902_v50  ;;  %v2362_v26 = vld [vmem:[%s4648_s3 + $0x3a0] sm:$0xff]  ;;  %v875_v50 = vrot.slane %v4067_v23, 1  ;;  %v2365_v23 = vld [vmem:[%s4648_s3 + $0x3b8] sm:$0xff] }
 0x1bc   : > { %2880 = vmatmul.mubr.f32.gmra.mrb[12].mxu0 %v4177_v58  ;;  %1168 = vmatprep.mubr.f32.mxu1 %v4188_v9 }
 0x1bd   : > { %3152 = vmatpush3.bf16.msra.mxu0 %v3149_v29  ;;  %2882 = vmatprep.mubr.f32.mxu0 %v4193_v13  ;;  %v870_v29 = vrot.slane %v4026_v59, 1  ;;  %v2361_v13 = vld [vmem:[%s4648_s3 + $0x398] sm:$0xff]  ;;  %v3159_v59 = vpack.c.bf16 %v2343_v0, %v2342_v61  ;;  %v2346_v0 = vld [vmem:[%s4648_s3 + $0x320] sm:$0xff] }
 0x1be   : > { %3154 = vmatprep.subr.bf16.mxu0 %v3153_v10  ;;  %3120 = vmatpush3.bf16.msra.mxu1 %v3119_v51  ;;  %v872_v51 = vrot.slane %v4039_v3, 1  ;;  %v3161_v28 = vpack.c.bf16 %v2361_v13, %v2360_v56  ;;  %v878_v56 = vrot.slane %v4083_v35, 1 }
 0x1bf   : > { %1169 = vmatmul.mubr.f32.gmra.mrb[34].mxu1 %v3959_v24  ;;  %3122 = vmatprep.subr.bf16.mxu1 %v3121_v39  ;;  %v4241_v48 = vsel %vm841_vm0, %v868_v11, %v870_v29  ;;  %v2344_v39 = vld [vmem:[%s4648_s3 + $0x310] sm:$0xff]  ;;  %v2363_v11 = vld [vmem:[%s4648_s3 + $0x3a8] sm:$0xff] }
 0x1c0   : > { %2883 = vmatmul.mubr.f32.gmra.mrb[14].mxu0 %v4216_v36  ;;  %1173 = vmatprep.mubr.f32.mxu1 %v4219_v46  ;;  %v4261_v40 = vsel %vm841_vm0, %v872_v51, %v873_v30  ;;  %v3165_v61 = vpack.c.bf16 %v2363_v11, %v2362_v26  ;;  %v2347_v29 = vld [vmem:[%s4648_s3 + $0x328] sm:$0xff]  ;;  %v2366_v51 = vld [vmem:[%s4648_s3 + $0x3c0] sm:$0xff] }
 0x1c1   : > { %3156 = vmatpush3.bf16.msra.mxu0 %v3153_v10  ;;  %2917 = vmatprep.mubr.f32.mxu0 %v901_v7  ;;  %v2345_v10 = vld [vmem:[%s4648_s3 + $0x318] sm:$0xff]  ;;  %v3167_v7 = vpack.c.bf16 %v2347_v29, %v2346_v0  ;;  %v2350_v11 = vld [vmem:[%s4648_s3 + $0x340] sm:$0xff]  ;;  %v1006_v29 = vrot.slane %v4122_v63, 1 }
 0x1c2   : > { %3158 = vmatprep.subr.bf16.mxu0 %v3157_v19  ;;  %3124 = vmatpush3.bf16.msra.mxu1 %v3123_v62  ;;  %v3163_v13 = vpack.c.bf16 %v2345_v10, %v2344_v39  ;;  %v4281_v19 = vsel %vm841_vm0, %v873_v30, %v875_v50  ;;  %v877_v62 = vrot.slane %v4080_v32, 1  ;;  %v2367_v30 = vld [vmem:[%s4648_s3 + $0x3c8] sm:$0xff]  ;;  %v880_v10 = vrot.slane %v4109_v54, 1  ;;  %v2368_v50 = vld [vmem:[%s4648_s3 + $0x3d0] sm:$0xff]  ;;  %v2369_v54 = vld [vmem:[%s4648_s3 + $0x3d8] sm:$0xff] }
 0x1c3   : > { %1174 = vmatmul.mubr.f32.gmra.mrb[36].mxu1 %v3997_v43  ;;  %v3173_v26 = vpack.c.bf16 %v2367_v30, %v2366_v51  ;;  %v1009_v51 = vrot.slane %v4150_v12, 1  ;;  %v2373_v12 = vld [vmem:[%s4648_s3 + $0x3f8] sm:$0xff] }
 0x1c4   : > { %2918 = vmatmul.mubr.f32.vlgmr.msra.gmra.mrb[0].mxu0 %v903_v14  ;;  %1178 = vmatprep.mubr.f32.mxu1 %v4241_v48  ;;  %v2348_v14 = vld [vmem:[%s4648_s3 + $0x330] sm:$0xff]  ;;  %v4302_v39 = vsel %vm841_vm0, %v877_v62, %v878_v56  ;;  %v4322_v0 = vsel %vm841_vm0, %v878_v56, %v880_v10  ;;  %v2353_v62 = vld [vmem:[%s4648_s3 + $0x358] sm:$0xff]  ;;  %v2370_v56 = vld [vmem:[%s4648_s3 + $0x3e0] sm:$0xff] }
 0x1c5   : > { %3160 = vmatpush3.bf16.msra.mxu0 %v3159_v59  ;;  %2920 = vmatprep.mubr.f32.mxu0 %v3862_v34  ;;  %v2364_v34 = vld [vmem:[%s4648_s3 + $0x3b0] sm:$0xff]  ;;  %v2355_v10 = vld [vmem:[%s4648_s3 + $0x368] sm:$0xff] }
 0x1c6   : > { %3162 = vmatprep.subr.bf16.mxu0 %v3161_v28  ;;  %v3169_v59 = vpack.c.bf16 %v2365_v23, %v2364_v34  ;;  %v1007_v34 = vrot.slane %v4125_v4, 1  ;;  %v3177_v23 = vpack.c.bf16 %v2369_v54, %v2368_v50  ;;  %v842_v50 = vrot.slane %v4163_v42, 1 }
 0x1c7   : > { %1179 = vmatmul.mubr.f32.gmra.mrb[38].mxu1 %v4000_v45  ;;  %v843_v54 = vrot.slane %v4166_v44, 1 }
 0x1c8   : > { %2921 = vmatmul.mubr.f32.gmra.mrb[2].mxu0 %v3927_v6  ;;  %1183 = vmatprep.mubr.f32.mxu1 %v4261_v40  ;;  %v2349_v6 = vld [vmem:[%s4648_s3 + $0x338] sm:$0xff] }
 0x1c9   : > { %3164 = vmatpush3.bf16.msra.mxu0 %v3163_v13  ;;  %2923 = vmatprep.mubr.f32.mxu0 %v3946_v15  ;;  %v3171_v28 = vpack.c.bf16 %v2349_v6, %v2348_v14  ;;  %v2351_v13 = vld [vmem:[%s4648_s3 + $0x348] sm:$0xff]  ;;  %v4343_v6 = vsel %vm841_vm0, %v1006_v29, %v1007_v34  ;;  %v2356_v29 = vld [vmem:[%s4648_s3 + $0x370] sm:$0xff] }
 0x1ca   : > { %3166 = vmatprep.subr.bf16.mxu0 %v3165_v61  ;;  %v3175_v61 = vpack.c.bf16 %v2351_v13, %v2350_v11  ;;  %v4363_v13 = vsel %vm841_vm0, %v1007_v34, %v1009_v51  ;;  %v2374_v34 = vld [vmem:[%s4648_s3 + $0x400] sm:$0xff]  ;;  %v2376_v51 = vld [vmem:[%s4648_s3 + $0x410] sm:$0xff] }
 0x1cb   : > { %1184 = vmatmul.mubr.f32.gmra.mrb[40].mxu1 %v4039_v3 }
 0x1cc   : > { %2924 = vmatmul.mubr.f32.gmra.mrb[4].mxu0 %v3970_v27  ;;  %1188 = vmatprep.mubr.f32.mxu1 %v4281_v19 }
 0x1cd   : > { %3168 = vmatpush3.bf16.msra.mxu0 %v3167_v7  ;;  %2926 = vmatprep.mubr.f32.mxu0 %v3987_v38  ;;  %v2352_v7 = vld [vmem:[%s4648_s3 + $0x350] sm:$0xff] }
 0x1ce   : > { %3170 = vmatprep.subr.bf16.mxu0 %v3169_v59  ;;  %v2371_v59 = vld [vmem:[%s4648_s3 + $0x3e8] sm:$0xff]  ;;  %v3179_v14 = vpack.c.bf16 %v2353_v62, %v2352_v7 }
 0x1cf   : > { %1189 = vmatmul.mubr.f32.gmra.mrb[42].mxu1 %v4042_v5  ;;  %v3181_v30 = vpack.c.bf16 %v2371_v59, %v2370_v56  ;;  %v2375_v7 = vld [vmem:[%s4648_s3 + $0x408] sm:$0xff]  ;;  %v844_v56 = vsel %vm841_vm0, %v842_v50, %v843_v54  ;;  %v845_v59 = vrot.slane %v4197_v2, 1 }
 0x1d0   : > { %2927 = vmatmul.mubr.f32.gmra.mrb[6].mxu0 %v4011_v49  ;;  %1193 = vmatprep.mubr.f32.mxu1 %v4302_v39 }
 0x1d1   : > { %3172 = vmatpush3.bf16.msra.mxu0 %v3171_v28  ;;  %2929 = vmatprep.mubr.f32.mxu0 %v4029_v60  ;;  %v2354_v28 = vld [vmem:[%s4648_s3 + $0x360] sm:$0xff]  ;;  %v846_v2 = vsel %vm841_vm0, %v843_v54, %v845_v59  ;;  %v2383_v54 = vld [vmem:[%s4648_s3 + $0x448] sm:$0xff] }
 0x1d2   : > { %3174 = vmatprep.subr.bf16.mxu0 %v3173_v26  ;;  %v2372_v26 = vld [vmem:[%s4648_s3 + $0x3f0] sm:$0xff]  ;;  %v3183_v11 = vpack.c.bf16 %v2355_v10, %v2354_v28  ;;  %v2378_v10 = vld [vmem:[%s4648_s3 + $0x420] sm:$0xff] }
 0x1d3   : > { %1194 = vmatmul.mubr.f32.gmra.mrb[44].mxu1 %v4080_v32 }
 0x1d4   : > { %2930 = vmatmul.mubr.f32.gmra.mrb[8].mxu0 %v4061_v16  ;;  %1198 = vmatprep.mubr.f32.mxu1 %v4322_v0 }
 0x1d5   : > { %3176 = vmatpush3.bf16.msra.mxu0 %v3175_v61  ;;  %2932 = vmatprep.mubr.f32.mxu0 %v4070_v25  ;;  %v3185_v61 = vpack.c.bf16 %v2373_v12, %v2372_v26  ;;  %v2379_v26 = vld [vmem:[%s4648_s3 + $0x428] sm:$0xff] }
 0x1d6   : > { %3178 = vmatprep.subr.bf16.mxu0 %v3177_v23  ;;  %v2357_v23 = vld [vmem:[%s4648_s3 + $0x378] sm:$0xff]  ;;  %v3197_v12 = vpack.c.bf16 %v2379_v26, %v2378_v10 }
 0x1d7   : > { %1199 = vmatmul.mubr.f32.gmra.mrb[46].mxu1 %v4083_v35  ;;  %v3187_v62 = vpack.c.bf16 %v2357_v23, %v2356_v29  ;;  %v4659_v29 = vld [vmem:[#allocation10_spill] sm:$0xff] }
 0x1d8   : > { %2933 = vmatmul.mubr.f32.gmra.mrb[10].mxu0 %v4094_v41  ;;  %1203 = vmatprep.mubr.f32.mxu1 %v4343_v6 }
 0x1d9   : > { %3180 = vmatpush3.bf16.msra.mxu0 %v3179_v14  ;;  %2935 = vmatprep.mubr.f32.mxu0 %v4112_v57  ;;  %v3189_v14 = vpack.c.bf16 %v2375_v7, %v2374_v34  ;;  %v2387_v34 = vld [vmem:[%s4648_s3 + $0x468] sm:$0xff]  ;;  %v2389_v7 = vld [vmem:[%s4648_s3 + $0x478] sm:$0xff] }
 0x1da   : > { %3182 = vmatprep.subr.bf16.mxu0 %v3181_v30  ;;  %v2377_v30 = vld [vmem:[%s4648_s3 + $0x418] sm:$0xff] }
 0x1db   : > { %1204 = vmatmul.mubr.f32.gmra.mrb[48].mxu1 %v4122_v63  ;;  %v3193_v28 = vpack.c.bf16 %v2377_v30, %v2376_v51 }
 0x1dc   : > { %2936 = vmatmul.mubr.f32.gmra.mrb[12].mxu0 %v4144_v22  ;;  %1208 = vmatprep.mubr.f32.mxu1 %v4363_v13 }
 0x1dd   : > { %3184 = vmatpush3.bf16.msra.mxu0 %v3183_v11  ;;  %2938 = vmatprep.mubr.f32.mxu0 %v4153_v37  ;;  %v2381_v11 = vld [vmem:[%s4648_s3 + $0x438] sm:$0xff] }
 0x1de   : > { %3186 = vmatprep.subr.bf16.mxu0 %v3185_v61  ;;  %v2385_v61 = vld [vmem:[%s4648_s3 + $0x458] sm:$0xff] }
 0x1df   : > { %1209 = vmatmul.mubr.f32.gmra.mrb[50].mxu1 %v4125_v4 }
 0x1e0   : > { %2939 = vmatmul.mubr.f32.gmra.mrb[14].mxu0 %v4177_v58  ;;  %1423 = vmatprep.mubr.f32.mxu1 %v844_v56 }
 0x1e1   : > { %3188 = vmatpush3.bf16.msra.mxu0 %v3187_v62  ;;  %1779 = vmatprep.mubr.f32.mxu0 %v3981_v31 }
 0x1e2   : > { %3190 = vmatprep.subr.bf16.mxu0 %v3189_v14 }
 0x1e3   : > { %1424 = vmatmul.mubr.f32.vlgmr.msra.gmra.mrb[52].mxu1 %v4163_v42  ;;  %v2380_v42 = vld [vmem:[%s4648_s3 + $0x430] sm:$0xff] }
 0x1e4   : > { %1780 = vmatmul.mubr.f32.vlgmr.msra.gmra.mrb[16].mxu0 %v3896_v52  ;;  %1428 = vmatprep.mubr.f32.mxu1 %v846_v2  ;;  %v3201_v50 = vpack.c.bf16 %v2381_v11, %v2380_v42 }
 0x1e5   : > { %3192 = vmatpush3.bf16.msra.mxu0 %v3189_v14  ;;  %1784 = vmatprep.mubr.f32.mxu0 %v4022_v55 }
 0x1e6   : > { %3194 = vmatprep.subr.bf16.mxu0 %v3193_v28 }
 0x1e7   : > { %1429 = vmatmul.mubr.f32.gmra.mrb[54].mxu1 %v4166_v44  ;;  %v2382_v44 = vld [vmem:[%s4648_s3 + $0x440] sm:$0xff] }
 0x1e8   : > { %1785 = vmatmul.mubr.f32.gmra.mrb[18].mxu0 %v3898_v53  ;;  %1433 = vmatprep.mubr.f32.mxu1 %v3859_v33  ;;  %v3205_v33 = vpack.c.bf16 %v2383_v54, %v2382_v44 }
 0x1e9   : > { %1789 = vmatprep.mubr.f32.mxu0 %v4064_v17  ;;  %3196 = vmatpush3.bf16.msra.mxu0 %v3193_v28 }
 0x1ea   : > { %3198 = vmatprep.subr.bf16.mxu0 %v3197_v12 }
 0x1eb   : > { %1434 = vmatmul.mubr.f32.gmra.mrb[56].mxu1 %v3830_v20  ;;  %v2384_v20 = vld [vmem:[%s4648_s3 + $0x450] sm:$0xff] }
 0x1ec   : > { %1790 = vmatmul.mubr.f32.gmra.mrb[20].mxu0 %v3916_v1  ;;  %1438 = vmatprep.mubr.f32.mxu1 %v3933_v8  ;;  %v4660_v8 = vld [vmem:[#allocation11_spill] sm:$0xff]  ;;  %v3209_v23 = vpack.c.bf16 %v2385_v61, %v2384_v20 }
 0x1ed   : > { %1794 = vmatprep.mubr.f32.mxu0 %v4105_v47  ;;  %3200 = vmatpush3.bf16.msra.mxu0 %v3197_v12 }
 0x1ee   : > { %3202 = vmatprep.subr.bf16.mxu0 %v3201_v50 }
 0x1ef   : > { %1439 = vmatmul.mubr.f32.gmra.mrb[58].mxu1 %v3832_v21  ;;  %v2386_v21 = vld [vmem:[%s4648_s3 + $0x460] sm:$0xff] }
 0x1f0   : > { %1795 = vmatmul.mubr.f32.gmra.mrb[22].mxu0 %v4659_v29  ;;  %1443 = vmatprep.mubr.f32.mxu1 %v3981_v31  ;;  %v3213_v31 = vpack.c.bf16 %v2387_v34, %v2386_v21 }
 0x1f1   : > { %1799 = vmatprep.mubr.f32.mxu0 %v4660_v8  ;;  %3204 = vmatpush3.bf16.msra.mxu0 %v3201_v50 }
 0x1f2   : > { %3206 = vmatprep.subr.bf16.mxu0 %v3205_v33 }
 0x1f3   : > { %1444 = vmatmul.mubr.f32.gmra.mrb[60].mxu1 %v3896_v52  ;;  %v2388_v52 = vld [vmem:[%s4648_s3 + $0x470] sm:$0xff] }
 0x1f4   : > { %1800 = vmatmul.mubr.f32.gmra.mrb[24].mxu0 %v3950_v18  ;;  %1448 = vmatprep.mubr.f32.mxu1 %v4022_v55  ;;  %v3217_v55 = vpack.c.bf16 %v2389_v7, %v2388_v52 }
 0x1f5   : > { %1804 = vmatprep.mubr.f32.mxu0 %v4188_v9  ;;  %3208 = vmatpush3.bf16.msra.mxu0 %v3205_v33 }
 0x1f6   : > { %3210 = vmatprep.subr.bf16.mxu0 %v3209_v23 }
 0x1f7   : > { %1449 = vmatmul.mubr.f32.gmra.mrb[62].mxu1 %v3898_v53  ;;  %v814_v53 = vld [vmem:[#allocation3 + $0xd8] sm:$0xff] }
 0x1f8   : > { %1805 = vmatmul.mubr.f32.gmra.mrb[26].mxu0 %v3959_v24  ;;  %1453 = vmatprep.mubr.f32.mxu1 %v4064_v17 }
 0x1f9   : > { %1809 = vmatprep.mubr.f32.mxu0 %v4219_v46  ;;  %3212 = vmatpush3.bf16.msra.mxu0 %v3209_v23 }
 0x1fa   : > { %3214 = vmatprep.subr.bf16.mxu0 %v3213_v31 }
 0x1fb   : > { %1454 = vmatmul.mubr.f32.gmra.mrb[64].mxu1 %v3916_v1  ;;  %v815_v1 = vld [vmem:[#allocation3 + $0xe0] sm:$0xff] }
 0x1fc   : > { %1810 = vmatmul.mubr.f32.gmra.mrb[28].mxu0 %v3997_v43  ;;  %1458 = vmatprep.mubr.f32.mxu1 %v4105_v47 }
 0x1fd   : > { %1814 = vmatprep.mubr.f32.mxu0 %v4241_v48  ;;  %3216 = vmatpush3.bf16.msra.mxu0 %v3213_v31 }
 0x1fe   : > { %3218 = vmatprep.subr.bf16.mxu0 %v3217_v55 }
 0x1ff   : > { %1459 = vmatmul.mubr.f32.gmra.mrb[66].mxu1 %v4659_v29 }
 0x200   : > { %1815 = vmatmul.mubr.f32.gmra.mrb[30].mxu0 %v4000_v45  ;;  %1463 = vmatprep.mubr.f32.mxu1 %v4660_v8 }
 0x201   : > { %1819 = vmatprep.mubr.f32.mxu0 %v4261_v40  ;;  %3220 = vmatpush3.bf16.msra.mxu0 %v3217_v55 }
 0x203   : > { %1464 = vmatmul.mubr.f32.gmra.mrb[68].mxu1 %v3950_v18  ;;  %v1652_v18 = vrot.slane %v814_v53, 1 }
 0x204   : > { %1820 = vmatmul.mubr.f32.gmra.mrb[32].mxu0 %v4039_v3  ;;  %1468 = vmatprep.mubr.f32.mxu1 %v4188_v9 }
 0x205   : > { %1824 = vmatprep.mubr.f32.mxu0 %v4281_v19 }
 0x207   : > { %1469 = vmatmul.mubr.f32.gmra.mrb[70].mxu1 %v3959_v24  ;;  %v1653_v24 = vrot.slane %v815_v1, 1 }
 0x208   : > { %1825 = vmatmul.mubr.f32.gmra.mrb[34].mxu0 %v4042_v5  ;;  %1473 = vmatprep.mubr.f32.mxu1 %v4219_v46 }
 0x209   : > { %1829 = vmatprep.mubr.f32.mxu0 %v4302_v39 }
 0x20b   : > { %1474 = vmatmul.mubr.f32.gmra.mrb[72].mxu1 %v3997_v43  ;;  %v816_v43 = vld [vmem:[#allocation3 + $0xe8] sm:$0x3] }
 0x20c   : > { %1830 = vmatmul.mubr.f32.gmra.mrb[36].mxu0 %v4080_v32  ;;  %1478 = vmatprep.mubr.f32.mxu1 %v4241_v48  ;;  %v1655_v17 = vrot.slane %v816_v43, 1 }
 0x20d   : > { %1834 = vmatprep.mubr.f32.mxu0 %v4322_v0 }
 0x20e   : > { %v1656_v47 = vsel %vm841_vm0, %v1653_v24, %v1655_v17 }
 0x20f   : > { %1479 = vmatmul.mubr.f32.gmra.mrb[74].mxu1 %v4000_v45  ;;  %v1654_v45 = vsel %vm841_vm0, %v1652_v18, %v1653_v24 }
 0x210   : > { %1835 = vmatmul.mubr.f32.gmra.mrb[38].mxu0 %v4083_v35  ;;  %1483 = vmatprep.mubr.f32.mxu1 %v4261_v40 }
 0x211   : > { %1839 = vmatprep.mubr.f32.mxu0 %v4343_v6 }
 0x213   : > { %1484 = vmatmul.mubr.f32.gmra.mrb[76].mxu1 %v4039_v3 }
 0x214   : > { %1840 = vmatmul.mubr.f32.gmra.mrb[40].mxu0 %v4122_v63  ;;  %1488 = vmatprep.mubr.f32.mxu1 %v4281_v19 }
 0x215   : > { %1844 = vmatprep.mubr.f32.mxu0 %v4363_v13 }
 0x217   : > { %1489 = vmatmul.mubr.f32.gmra.mrb[78].mxu1 %v4042_v5 }
 0x218   : > { %1845 = vmatmul.mubr.f32.gmra.mrb[42].mxu0 %v4125_v4  ;;  %1493 = vmatprep.mubr.f32.mxu1 %v4302_v39 }
 0x219   : > { %1849 = vmatprep.mubr.f32.mxu0 %v1654_v45 }
 0x21b   : > { %1494 = vmatmul.mubr.f32.gmra.mrb[80].mxu1 %v4080_v32 }
 0x21c   : > { %1850 = vmatmul.mubr.f32.gmra.mrb[44].mxu0 %v814_v53  ;;  %1498 = vmatprep.mubr.f32.mxu1 %v4322_v0 }
 0x21d   : > { %1854 = vmatprep.mubr.f32.mxu0 %v1656_v47 }
 0x21f   : > { %1499 = vmatmul.mubr.f32.gmra.mrb[82].mxu1 %v4083_v35 }
 0x220   : > { %1855 = vmatmul.mubr.f32.gmra.mrb[46].mxu0 %v815_v1 }
 0x221   : > { %2973 = vmatprep.mubr.f32.mxu0 %v3946_v15  ;;  %v1659_v15 = vrot.slane %v814_v53, 2 }
 0x224   : > { %2974 = vmatmul.mubr.f32.vlgmr.msra.gmra.mrb[0].mxu0 %v3970_v27  ;;  %v1660_v27 = vrot.slane %v815_v1, 2 }
 0x225   : > { %2976 = vmatprep.mubr.f32.mxu0 %v3987_v38  ;;  %v4661_v38 = vld [vmem:[#allocation12_spill] sm:$0xff] }
 0x228   : > { %2977 = vmatmul.mubr.f32.gmra.mrb[2].mxu0 %v4011_v49  ;;  %v1662_v49 = vrot.slane %v816_v43, 2 }
 0x229   : > { %2979 = vmatprep.mubr.f32.mxu0 %v4029_v60  ;;  %v1661_v60 = vsel %vm898_vm1, %v1659_v15, %v1660_v27 }
 0x22a   : > { %v1663_v3 = vsel %vm898_vm1, %v1660_v27, %v1662_v49 }
 0x22c   : > { %2980 = vmatmul.mubr.f32.gmra.mrb[4].mxu0 %v4061_v16 }
 0x22d   : > { %2982 = vmatprep.mubr.f32.mxu0 %v4070_v25 }
 0x230   : > { %2983 = vmatmul.mubr.f32.gmra.mrb[6].mxu0 %v4094_v41 }
 0x231   : > { %2985 = vmatprep.mubr.f32.mxu0 %v4112_v57 }
 0x234   : > { %2986 = vmatmul.mubr.f32.gmra.mrb[8].mxu0 %v4144_v22 }
 0x235   : > { %2988 = vmatprep.mubr.f32.mxu0 %v4153_v37 }
 0x238   : > { %2989 = vmatmul.mubr.f32.gmra.mrb[10].mxu0 %v4177_v58 }
 0x239   : > { %2991 = vmatprep.mubr.f32.mxu0 %v4661_v38 }
 0x23c   : > { %2992 = vmatmul.mubr.f32.gmra.mrb[12].mxu0 %v4216_v36 }
 0x23d   : > { %2994 = vmatprep.mubr.f32.mxu0 %v1661_v60 }
 0x240   : > { %2995 = vmatmul.mubr.f32.gmra.mrb[14].mxu0 %v1663_v3 }
 0x276   : > { %v2463_v5 = vpop.f32.mrb[20].mxu1 }
 0x277   : > { %v2464_v16 = vpop.f32.mrb[21].mxu1 }
 0x278   : > { %v2465_v25 = vadd.f32 %v2464_v16, %v2463_v5 }
 0x27a   : > { %v2466_v32 = vpop.f32.mrb[22].mxu1 }
 0x27b   : > { %v2467_v35 = vpop.f32.mrb[23].mxu1 }
 0x27c   : > { %v2468_v41 = vadd.f32 %v2467_v35, %v2466_v32 }
 0x27e   : > { %v2469_v57 = vpop.f32.mrb[24].mxu1 }
 0x27f   : > { %v2470_v63 = vpop.f32.mrb[25].mxu1 }
 0x280   : > { %v2471_v4 = vadd.f32 %v2470_v63, %v2469_v57 }
 0x282   : > { %v2472_v22 = vpop.f32.mrb[26].mxu1 }
 0x283   : > { %v2473_v37 = vpop.f32.mrb[27].mxu1 }
 0x284   : > { %v4506_v58 = vadd.f32 %v2473_v37, %v2472_v22 }
 0x286   : > { %v2475_v9 = vpop.f32.mrb[28].mxu1 }
 0x287   : > { %v2476_v46 = vpop.f32.mrb[29].mxu1 }
 0x288   : > { %v4508_v36 = vadd.f32 %v2476_v46, %v2475_v9 }
 0x28a   : > { %v2478_v48 = vpop.f32.mrb[30].mxu1 }
 0x28b   : > { %v2479_v40 = vpop.f32.mrb[31].mxu1 }
 0x28c   : > { %v4510_v19 = vadd.f32 %v2479_v40, %v2478_v48 }
 0x28e   : > { %v2481_v39 = vpop.f32.mrb[32].mxu1 }
 0x28f   : > { %v2482_v0 = vpop.f32.mrb[33].mxu1 }
 0x290   : > { %v4512_v6 = vadd.f32 %v2482_v0, %v2481_v39 }
 0x292   : > { %v2484_v13 = vpop.f32.mrb[34].mxu1 }
 0x293   : > { %v2485_v62 = vpop.f32.mrb[35].mxu1 }
 0x294   : > { %v4514_v56 = vadd.f32 %v2485_v62, %v2484_v13 }
 0x296   : > { %v2487_v59 = vpop.f32.mrb[36].mxu1 }
 0x297   : > { %v2488_v14 = vpop.f32.mrb[37].mxu1 }
 0x298   : > { %v4516_v51 = vadd.f32 %v2488_v14, %v2487_v59 }
 0x29a   : > { %v2490_v30 = vpop.f32.mrb[38].mxu1 }
 0x29b   : > { %v2491_v2 = vpop.f32.mrb[39].mxu1 }
 0x29c   : > { %v4518_v28 = vadd.f32 %v2491_v2, %v2490_v30 }
 0x29e   : > { %v2493_v10 = vpop.f32.mrb[40].mxu1 }
 0x29f   : > { %v2494_v26 = vpop.f32.mrb[41].mxu1 }
 0x2a0   : > { %v4520_v12 = vadd.f32 %v2494_v26, %v2493_v10 }
 0x2a2   : > { %v2496_v42 = vpop.f32.mrb[42].mxu1 }
 0x2a3   : > { %v2497_v11 = vpop.f32.mrb[43].mxu1 }
 0x2a4   : > { %v4522_v50 = vadd.f32 %v2497_v11, %v2496_v42 }
 0x2a6   : > { %v2499_v44 = vpop.f32.mrb[44].mxu1 }
 0x2a7   : > { %v2500_v54 = vpop.f32.mrb[45].mxu1 }
 0x2a8   : > { %v4524_v33 = vadd.f32 %v2500_v54, %v2499_v44 }
 0x2aa   : > { %v2502_v20 = vpop.f32.mrb[46].mxu1 }
 0x2ab   : > { %v2503_v61 = vpop.f32.mrb[47].mxu1 }
 0x2ac   : > { %v4526_v29 = vadd.f32 %v2503_v61, %v2502_v20 }
 0x2ae   : > { %v2505_v8 = vpop.f32.mrb[48].mxu1 }
 0x2af   : > { %v2506_v23 = vpop.f32.mrb[49].mxu1 }
 0x2b0   : > { %v4528_v21 = vadd.f32 %v2506_v23, %v2505_v8 }
 0x2b2   : > { %v2508_v34 = vpop.f32.mrb[50].mxu1 }
 0x2b3   : > { %v2509_v31 = vpop.f32.mrb[51].mxu1 }
 0x2b4   : > { %v4530_v52 = vadd.f32 %v2509_v31, %v2508_v34 }
 0x2b6   : > { %v2575_v7 = vpop.f32.mrb[52].mxu1 }
 0x2b7   : > { %v2687_v55 = vpop.f32.mrb[16].mxu0  ;;  %v2576_v53 = vpop.f32.mrb[53].mxu1 }
 0x2b8   : > { %v2577_v1 = vadd.f32 %v2576_v53, %v2575_v7  ;;  %v2688_v18 = vpop.f32.mrb[17].mxu0 }
 0x2b9   : > { %v2689_v24 = vadd.f32 %v2688_v18, %v2687_v55 }
 0x2ba   : > { %v3224_v43 = vadd.f32 %v2577_v1, %v2465_v25  ;;  %v2578_v45 = vpop.f32.mrb[54].mxu1 }
 0x2bb   : > { %v2690_v17 = vpop.f32.mrb[18].mxu0  ;;  %v2579_v47 = vpop.f32.mrb[55].mxu1 }
 0x2bc   : > { %v2580_v15 = vadd.f32 %v2579_v47, %v2578_v45  ;;  %v2691_v27 = vpop.f32.mrb[19].mxu0  ;;  %v4532_v38 = vadd.f32 %v3224_v43, %v2689_v24 }
 0x2bd   : > { %v2692_v49 = vadd.f32 %v2691_v27, %v2690_v17 }
 0x2be   : > { %v3221_v60 = vadd.f32 %v2580_v15, %v2468_v41  ;;  %v2581_v3 = vpop.f32.mrb[56].mxu1 }
 0x2bf   : > { %v2693_v5 = vpop.f32.mrb[20].mxu0  ;;  %v2582_v16 = vpop.f32.mrb[57].mxu1 }
 0x2c0   : > { %v2583_v32 = vadd.f32 %v2582_v16, %v2581_v3  ;;  %v2694_v35 = vpop.f32.mrb[21].mxu0  ;;  %v4534_v57 = vadd.f32 %v3221_v60, %v2692_v49 }
 0x2c1   : > { %v2695_v63 = vadd.f32 %v2694_v35, %v2693_v5 }
 0x2c2   : > { %v3230_v22 = vadd.f32 %v2583_v32, %v2471_v4  ;;  %v2584_v37 = vpop.f32.mrb[58].mxu1 }
 0x2c3   : > { %v2696_v25 = vpop.f32.mrb[22].mxu0  ;;  %v2585_v9 = vpop.f32.mrb[59].mxu1 }
 0x2c4   : > { %v2586_v46 = vadd.f32 %v2585_v9, %v2584_v37  ;;  %v2697_v48 = vpop.f32.mrb[23].mxu0  ;;  %v4536_v40 = vadd.f32 %v3230_v22, %v2695_v63 }
 0x2c5   : > { %v2698_v39 = vadd.f32 %v2697_v48, %v2696_v25 }
 0x2c6   : > { %v3227_v0 = vadd.f32 %v2586_v46, %v4506_v58  ;;  %v2587_v41 = vpop.f32.mrb[60].mxu1 }
 0x2c7   : > { %v2699_v13 = vpop.f32.mrb[24].mxu0  ;;  %v2588_v62 = vpop.f32.mrb[61].mxu1 }
 0x2c8   : > { %v2589_v59 = vadd.f32 %v2588_v62, %v2587_v41  ;;  %v2700_v14 = vpop.f32.mrb[25].mxu0  ;;  %v4539_v30 = vadd.f32 %v3227_v0, %v2698_v39 }
 0x2c9   : > { %v2701_v2 = vadd.f32 %v2700_v14, %v2699_v13 }
 0x2ca   : > { %v3236_v4 = vadd.f32 %v2589_v59, %v4508_v36  ;;  %v2590_v10 = vpop.f32.mrb[62].mxu1 }
 0x2cb   : > { %v2702_v26 = vpop.f32.mrb[26].mxu0  ;;  %v2591_v42 = vpop.f32.mrb[63].mxu1 }
 0x2cc   : > { %v2592_v11 = vadd.f32 %v2591_v42, %v2590_v10  ;;  %v2703_v44 = vpop.f32.mrb[27].mxu0  ;;  %v4542_v54 = vadd.f32 %v3236_v4, %v2701_v2 }
 0x2cd   : > { %v2704_v20 = vadd.f32 %v2703_v44, %v2702_v26 }
 0x2ce   : > { %v3233_v58 = vadd.f32 %v2592_v11, %v4510_v19  ;;  %v2593_v61 = vpop.f32.mrb[64].mxu1 }
 0x2cf   : > { %v2705_v8 = vpop.f32.mrb[28].mxu0  ;;  %v2594_v23 = vpop.f32.mrb[65].mxu1 }
 0x2d0   : > { %v2595_v34 = vadd.f32 %v2594_v23, %v2593_v61  ;;  %v2706_v31 = vpop.f32.mrb[29].mxu0  ;;  %v4545_v7 = vadd.f32 %v3233_v58, %v2704_v20 }
 0x2d1   : > { %v2707_v55 = vadd.f32 %v2706_v31, %v2705_v8 }
 0x2d2   : > { %v3242_v36 = vadd.f32 %v2595_v34, %v4512_v6  ;;  %v2596_v53 = vpop.f32.mrb[66].mxu1 }
 0x2d3   : > { %v2708_v1 = vpop.f32.mrb[30].mxu0  ;;  %v2597_v18 = vpop.f32.mrb[67].mxu1 }
 0x2d4   : > { %v2598_v24 = vadd.f32 %v2597_v18, %v2596_v53  ;;  %v2709_v43 = vpop.f32.mrb[31].mxu0  ;;  %v4548_v45 = vadd.f32 %v3242_v36, %v2707_v55 }
 0x2d5   : > { %v2710_v17 = vadd.f32 %v2709_v43, %v2708_v1 }
 0x2d6   : > { %v3239_v19 = vadd.f32 %v2598_v24, %v4514_v56  ;;  %v2599_v47 = vpop.f32.mrb[68].mxu1 }
 0x2d7   : > { %v2711_v15 = vpop.f32.mrb[32].mxu0  ;;  %v2600_v27 = vpop.f32.mrb[69].mxu1 }
 0x2d8   : > { %v2601_v49 = vadd.f32 %v2600_v27, %v2599_v47  ;;  %v2712_v60 = vpop.f32.mrb[33].mxu0  ;;  %v4551_v3 = vadd.f32 %v3239_v19, %v2710_v17 }
 0x2d9   : > { %v2713_v5 = vadd.f32 %v2712_v60, %v2711_v15 }
 0x2da   : > { %v3248_v6 = vadd.f32 %v2601_v49, %v4516_v51  ;;  %v2602_v16 = vpop.f32.mrb[70].mxu1 }
 0x2db   : > { %v2714_v32 = vpop.f32.mrb[34].mxu0  ;;  %v2603_v35 = vpop.f32.mrb[71].mxu1 }
 0x2dc   : > { %v2604_v63 = vadd.f32 %v2603_v35, %v2602_v16  ;;  %v2715_v22 = vpop.f32.mrb[35].mxu0  ;;  %v4554_v37 = vadd.f32 %v3248_v6, %v2713_v5 }
 0x2dd   : > { %v2716_v25 = vadd.f32 %v2715_v22, %v2714_v32 }
 0x2de   : > { %v3245_v56 = vadd.f32 %v2604_v63, %v4518_v28  ;;  %v2605_v9 = vpop.f32.mrb[72].mxu1  ;;  %v4578_v63 = vld [vmem:[%s4649_s4] ss:$0 sm:$0xff] }
 0x2df   : > { %v2717_v46 = vpop.f32.mrb[36].mxu0  ;;  %v2606_v48 = vpop.f32.mrb[73].mxu1 }
 0x2e0   : > { %v2607_v39 = vadd.f32 %v2606_v48, %v2605_v9  ;;  %v2718_v0 = vpop.f32.mrb[37].mxu0  ;;  %v4557_v41 = vadd.f32 %v3245_v56, %v2716_v25 }
 0x2e1   : > { %v2719_v13 = vadd.f32 %v2718_v0, %v2717_v46 }
 0x2e2   : > { %v3254_v51 = vadd.f32 %v2607_v39, %v4520_v12  ;;  %v2608_v62 = vpop.f32.mrb[74].mxu1 }
 0x2e3   : > { %v2720_v59 = vpop.f32.mrb[38].mxu0  ;;  %v2609_v14 = vpop.f32.mrb[75].mxu1 }
 0x2e4   : > { %v2610_v2 = vadd.f32 %v2609_v14, %v2608_v62  ;;  %v2721_v4 = vpop.f32.mrb[39].mxu0  ;;  %v4560_v10 = vadd.f32 %v3254_v51, %v2719_v13 }
 0x2e5   : > { %v2722_v26 = vadd.f32 %v2721_v4, %v2720_v59 }
 0x2e6   : > { %v3251_v28 = vadd.f32 %v2610_v2, %v4522_v50  ;;  %v2611_v42 = vpop.f32.mrb[76].mxu1 }
 0x2e7   : > { %v2723_v11 = vpop.f32.mrb[40].mxu0  ;;  %v2612_v44 = vpop.f32.mrb[77].mxu1 }
 0x2e8   : > { %v2613_v20 = vadd.f32 %v2612_v44, %v2611_v42  ;;  %v2724_v58 = vpop.f32.mrb[41].mxu0  ;;  %v4563_v61 = vadd.f32 %v3251_v28, %v2722_v26 }
 0x2e9   : > { %v2725_v8 = vadd.f32 %v2724_v58, %v2723_v11 }
 0x2ea   : > { %v3260_v12 = vadd.f32 %v2613_v20, %v4524_v33  ;;  %v2614_v23 = vpop.f32.mrb[78].mxu1 }
 0x2eb   : > { %v2726_v34 = vpop.f32.mrb[42].mxu0  ;;  %v2615_v31 = vpop.f32.mrb[79].mxu1 }
 0x2ec   : > { %v2616_v55 = vadd.f32 %v2615_v31, %v2614_v23  ;;  %v2727_v36 = vpop.f32.mrb[43].mxu0  ;;  %v4566_v53 = vadd.f32 %v3260_v12, %v2725_v8 }
 0x2ed   : > { %v2728_v1 = vadd.f32 %v2727_v36, %v2726_v34 }
 0x2ee   : > { %v3257_v50 = vadd.f32 %v2616_v55, %v4526_v29  ;;  %v2617_v18 = vpop.f32.mrb[80].mxu1 }
 0x2ef   : > { %v2729_v24 = vpop.f32.mrb[44].mxu0  ;;  %v2618_v43 = vpop.f32.mrb[81].mxu1 }
 0x2f0   : > { %v2619_v17 = vadd.f32 %v2618_v43, %v2617_v18  ;;  %v2730_v19 = vpop.f32.mrb[45].mxu0  ;;  %v4569_v47 = vadd.f32 %v3257_v50, %v2728_v1 }
 0x2f1   : > { %v2731_v15 = vadd.f32 %v2730_v19, %v2729_v24 }
 0x2f2   : > { %v3266_v33 = vadd.f32 %v2619_v17, %v4528_v21  ;;  %v2620_v27 = vpop.f32.mrb[82].mxu1 }
 0x2f3   : > { %v2732_v49 = vpop.f32.mrb[46].mxu0  ;;  %v2621_v60 = vpop.f32.mrb[83].mxu1 }
 0x2f4   : > { %v2622_v5 = vadd.f32 %v2621_v60, %v2620_v27  ;;  %v2733_v6 = vpop.f32.mrb[47].mxu0  ;;  %v4572_v16 = vadd.f32 %v3266_v33, %v2731_v15 }
 0x2f5   : > { %v2734_v32 = vadd.f32 %v2733_v6, %v2732_v49 }
 0x2f6   : > { %v3263_v29 = vadd.f32 %v2622_v5, %v4530_v52 }
 0x2f7   : > { %v2975_v35 = vpop.f32.mrb[0].mxu0 }
 0x2f8   : > { %v3223_v21 = vadd.f32 %v4534_v57, %v2975_v35  ;;  %v1926_v22 = vpop.f32.mrb[1].mxu0  ;;  %v4581_v25 = vadd.f32 %v3263_v29, %v2734_v32 }
 0x2f9   : > { %v3226_v56 = vadd.f32 %v4532_v38, %v1926_v22 }
 0x2fa   : > { %v2029_v9 = vadd.f32 %v3223_v21, %v4578_v63 }
 0x2fb   : > { %v2028_v46 = vadd.f32 %v3226_v56, %v4578_v63  ;;  %v2978_v48 = vpop.f32.mrb[2].mxu0 }
 0x2fc   : > { %v2045_v52 = vmax.f32 %v2029_v9, 0.0  ;;  %v3229_v39 = vadd.f32 %v4539_v30, %v2978_v48  ;;  %v1936_v0 = vpop.f32.mrb[3].mxu0 }
 0x2fd   : > { %v2044_v13 = vmax.f32 %v2028_v46, 0.0  ;;  %v3232_v51 = vadd.f32 %v4536_v40, %v1936_v0 }
 0x2fe   : > { %2061 = vst [vmem:[%s3469_s12 + $0x8] sm:$0xff] %v2045_v52  ;;  %v2031_v57 = vadd.f32 %v3229_v39, %v4578_v63 }
 0x2ff   : > { %2060 = vst [vmem:[%s3469_s12] sm:$0xff] %v2044_v13  ;;  %v2030_v38 = vadd.f32 %v3232_v51, %v4578_v63  ;;  %v2981_v62 = vpop.f32.mrb[4].mxu0 }
 0x300   : > { %v2047_v59 = vmax.f32 %v2031_v57, 0.0  ;;  %v3235_v14 = vadd.f32 %v4545_v7, %v2981_v62  ;;  %v1946_v2 = vpop.f32.mrb[5].mxu0 }
 0x301   : > { %v2046_v4 = vmax.f32 %v2030_v38, 0.0  ;;  %v3238_v30 = vadd.f32 %v4542_v54, %v1946_v2 }
 0x302   : > { %2063 = vst [vmem:[%s3469_s12 + $0x18] sm:$0xff] %v2047_v59  ;;  %v2033_v26 = vadd.f32 %v3235_v14, %v4578_v63 }
 0x303   : > { %2062 = vst [vmem:[%s3469_s12 + $0x10] sm:$0xff] %v2046_v4  ;;  %v2032_v40 = vadd.f32 %v3238_v30, %v4578_v63  ;;  %v2984_v28 = vpop.f32.mrb[6].mxu0 }
 0x304   : > { %v2049_v42 = vmax.f32 %v2033_v26, 0.0  ;;  %v3241_v11 = vadd.f32 %v4551_v3, %v2984_v28  ;;  %v1956_v44 = vpop.f32.mrb[7].mxu0 }
 0x305   : > { %v2048_v20 = vmax.f32 %v2032_v40, 0.0  ;;  %v3244_v7 = vadd.f32 %v4548_v45, %v1956_v44 }
 0x306   : > { %2065 = vst [vmem:[%s3469_s12 + $0x28] sm:$0xff] %v2049_v42  ;;  %v2035_v58 = vadd.f32 %v3241_v11, %v4578_v63 }
 0x307   : > { %2064 = vst [vmem:[%s3469_s12 + $0x20] sm:$0xff] %v2048_v20  ;;  %v2034_v54 = vadd.f32 %v3244_v7, %v4578_v63  ;;  %v2987_v8 = vpop.f32.mrb[8].mxu0 }
 0x308   : > { %v2051_v12 = vmax.f32 %v2035_v58, 0.0  ;;  %v3247_v23 = vadd.f32 %v4557_v41, %v2987_v8  ;;  %v1966_v34 = vpop.f32.mrb[9].mxu0 }
 0x309   : > { %v2050_v31 = vmax.f32 %v2034_v54, 0.0  ;;  %v3250_v3 = vadd.f32 %v4554_v37, %v1966_v34 }
 0x30a   : > { %2067 = vst [vmem:[%s3469_s12 + $0x38] sm:$0xff] %v2051_v12  ;;  %v2037_v55 = vadd.f32 %v3247_v23, %v4578_v63 }
 0x30b   : > { %2066 = vst [vmem:[%s3469_s12 + $0x30] sm:$0xff] %v2050_v31  ;;  %v2036_v45 = vadd.f32 %v3250_v3, %v4578_v63  ;;  %v2990_v36 = vpop.f32.mrb[10].mxu0 }
 0x30c   : > { %v2053_v1 = vmax.f32 %v2037_v55, 0.0  ;;  %v3253_v50 = vadd.f32 %v4563_v61, %v2990_v36  ;;  %v1976_v18 = vpop.f32.mrb[11].mxu0 }
 0x30d   : > { %v2052_v24 = vmax.f32 %v2036_v45, 0.0  ;;  %v3256_v41 = vadd.f32 %v4560_v10, %v1976_v18 }
 0x30e   : > { %2069 = vst [vmem:[%s3469_s12 + $0x48] sm:$0xff] %v2053_v1  ;;  %v2039_v43 = vadd.f32 %v3253_v50, %v4578_v63 }
 0x30f   : > { %2068 = vst [vmem:[%s3469_s12 + $0x40] sm:$0xff] %v2052_v24  ;;  %v2038_v37 = vadd.f32 %v3256_v41, %v4578_v63  ;;  %v2993_v17 = vpop.f32.mrb[12].mxu0 }
 0x310   : > { %v2055_v19 = vmax.f32 %v2039_v43, 0.0  ;;  %v3259_v15 = vadd.f32 %v4569_v47, %v2993_v17  ;;  %v1986_v33 = vpop.f32.mrb[13].mxu0 }
 0x311   : > { %v2054_v27 = vmax.f32 %v2038_v37, 0.0  ;;  %v3262_v61 = vadd.f32 %v4566_v53, %v1986_v33 }
 0x312   : > { %2071 = vst [vmem:[%s3469_s12 + $0x58] sm:$0xff] %v2055_v19  ;;  %v2041_v10 = vadd.f32 %v3259_v15, %v4578_v63 }
 0x313   : > { %2070 = vst [vmem:[%s3469_s12 + $0x50] sm:$0xff] %v2054_v27  ;;  %v2040_v49 = vadd.f32 %v3262_v61, %v4578_v63  ;;  %v2996_v60 = vpop.f32.mrb[14].mxu0 }
 0x314   : > { %v2057_v5 = vmax.f32 %v2041_v10, 0.0  ;;  %v3265_v6 = vadd.f32 %v4581_v25, %v2996_v60  ;;  %v1996_v32 = vpop.f32.mrb[15].mxu0 }
 0x315   : > { %v2056_v29 = vmax.f32 %v2040_v49, 0.0  ;;  %v3268_v47 = vadd.f32 %v4572_v16, %v1996_v32 }
 0x316   : > { %2073 = vst [vmem:[%s3469_s12 + $0x68] sm:$0xff] %v2057_v5  ;;  %v2043_v35 = vadd.f32 %v3265_v6, %v4578_v63 }
 0x317   : > { %2072 = vst [vmem:[%s3469_s12 + $0x60] sm:$0xff] %v2056_v29  ;;  %v2042_v53 = vadd.f32 %v3268_v47, %v4578_v63 }
 0x318   : > { %v2059_v21 = vmax.f32 %v2043_v35, 0.0 }
 0x319   : > { %v2058_v22 = vmax.f32 %v2042_v53, 0.0 }
 0x31a   : > { %2075 = vst [vmem:[%s3469_s12 + $0x78] sm:$0xff] %v2059_v21 }
 0x31b   : > { %2074 = vst [vmem:[%s3469_s12 + $0x70] sm:$0xff] %v2058_v22 }
 0x31c PF: > { %s15_s22 = sadd.s32 1, %s3391_s22   ;;  %s4662_s18 = smov %s3383_s20 }
 0x31d   : > { %p12_p3 = scmp.ge.s32.totalorder %s15_s22, 6   ;;  %s4663_s19 = smov %s3387_s21 }
 0x31e   : > { %s4664_s20 = smov %s4667_s23  ;;  %s4665_s21 = smov %s4671_s24 }
 0x31f   :  { %14 = sbr.rel (!%p12_p3) target bundleno = 3 (0x3), region = 232 }
 0x326   :  { %2108 = vsyncmov [#allocation4] }
 0x329   :  { %s2109_s12 = vpop.sfrf %2108 }
 0x32a   :  { %p2393_p4 = scmp.ne.s32.totalorder %s2109_s12, 0 }
 0x32c   :  { %2113 = shalt.err (%p2393_p4)  }
 0x32d   :  { %2115 = vsyncmov [#allocation4 + $0x1] }
 0x330   :  { %s2116_s15 = vpop.sfrf %2115 }
 0x331   :  { %p2394_p5 = scmp.ne.s32.totalorder %s2116_s15, 0 }
 0x333   :  { %2120 = shalt.err (%p2394_p5)  }

</bundles_post_ra>
